<compile_context>
chip_gen: v7x
topology: tpu7x:2x2x1
jax: 0.10.0
libtpu: 0.0.40
codegen_flags: <defaults>
</compile_context>

<pallas_src>
import numpy as np
import jax
import jax.numpy as jnp
from jax import lax
from jax.experimental import pallas as pl
from jax.experimental.pallas import tpu as pltpu

EPS = 1e-5
_PREC = lax.Precision.HIGHEST


def _dot(a, b):
    return jnp.dot(a, b, preferred_element_type=jnp.float32, precision=_PREC)


# ----------------------- host-side (one-time) matrix builders ----------------

def _build_T(w, stride, padding, W, OW):
    """T_kh[(ci,iw), (co,ow)] = w[ci, co, kh, ow + padding - iw*stride] (if valid).

    w: PyTorch ConvTranspose2d weight [Cin, Cout, K, K]."""
    w = np.asarray(w, np.float32)
    Cin, Cout, K, _ = w.shape
    T = np.zeros((K, Cin * W, Cout * OW), np.float32)
    for kh in range(K):
        for iw in range(W):
            for kw in range(K):
                ow = iw * stride - padding + kw
                if 0 <= ow < OW:
                    # rows ci*W+iw, cols co*OW+ow
                    T[kh, iw::W, ow::OW] = w[:, :, kh, kw]
    return T


def _build_R(H, OH, N, stride, padding, K, batch_major_out=False):
    """0/1 row-selection: output row (oh,n) takes input row (ih,n) when
    oh == ih*stride - padding + kh.  Input rows are ordered ih*N + n; output
    rows oh*N + n (hidden layers) or n*OH + oh (final layer)."""
    R = np.zeros((K, OH * N, H * N), np.float32)
    for kh in range(K):
        for ih in range(H):
            oh = ih * stride - padding + kh
            if 0 <= oh < OH:
                for n in range(N):
                    r = (n * OH + oh) if batch_major_out else (oh * N + n)
                    R[kh, r, ih * N + n] = 1.0
    return R


def _build_B(Cout, OW):
    """0/1 channel-block matrix: column co*OW+ow belongs to channel co."""
    B = np.zeros((Cout * OW, Cout), np.float32)
    for co in range(Cout):
        B[co * OW:(co + 1) * OW, co] = 1.0
    return B, np.ascontiguousarray(B.T)


# ------------------------------- fused kernel --------------------------------

def _convt_mm(act, T_ref, R_ref):
    """ConvTranspose2d of act[(ih,n), (ci,iw)] -> out[(oh,n), (co,ow)]:
       out = sum_kh  R_kh @ (act @ T_kh)."""
    out = None
    for kh in range(T_ref.shape[0]):
        y = _dot(R_ref[kh], _dot(act, T_ref[kh]))
        out = y if out is None else out + y
    return out


def _make_decoder_kernel(num_hidden, H0, N):
    """Single fused kernel: dense -> unflatten -> [convT+ReLU+BN]*num_hidden
    -> convT -> sigmoid.  All intermediates stay on-chip."""

    def kernel(*refs):
        it = iter(refs)
        x_ref, dw_ref, db_ref = next(it), next(it), next(it)
        hidden = [tuple(next(it) for _ in range(7)) for _ in range(num_hidden)]
        fT_ref, fR_ref, fb_ref = next(it), next(it), next(it)
        o_ref = next(it)          # output
        act0_ref = next(it)       # VMEM scratch for the unflattened dense output

        # ---- Linear + Unflatten, emitted directly in the (h,n) x (c,w) layout
        #      the conv layers consume (column permutation folded into dw). ----
        x = x_ref[...]
        for h in range(H0):
            act0_ref[h * N:(h + 1) * N, :] = _dot(x, dw_ref[h]) + db_ref[h]
        act = act0_ref[...]

        # ---- ConvTranspose2d -> ReLU -> BatchNorm2d (batch stats), fused ----
        for T_ref, R_ref, b_ref, g_ref, be_ref, B_ref, Bt_ref in hidden:
            z = _convt_mm(act, T_ref, R_ref) + b_ref[...]
            z = jnp.maximum(z, 0.0)                           # ReLU
            # single-pass per-channel stats via MXU (sum and sum of squares)
            B = B_ref[...]
            cnt = float(z.shape[0] * (z.shape[1] // B.shape[1]))   # N*OH*OW
            s1 = jnp.sum(_dot(z, B), axis=0, keepdims=True)        # [1, Cout]
            s2 = jnp.sum(_dot(z * z, B), axis=0, keepdims=True)    # [1, Cout]
            mean = s1 / cnt
            var = jnp.maximum(s2 / cnt - mean * mean, 0.0)         # biased variance
            inv = lax.rsqrt(var + EPS)
            Bt = Bt_ref[...]
            act = g_ref[...] * (z - _dot(mean, Bt)) * _dot(inv, Bt) + be_ref[...]

        # ---- final ConvTranspose2d -> Sigmoid; rows ordered (n, oh) so the
        #      wrapper's reshape to NCHW is a free row-major view ----
        z = _convt_mm(act, fT_ref, fR_ref) + fb_ref[...]
        o_ref[...] = jax.nn.sigmoid(z)

    return kernel


# --------------------------- parameter construction --------------------------

def init_decoder_params(key, layer_channels, layer_kernel_sizes, layer_strides,
                        latent_dim, dense_size, small_shape, output_pads):
    keys = iter(jax.random.split(key, 64))
    params = {
        "dense_w": 0.1 * jax.random.normal(next(keys), (latent_dim, dense_size), jnp.float32),
        "dense_b": 0.1 * jax.random.normal(next(keys), (dense_size,), jnp.float32),
        "small_shape": small_shape,
    }
    layeramt = len(layer_channels)
    convs = []
    for i in reversed(range(1, layeramt)):     # mirrors the nn.ModuleList construction order
        cin = layer_channels[-1] if i == layeramt - 1 else layer_channels[i + 1]
        cout = layer_channels[i]
        K = layer_kernel_sizes[i]
        convs.append(dict(
            weight=0.1 * jax.random.normal(next(keys), (cin, cout, K, K), jnp.float32),
            bias=0.1 * jax.random.normal(next(keys), (cout,), jnp.float32),
            gamma=1.0 + 0.1 * jax.random.normal(next(keys), (cout,), jnp.float32),
            beta=0.1 * jax.random.normal(next(keys), (cout,), jnp.float32),
            kernel_size=K, stride=layer_strides[i], out_pad=output_pads[i]))
    params["convlayers"] = convs
    K0 = layer_kernel_sizes[0]
    params["final"] = dict(
        weight=0.1 * jax.random.normal(next(keys), (layer_channels[1], 1, K0, K0), jnp.float32),
        bias=0.1 * jax.random.normal(next(keys), (1,), jnp.float32),
        kernel_size=K0, stride=layer_strides[0],
        out_pad=1)  # the module hardcodes output_padding=1 for finaltranspose
    return params


def prepare_decoder_params(params, batch):
    """One-time host-side preparation of all kernel-ready matrices (hoisted out
    of the forward pass).  Depends on the (static) batch size via the R maps."""
    N = batch
    C0, H0, W0 = params["small_shape"]
    latent = params["dense_w"].shape[0]

    # dense: permute output columns from (c,h,w) order to (h,c,w) order and
    # split into per-spatial-row weight blocks -> [H0, latent, C0*W0]
    Wd = np.asarray(params["dense_w"], np.float32)
    bd = np.asarray(params["dense_b"], np.float32)
    perm = np.arange(C0 * H0 * W0).reshape(C0, H0, W0).transpose(1, 0, 2).reshape(-1)
    Wd, bd = Wd[:, perm], bd[perm]
    dense_w = np.ascontiguousarray(Wd.reshape(latent, H0, C0 * W0).transpose(1, 0, 2))
    dense_b = np.ascontiguousarray(bd.reshape(H0, 1, C0 * W0))
    prep = {"dense_w": jnp.asarray(dense_w), "dense_b": jnp.asarray(dense_b)}

    H, W = H0, W0
    layers = []
    for layer in params["convlayers"]:
        K, s, op, p = layer["kernel_size"], layer["stride"], layer["out_pad"], 1
        Cout = layer["weight"].shape[1]
        OH = (H - 1) * s - 2 * p + K + op
        OW = (W - 1) * s - 2 * p + K + op
        B, Bt = _build_B(Cout, OW)
        layers.append(dict(
            T=jnp.asarray(_build_T(layer["weight"], s, p, W, OW)),
            R=jnp.asarray(_build_R(H, OH, N, s, p, K)),
            bias=jnp.asarray(np.repeat(np.asarray(layer["bias"], np.float32), OW)[None, :]),
            gamma=jnp.asarray(np.repeat(np.asarray(layer["gamma"], np.float32), OW)[None, :]),
            beta=jnp.asarray(np.repeat(np.asarray(layer["beta"], np.float32), OW)[None, :]),
            B=jnp.asarray(B), Bt=jnp.asarray(Bt)))
        H, W = OH, OW
    prep["layers"] = layers

    fl = params["final"]
    K, s, op, p = fl["kernel_size"], fl["stride"], fl["out_pad"], 1
    OH = (H - 1) * s - 2 * p + K + op
    OW = (W - 1) * s - 2 * p + K + op
    prep["final"] = dict(
        T=jnp.asarray(_build_T(fl["weight"], s, p, W, OW)),
        R=jnp.asarray(_build_R(H, OH, N, s, p, K, batch_major_out=True)),
        bias=jnp.asarray(np.repeat(np.asarray(fl["bias"], np.float32), OW)[None, :]))
    prep["meta"] = dict(N=N, H0=H0, C0W0=C0 * W0, OH=OH, OW=OW)
    return prep


# ------------------------------ decoder forward ------------------------------

def decoder_forward(prep, x):
    meta = prep["meta"]
    N, H0, C0W0, OH, OW = meta["N"], meta["H0"], meta["C0W0"], meta["OH"], meta["OW"]
    assert x.shape[0] == N

    args = [x, prep["dense_w"], prep["dense_b"]]
    for L in prep["layers"]:
        args += [L["T"], L["R"], L["bias"], L["gamma"], L["beta"], L["B"], L["Bt"]]
    F = prep["final"]
    args += [F["T"], F["R"], F["bias"]]

    out2d = pl.pallas_call(
        _make_decoder_kernel(len(prep["layers"]), H0, N),
        out_shape=jax.ShapeDtypeStruct((N * OH, OW), jnp.float32),
        in_specs=[pl.BlockSpec(memory_space=pltpu.MemorySpace.VMEM)] * len(args),
        out_specs=pl.BlockSpec(memory_space=pltpu.MemorySpace.VMEM),
        scratch_shapes=[pltpu.VMEM((H0 * N, C0W0), jnp.float32)],
    )(*args)
    # rows are (n, oh) -> NCHW reshape is a free row-major view
    return out2d.reshape(N, 1, OH, OW)


# -------------------------- pure-JAX reference (check) -----------------------

def _ref_convt(x, w, b, stride, padding, out_pad):
    Cin, Cout, K, _ = w.shape
    w_conv = jnp.transpose(w[:, :, ::-1, ::-1], (1, 0, 2, 3))   # [Cout, Cin, K, K]
    lo, hi = K - 1 - padding, K - 1 - padding + out_pad
    y = lax.conv_general_dilated(
        x, w_conv, window_strides=(1, 1), padding=[(lo, hi), (lo, hi)],
        lhs_dilation=(stride, stride),
        dimension_numbers=("NCHW", "OIHW", "NCHW"), precision=_PREC)
    return y + b.reshape(1, -1, 1, 1)


def decoder_forward_ref(params, x):
    h = jnp.dot(x, params["dense_w"], precision=_PREC) + params["dense_b"]
    C, Hs, Ws = params["small_shape"]
    z = h.reshape(x.shape[0], C, Hs, Ws)
    for layer in params["convlayers"]:
        y = _ref_convt(z, layer["weight"], layer["bias"], layer["stride"], 1, layer["out_pad"])
        y = jnp.maximum(y, 0.0)
        mean = jnp.mean(y, axis=(0, 2, 3), keepdims=True)
        var = jnp.mean((y - mean) ** 2, axis=(0, 2, 3), keepdims=True)
        z = (layer["gamma"].reshape(1, -1, 1, 1) * (y - mean) * lax.rsqrt(var + EPS)
             + layer["beta"].reshape(1, -1, 1, 1))
    fl = params["final"]
    y = _ref_convt(z, fl["weight"], fl["bias"], fl["stride"], 1, fl["out_pad"])
    return jax.nn.sigmoid(y)


# ---------------------------------- main --------------------------------------

if __name__ == "__main__":
    # Small deterministic config (consistent with the module's constructor args).
    layer_channels = [1, 4, 8, 8]
    layer_kernel_sizes = [3, 3, 3, 3]
    layer_strides = [2, 2, 2, 2]
    output_pads = [1, 1, 1, 1]
    latent_dim = 16
    small_shape = (8, 2, 2)
    dense_size = small_shape[0] * small_shape[1] * small_shape[2]   # 32
    batch = 2

    key = jax.random.PRNGKey(0)
    pkey, xkey = jax.random.split(key)
    params = init_decoder_params(pkey, layer_channels, layer_kernel_sizes,
                                 layer_strides, latent_dim, dense_size,
                                 small_shape, output_pads)
    prep = prepare_decoder_params(params, batch)        # one-time weight prep
    x = jax.random.normal(xkey, (batch, latent_dim), jnp.float32)

    out = jax.block_until_ready(decoder_forward(prep, x))
    ref = jax.block_until_ready(decoder_forward_ref(params, x))

    assert out.shape == (batch, 1, 32, 32), out.shape
    np.testing.assert_allclose(np.asarray(out), np.asarray(ref), atol=1e-3, rtol=1e-3)
    # TODO(synk): BatchNorm2d running_mean/running_var updates (training-mode side
    # effect) are not reproduced; only the batch-statistics forward output is.
    print("KERNEL_OK")
</pallas_src>

<mosaic_0001>
module attributes {stable_mosaic.version = 11 : i64} {
  func.func @kernel(%arg0: memref<2x16xf32, #tpu.memory_space<vmem>>, %arg1: memref<2x16x16xf32, #tpu.memory_space<vmem>>, %arg2: memref<2x1x16xf32, #tpu.memory_space<vmem>>, %arg3: memref<3x16x32xf32, #tpu.memory_space<vmem>>, %arg4: memref<3x8x4xf32, #tpu.memory_space<vmem>>, %arg5: memref<1x32xf32, #tpu.memory_space<vmem>>, %arg6: memref<1x32xf32, #tpu.memory_space<vmem>>, %arg7: memref<1x32xf32, #tpu.memory_space<vmem>>, %arg8: memref<32x8xf32, #tpu.memory_space<vmem>>, %arg9: memref<8x32xf32, #tpu.memory_space<vmem>>, %arg10: memref<3x32x64xf32, #tpu.memory_space<vmem>>, %arg11: memref<3x16x8xf32, #tpu.memory_space<vmem>>, %arg12: memref<1x64xf32, #tpu.memory_space<vmem>>, %arg13: memref<1x64xf32, #tpu.memory_space<vmem>>, %arg14: memref<1x64xf32, #tpu.memory_space<vmem>>, %arg15: memref<64x8xf32, #tpu.memory_space<vmem>>, %arg16: memref<8x64xf32, #tpu.memory_space<vmem>>, %arg17: memref<3x64x64xf32, #tpu.memory_space<vmem>>, %arg18: memref<3x32x16xf32, #tpu.memory_space<vmem>>, %arg19: memref<1x64xf32, #tpu.memory_space<vmem>>, %arg20: memref<1x64xf32, #tpu.memory_space<vmem>>, %arg21: memref<1x64xf32, #tpu.memory_space<vmem>>, %arg22: memref<64x4xf32, #tpu.memory_space<vmem>>, %arg23: memref<4x64xf32, #tpu.memory_space<vmem>>, %arg24: memref<3x64x32xf32, #tpu.memory_space<vmem>>, %arg25: memref<3x64x32xf32, #tpu.memory_space<vmem>>, %arg26: memref<1x32xf32, #tpu.memory_space<vmem>>, %arg27: memref<64x32xf32, #tpu.memory_space<vmem>>, %arg28: memref<4x16xf32, #tpu.memory_space<vmem>>) attributes {dimension_semantics = [], scalar_prefetch = 0 : i64, scratch_operands = 1 : i64, tpu.core_type = #tpu.core_type<tc>} {
    %c0 = arith.constant 0 : index
    %c0_0 = arith.constant 0 : index
    %0 = vector.load %arg0[%c0, %c0_0] : memref<2x16xf32, #tpu.memory_space<vmem>>, vector<2x16xf32>
    %c0_1 = arith.constant 0 : index
    %c0_2 = arith.constant 0 : index
    %c0_3 = arith.constant 0 : index
    %1 = vector.load %arg1[%c0_1, %c0_2, %c0_3] : memref<2x16x16xf32, #tpu.memory_space<vmem>>, vector<1x16x16xf32>
    %2 = vector.shape_cast %1 : vector<1x16x16xf32> to vector<16x16xf32>
    %cst = arith.constant dense<0.000000e+00> : vector<2x16xf32>
    %3 = tpu.matmul %0, %2, %cst {dimension_numbers = #tpu.dot_dimension_numbers<[1], [0], [0], [1], [0, 0, 1, 1], [], []>, precision = #tpu.contract_precision<fp32>} : vector<2x16xf32>, vector<16x16xf32>, vector<2x16xf32> -> vector<2x16xf32>
    %c0_4 = arith.constant 0 : index
    %c0_5 = arith.constant 0 : index
    %c0_6 = arith.constant 0 : index
    %4 = vector.load %arg2[%c0_4, %c0_5, %c0_6] : memref<2x1x16xf32, #tpu.memory_space<vmem>>, vector<1x1x16xf32>
    %5 = vector.shape_cast %4 : vector<1x1x16xf32> to vector<1x16xf32>
    %6 = vector.broadcast %5 : vector<1x16xf32> to vector<2x16xf32>
    %7 = arith.addf %3, %6 : vector<2x16xf32>
    %c0_7 = arith.constant 0 : index
    %c0_8 = arith.constant 0 : index
    %8 = vector.load %arg28[%c0_7, %c0_8] : memref<4x16xf32, #tpu.memory_space<vmem>>, vector<2x16xf32>
    tpu.vector_store %arg28[%c0_7, %c0_8], %7 {strides = array<i32>} : memref<4x16xf32, #tpu.memory_space<vmem>>, vector<2x16xf32>,
    %c1 = arith.constant 1 : index
    %c0_9 = arith.constant 0 : index
    %c0_10 = arith.constant 0 : index
    %9 = vector.load %arg1[%c1, %c0_9, %c0_10] : memref<2x16x16xf32, #tpu.memory_space<vmem>>, vector<1x16x16xf32>
    %10 = vector.shape_cast %9 : vector<1x16x16xf32> to vector<16x16xf32>
    %cst_11 = arith.constant dense<0.000000e+00> : vector<2x16xf32>
    %11 = tpu.matmul %0, %10, %cst_11 {dimension_numbers = #tpu.dot_dimension_numbers<[1], [0], [0], [1], [0, 0, 1, 1], [], []>, precision = #tpu.contract_precision<fp32>} : vector<2x16xf32>, vector<16x16xf32>, vector<2x16xf32> -> vector<2x16xf32>
    %c1_12 = arith.constant 1 : index
    %c0_13 = arith.constant 0 : index
    %c0_14 = arith.constant 0 : index
    %12 = vector.load %arg2[%c1_12, %c0_13, %c0_14] : memref<2x1x16xf32, #tpu.memory_space<vmem>>, vector<1x1x16xf32>
    %13 = vector.shape_cast %12 : vector<1x1x16xf32> to vector<1x16xf32>
    %14 = vector.broadcast %13 : vector<1x16xf32> to vector<2x16xf32>
    %15 = arith.addf %11, %14 : vector<2x16xf32>
    %c2 = arith.constant 2 : index
    %c0_15 = arith.constant 0 : index
    %16 = vector.load %arg28[%c2, %c0_15] : memref<4x16xf32, #tpu.memory_space<vmem>>, vector<2x16xf32>
    tpu.vector_store %arg28[%c2, %c0_15], %15 {strides = array<i32>} : memref<4x16xf32, #tpu.memory_space<vmem>>, vector<2x16xf32>,
    %c0_16 = arith.constant 0 : index
    %c0_17 = arith.constant 0 : index
    %17 = vector.load %arg28[%c0_16, %c0_17] : memref<4x16xf32, #tpu.memory_space<vmem>>, vector<4x16xf32>
    %c0_18 = arith.constant 0 : index
    %c0_19 = arith.constant 0 : index
    %c0_20 = arith.constant 0 : index
    %18 = vector.load %arg4[%c0_18, %c0_19, %c0_20] : memref<3x8x4xf32, #tpu.memory_space<vmem>>, vector<1x8x4xf32>
    %19 = vector.shape_cast %18 : vector<1x8x4xf32> to vector<8x4xf32>
    %c0_21 = arith.constant 0 : index
    %c0_22 = arith.constant 0 : index
    %c0_23 = arith.constant 0 : index
    %20 = vector.load %arg3[%c0_21, %c0_22, %c0_23] : memref<3x16x32xf32, #tpu.memory_space<vmem>>, vector<1x16x32xf32>
    %21 = vector.shape_cast %20 : vector<1x16x32xf32> to vector<16x32xf32>
    %cst_24 = arith.constant dense<0.000000e+00> : vector<4x32xf32>
    %22 = tpu.matmul %17, %21, %cst_24 {dimension_numbers = #tpu.dot_dimension_numbers<[1], [0], [0], [1], [0, 0, 1, 1], [], []>, precision = #tpu.contract_precision<fp32>} : vector<4x16xf32>, vector<16x32xf32>, vector<4x32xf32> -> vector<4x32xf32>
    %cst_25 = arith.constant dense<0.000000e+00> : vector<8x32xf32>
    %23 = tpu.matmul %19, %22, %cst_25 {dimension_numbers = #tpu.dot_dimension_numbers<[1], [0], [0], [1], [0, 0, 1, 1], [], []>, precision = #tpu.contract_precision<fp32>} : vector<8x4xf32>, vector<4x32xf32>, vector<8x32xf32> -> vector<8x32xf32>
    %c1_26 = arith.constant 1 : index
    %c0_27 = arith.constant 0 : index
    %c0_28 = arith.constant 0 : index
    %24 = vector.load %arg4[%c1_26, %c0_27, %c0_28] : memref<3x8x4xf32, #tpu.memory_space<vmem>>, vector<1x8x4xf32>
    %25 = vector.shape_cast %24 : vector<1x8x4xf32> to vector<8x4xf32>
    %c1_29 = arith.constant 1 : index
    %c0_30 = arith.constant 0 : index
    %c0_31 = arith.constant 0 : index
    %26 = vector.load %arg3[%c1_29, %c0_30, %c0_31] : memref<3x16x32xf32, #tpu.memory_space<vmem>>, vector<1x16x32xf32>
    %27 = vector.shape_cast %26 : vector<1x16x32xf32> to vector<16x32xf32>
    %cst_32 = arith.constant dense<0.000000e+00> : vector<4x32xf32>
    %28 = tpu.matmul %17, %27, %cst_32 {dimension_numbers = #tpu.dot_dimension_numbers<[1], [0], [0], [1], [0, 0, 1, 1], [], []>, precision = #tpu.contract_precision<fp32>} : vector<4x16xf32>, vector<16x32xf32>, vector<4x32xf32> -> vector<4x32xf32>
    %cst_33 = arith.constant dense<0.000000e+00> : vector<8x32xf32>
    %29 = tpu.matmul %25, %28, %cst_33 {dimension_numbers = #tpu.dot_dimension_numbers<[1], [0], [0], [1], [0, 0, 1, 1], [], []>, precision = #tpu.contract_precision<fp32>} : vector<8x4xf32>, vector<4x32xf32>, vector<8x32xf32> -> vector<8x32xf32>
    %30 = arith.addf %23, %29 : vector<8x32xf32>
    %c2_34 = arith.constant 2 : index
    %c0_35 = arith.constant 0 : index
    %c0_36 = arith.constant 0 : index
    %31 = vector.load %arg4[%c2_34, %c0_35, %c0_36] : memref<3x8x4xf32, #tpu.memory_space<vmem>>, vector<1x8x4xf32>
    %32 = vector.shape_cast %31 : vector<1x8x4xf32> to vector<8x4xf32>
    %c2_37 = arith.constant 2 : index
    %c0_38 = arith.constant 0 : index
    %c0_39 = arith.constant 0 : index
    %33 = vector.load %arg3[%c2_37, %c0_38, %c0_39] : memref<3x16x32xf32, #tpu.memory_space<vmem>>, vector<1x16x32xf32>
    %34 = vector.shape_cast %33 : vector<1x16x32xf32> to vector<16x32xf32>
    %cst_40 = arith.constant dense<0.000000e+00> : vector<4x32xf32>
    %35 = tpu.matmul %17, %34, %cst_40 {dimension_numbers = #tpu.dot_dimension_numbers<[1], [0], [0], [1], [0, 0, 1, 1], [], []>, precision = #tpu.contract_precision<fp32>} : vector<4x16xf32>, vector<16x32xf32>, vector<4x32xf32> -> vector<4x32xf32>
    %cst_41 = arith.constant dense<0.000000e+00> : vector<8x32xf32>
    %36 = tpu.matmul %32, %35, %cst_41 {dimension_numbers = #tpu.dot_dimension_numbers<[1], [0], [0], [1], [0, 0, 1, 1], [], []>, precision = #tpu.contract_precision<fp32>} : vector<8x4xf32>, vector<4x32xf32>, vector<8x32xf32> -> vector<8x32xf32>
    %37 = arith.addf %30, %36 : vector<8x32xf32>
    %c0_42 = arith.constant 0 : index
    %c0_43 = arith.constant 0 : index
    %38 = vector.load %arg5[%c0_42, %c0_43] : memref<1x32xf32, #tpu.memory_space<vmem>>, vector<1x32xf32>
    %39 = vector.broadcast %38 : vector<1x32xf32> to vector<8x32xf32>
    %40 = arith.addf %37, %39 : vector<8x32xf32>
    %cst_44 = arith.constant 0.000000e+00 : f32
    %41 = vector.broadcast %cst_44 : f32 to vector<8x32xf32>
    %42 = arith.maximumf %40, %41 : vector<8x32xf32>
    %c0_45 = arith.constant 0 : index
    %c0_46 = arith.constant 0 : index
    %43 = vector.load %arg8[%c0_45, %c0_46] : memref<32x8xf32, #tpu.memory_space<vmem>>, vector<32x8xf32>
    %cst_47 = arith.constant dense<0.000000e+00> : vector<8x8xf32>
    %44 = tpu.matmul %42, %43, %cst_47 {dimension_numbers = #tpu.dot_dimension_numbers<[1], [0], [0], [1], [0, 0, 1, 1], [], []>, precision = #tpu.contract_precision<fp32>} : vector<8x32xf32>, vector<32x8xf32>, vector<8x8xf32> -> vector<8x8xf32>
    %cst_48 = arith.constant dense<0.000000e+00> : vector<8xf32>
    %45 = vector.multi_reduction <add>, %44, %cst_48 [0] : vector<8x8xf32> to vector<8xf32>
    %46 = vector.shape_cast %45 : vector<8xf32> to vector<1x8xf32>
    %47 = arith.mulf %42, %42 : vector<8x32xf32>
    %cst_49 = arith.constant dense<0.000000e+00> : vector<8x8xf32>
    %48 = tpu.matmul %47, %43, %cst_49 {dimension_numbers = #tpu.dot_dimension_numbers<[1], [0], [0], [1], [0, 0, 1, 1], [], []>, precision = #tpu.contract_precision<fp32>} : vector<8x32xf32>, vector<32x8xf32>, vector<8x8xf32> -> vector<8x8xf32>
    %cst_50 = arith.constant dense<0.000000e+00> : vector<8xf32>
    %49 = vector.multi_reduction <add>, %48, %cst_50 [0] : vector<8x8xf32> to vector<8xf32>
    %50 = vector.shape_cast %49 : vector<8xf32> to vector<1x8xf32>
    %cst_51 = arith.constant 3.200000e+01 : f32
    %51 = vector.broadcast %cst_51 : f32 to vector<1x8xf32>
    %52 = arith.divf %46, %51 : vector<1x8xf32>
    %cst_52 = arith.constant 3.200000e+01 : f32
    %53 = vector.broadcast %cst_52 : f32 to vector<1x8xf32>
    %54 = arith.divf %50, %53 : vector<1x8xf32>
    %55 = arith.mulf %52, %52 : vector<1x8xf32>
    %56 = arith.subf %54, %55 : vector<1x8xf32>
    %cst_53 = arith.constant 0.000000e+00 : f32
    %57 = vector.broadcast %cst_53 : f32 to vector<1x8xf32>
    %58 = arith.maximumf %56, %57 : vector<1x8xf32>
    %cst_54 = arith.constant 9.99999974E-6 : f32
    %59 = vector.broadcast %cst_54 : f32 to vector<1x8xf32>
    %60 = arith.addf %58, %59 : vector<1x8xf32>
    %61 = math.rsqrt %60 : vector<1x8xf32>
    %c0_55 = arith.constant 0 : index
    %c0_56 = arith.constant 0 : index
    %62 = vector.load %arg9[%c0_55, %c0_56] : memref<8x32xf32, #tpu.memory_space<vmem>>, vector<8x32xf32>
    %c0_57 = arith.constant 0 : index
    %c0_58 = arith.constant 0 : index
    %63 = vector.load %arg6[%c0_57, %c0_58] : memref<1x32xf32, #tpu.memory_space<vmem>>, vector<1x32xf32>
    %cst_59 = arith.constant dense<0.000000e+00> : vector<1x32xf32>
    %64 = tpu.matmul %52, %62, %cst_59 {dimension_numbers = #tpu.dot_dimension_numbers<[1], [0], [0], [1], [0, 0, 1, 1], [], []>, precision = #tpu.contract_precision<fp32>} : vector<1x8xf32>, vector<8x32xf32>, vector<1x32xf32> -> vector<1x32xf32>
    %65 = vector.broadcast %64 : vector<1x32xf32> to vector<8x32xf32>
    %66 = arith.subf %42, %65 : vector<8x32xf32>
    %67 = vector.broadcast %63 : vector<1x32xf32> to vector<8x32xf32>
    %68 = arith.mulf %67, %66 : vector<8x32xf32>
    %cst_60 = arith.constant dense<0.000000e+00> : vector<1x32xf32>
    %69 = tpu.matmul %61, %62, %cst_60 {dimension_numbers = #tpu.dot_dimension_numbers<[1], [0], [0], [1], [0, 0, 1, 1], [], []>, precision = #tpu.contract_precision<fp32>} : vector<1x8xf32>, vector<8x32xf32>, vector<1x32xf32> -> vector<1x32xf32>
    %70 = vector.broadcast %69 : vector<1x32xf32> to vector<8x32xf32>
    %71 = arith.mulf %68, %70 : vector<8x32xf32>
    %c0_61 = arith.constant 0 : index
    %c0_62 = arith.constant 0 : index
    %72 = vector.load %arg7[%c0_61, %c0_62] : memref<1x32xf32, #tpu.memory_space<vmem>>, vector<1x32xf32>
    %73 = vector.broadcast %72 : vector<1x32xf32> to vector<8x32xf32>
    %74 = arith.addf %71, %73 : vector<8x32xf32>
    %c0_63 = arith.constant 0 : index
    %c0_64 = arith.constant 0 : index
    %c0_65 = arith.constant 0 : index
    %75 = vector.load %arg11[%c0_63, %c0_64, %c0_65] : memref<3x16x8xf32, #tpu.memory_space<vmem>>, vector<1x16x8xf32>
    %76 = vector.shape_cast %75 : vector<1x16x8xf32> to vector<16x8xf32>
    %c0_66 = arith.constant 0 : index
    %c0_67 = arith.constant 0 : index
    %c0_68 = arith.constant 0 : index
    %77 = vector.load %arg10[%c0_66, %c0_67, %c0_68] : memref<3x32x64xf32, #tpu.memory_space<vmem>>, vector<1x32x64xf32>
    %78 = vector.shape_cast %77 : vector<1x32x64xf32> to vector<32x64xf32>
    %cst_69 = arith.constant dense<0.000000e+00> : vector<8x64xf32>
    %79 = tpu.matmul %74, %78, %cst_69 {dimension_numbers = #tpu.dot_dimension_numbers<[1], [0], [0], [1], [0, 0, 1, 1], [], []>, precision = #tpu.contract_precision<fp32>} : vector<8x32xf32>, vector<32x64xf32>, vector<8x64xf32> -> vector<8x64xf32>
    %cst_70 = arith.constant dense<0.000000e+00> : vector<16x64xf32>
    %80 = tpu.matmul %76, %79, %cst_70 {dimension_numbers = #tpu.dot_dimension_numbers<[1], [0], [0], [1], [0, 0, 1, 1], [], []>, precision = #tpu.contract_precision<fp32>} : vector<16x8xf32>, vector<8x64xf32>, vector<16x64xf32> -> vector<16x64xf32>
    %c1_71 = arith.constant 1 : index
    %c0_72 = arith.constant 0 : index
    %c0_73 = arith.constant 0 : index
    %81 = vector.load %arg11[%c1_71, %c0_72, %c0_73] : memref<3x16x8xf32, #tpu.memory_space<vmem>>, vector<1x16x8xf32>
    %82 = vector.shape_cast %81 : vector<1x16x8xf32> to vector<16x8xf32>
    %c1_74 = arith.constant 1 : index
    %c0_75 = arith.constant 0 : index
    %c0_76 = arith.constant 0 : index
    %83 = vector.load %arg10[%c1_74, %c0_75, %c0_76] : memref<3x32x64xf32, #tpu.memory_space<vmem>>, vector<1x32x64xf32>
    %84 = vector.shape_cast %83 : vector<1x32x64xf32> to vector<32x64xf32>
    %cst_77 = arith.constant dense<0.000000e+00> : vector<8x64xf32>
    %85 = tpu.matmul %74, %84, %cst_77 {dimension_numbers = #tpu.dot_dimension_numbers<[1], [0], [0], [1], [0, 0, 1, 1], [], []>, precision = #tpu.contract_precision<fp32>} : vector<8x32xf32>, vector<32x64xf32>, vector<8x64xf32> -> vector<8x64xf32>
    %cst_78 = arith.constant dense<0.000000e+00> : vector<16x64xf32>
    %86 = tpu.matmul %82, %85, %cst_78 {dimension_numbers = #tpu.dot_dimension_numbers<[1], [0], [0], [1], [0, 0, 1, 1], [], []>, precision = #tpu.contract_precision<fp32>} : vector<16x8xf32>, vector<8x64xf32>, vector<16x64xf32> -> vector<16x64xf32>
    %87 = arith.addf %80, %86 : vector<16x64xf32>
    %c2_79 = arith.constant 2 : index
    %c0_80 = arith.constant 0 : index
    %c0_81 = arith.constant 0 : index
    %88 = vector.load %arg11[%c2_79, %c0_80, %c0_81] : memref<3x16x8xf32, #tpu.memory_space<vmem>>, vector<1x16x8xf32>
    %89 = vector.shape_cast %88 : vector<1x16x8xf32> to vector<16x8xf32>
    %c2_82 = arith.constant 2 : index
    %c0_83 = arith.constant 0 : index
    %c0_84 = arith.constant 0 : index
    %90 = vector.load %arg10[%c2_82, %c0_83, %c0_84] : memref<3x32x64xf32, #tpu.memory_space<vmem>>, vector<1x32x64xf32>
    %91 = vector.shape_cast %90 : vector<1x32x64xf32> to vector<32x64xf32>
    %cst_85 = arith.constant dense<0.000000e+00> : vector<8x64xf32>
    %92 = tpu.matmul %74, %91, %cst_85 {dimension_numbers = #tpu.dot_dimension_numbers<[1], [0], [0], [1], [0, 0, 1, 1], [], []>, precision = #tpu.contract_precision<fp32>} : vector<8x32xf32>, vector<32x64xf32>, vector<8x64xf32> -> vector<8x64xf32>
    %cst_86 = arith.constant dense<0.000000e+00> : vector<16x64xf32>
    %93 = tpu.matmul %89, %92, %cst_86 {dimension_numbers = #tpu.dot_dimension_numbers<[1], [0], [0], [1], [0, 0, 1, 1], [], []>, precision = #tpu.contract_precision<fp32>} : vector<16x8xf32>, vector<8x64xf32>, vector<16x64xf32> -> vector<16x64xf32>
    %94 = arith.addf %87, %93 : vector<16x64xf32>
    %c0_87 = arith.constant 0 : index
    %c0_88 = arith.constant 0 : index
    %95 = vector.load %arg12[%c0_87, %c0_88] : memref<1x64xf32, #tpu.memory_space<vmem>>, vector<1x64xf32>
    %96 = vector.broadcast %95 : vector<1x64xf32> to vector<16x64xf32>
    %97 = arith.addf %94, %96 : vector<16x64xf32>
    %cst_89 = arith.constant 0.000000e+00 : f32
    %98 = vector.broadcast %cst_89 : f32 to vector<16x64xf32>
    %99 = arith.maximumf %97, %98 : vector<16x64xf32>
    %c0_90 = arith.constant 0 : index
    %c0_91 = arith.constant 0 : index
    %100 = vector.load %arg15[%c0_90, %c0_91] : memref<64x8xf32, #tpu.memory_space<vmem>>, vector<64x8xf32>
    %cst_92 = arith.constant dense<0.000000e+00> : vector<16x8xf32>
    %101 = tpu.matmul %99, %100, %cst_92 {dimension_numbers = #tpu.dot_dimension_numbers<[1], [0], [0], [1], [0, 0, 1, 1], [], []>, precision = #tpu.contract_precision<fp32>} : vector<16x64xf32>, vector<64x8xf32>, vector<16x8xf32> -> vector<16x8xf32>
    %cst_93 = arith.constant dense<0.000000e+00> : vector<8xf32>
    %102 = vector.multi_reduction <add>, %101, %cst_93 [0] : vector<16x8xf32> to vector<8xf32>
    %103 = vector.shape_cast %102 : vector<8xf32> to vector<1x8xf32>
    %104 = arith.mulf %99, %99 : vector<16x64xf32>
    %cst_94 = arith.constant dense<0.000000e+00> : vector<16x8xf32>
    %105 = tpu.matmul %104, %100, %cst_94 {dimension_numbers = #tpu.dot_dimension_numbers<[1], [0], [0], [1], [0, 0, 1, 1], [], []>, precision = #tpu.contract_precision<fp32>} : vector<16x64xf32>, vector<64x8xf32>, vector<16x8xf32> -> vector<16x8xf32>
    %cst_95 = arith.constant dense<0.000000e+00> : vector<8xf32>
    %106 = vector.multi_reduction <add>, %105, %cst_95 [0] : vector<16x8xf32> to vector<8xf32>
    %107 = vector.shape_cast %106 : vector<8xf32> to vector<1x8xf32>
    %cst_96 = arith.constant 1.280000e+02 : f32
    %108 = vector.broadcast %cst_96 : f32 to vector<1x8xf32>
    %109 = arith.divf %103, %108 : vector<1x8xf32>
    %cst_97 = arith.constant 1.280000e+02 : f32
    %110 = vector.broadcast %cst_97 : f32 to vector<1x8xf32>
    %111 = arith.divf %107, %110 : vector<1x8xf32>
    %112 = arith.mulf %109, %109 : vector<1x8xf32>
    %113 = arith.subf %111, %112 : vector<1x8xf32>
    %cst_98 = arith.constant 0.000000e+00 : f32
    %114 = vector.broadcast %cst_98 : f32 to vector<1x8xf32>
    %115 = arith.maximumf %113, %114 : vector<1x8xf32>
    %cst_99 = arith.constant 9.99999974E-6 : f32
    %116 = vector.broadcast %cst_99 : f32 to vector<1x8xf32>
    %117 = arith.addf %115, %116 : vector<1x8xf32>
    %118 = math.rsqrt %117 : vector<1x8xf32>
    %c0_100 = arith.constant 0 : index
    %c0_101 = arith.constant 0 : index
    %119 = vector.load %arg16[%c0_100, %c0_101] : memref<8x64xf32, #tpu.memory_space<vmem>>, vector<8x64xf32>
    %c0_102 = arith.constant 0 : index
    %c0_103 = arith.constant 0 : index
    %120 = vector.load %arg13[%c0_102, %c0_103] : memref<1x64xf32, #tpu.memory_space<vmem>>, vector<1x64xf32>
    %cst_104 = arith.constant dense<0.000000e+00> : vector<1x64xf32>
    %121 = tpu.matmul %109, %119, %cst_104 {dimension_numbers = #tpu.dot_dimension_numbers<[1], [0], [0], [1], [0, 0, 1, 1], [], []>, precision = #tpu.contract_precision<fp32>} : vector<1x8xf32>, vector<8x64xf32>, vector<1x64xf32> -> vector<1x64xf32>
    %122 = vector.broadcast %121 : vector<1x64xf32> to vector<16x64xf32>
    %123 = arith.subf %99, %122 : vector<16x64xf32>
    %124 = vector.broadcast %120 : vector<1x64xf32> to vector<16x64xf32>
    %125 = arith.mulf %124, %123 : vector<16x64xf32>
    %cst_105 = arith.constant dense<0.000000e+00> : vector<1x64xf32>
    %126 = tpu.matmul %118, %119, %cst_105 {dimension_numbers = #tpu.dot_dimension_numbers<[1], [0], [0], [1], [0, 0, 1, 1], [], []>, precision = #tpu.contract_precision<fp32>} : vector<1x8xf32>, vector<8x64xf32>, vector<1x64xf32> -> vector<1x64xf32>
    %127 = vector.broadcast %126 : vector<1x64xf32> to vector<16x64xf32>
    %128 = arith.mulf %125, %127 : vector<16x64xf32>
    %c0_106 = arith.constant 0 : index
    %c0_107 = arith.constant 0 : index
    %129 = vector.load %arg14[%c0_106, %c0_107] : memref<1x64xf32, #tpu.memory_space<vmem>>, vector<1x64xf32>
    %130 = vector.broadcast %129 : vector<1x64xf32> to vector<16x64xf32>
    %131 = arith.addf %128, %130 : vector<16x64xf32>
    %c0_108 = arith.constant 0 : index
    %c0_109 = arith.constant 0 : index
    %c0_110 = arith.constant 0 : index
    %132 = vector.load %arg18[%c0_108, %c0_109, %c0_110] : memref<3x32x16xf32, #tpu.memory_space<vmem>>, vector<1x32x16xf32>
    %133 = vector.shape_cast %132 : vector<1x32x16xf32> to vector<32x16xf32>
    %c0_111 = arith.constant 0 : index
    %c0_112 = arith.constant 0 : index
    %c0_113 = arith.constant 0 : index
    %134 = vector.load %arg17[%c0_111, %c0_112, %c0_113] : memref<3x64x64xf32, #tpu.memory_space<vmem>>, vector<1x64x64xf32>
    %135 = vector.shape_cast %134 : vector<1x64x64xf32> to vector<64x64xf32>
    %cst_114 = arith.constant dense<0.000000e+00> : vector<16x64xf32>
    %136 = tpu.matmul %131, %135, %cst_114 {dimension_numbers = #tpu.dot_dimension_numbers<[1], [0], [0], [1], [0, 0, 1, 1], [], []>, precision = #tpu.contract_precision<fp32>} : vector<16x64xf32>, vector<64x64xf32>, vector<16x64xf32> -> vector<16x64xf32>
    %cst_115 = arith.constant dense<0.000000e+00> : vector<32x64xf32>
    %137 = tpu.matmul %133, %136, %cst_115 {dimension_numbers = #tpu.dot_dimension_numbers<[1], [0], [0], [1], [0, 0, 1, 1], [], []>, precision = #tpu.contract_precision<fp32>} : vector<32x16xf32>, vector<16x64xf32>, vector<32x64xf32> -> vector<32x64xf32>
    %c1_116 = arith.constant 1 : index
    %c0_117 = arith.constant 0 : index
    %c0_118 = arith.constant 0 : index
    %138 = vector.load %arg18[%c1_116, %c0_117, %c0_118] : memref<3x32x16xf32, #tpu.memory_space<vmem>>, vector<1x32x16xf32>
    %139 = vector.shape_cast %138 : vector<1x32x16xf32> to vector<32x16xf32>
    %c1_119 = arith.constant 1 : index
    %c0_120 = arith.constant 0 : index
    %c0_121 = arith.constant 0 : index
    %140 = vector.load %arg17[%c1_119, %c0_120, %c0_121] : memref<3x64x64xf32, #tpu.memory_space<vmem>>, vector<1x64x64xf32>
    %141 = vector.shape_cast %140 : vector<1x64x64xf32> to vector<64x64xf32>
    %cst_122 = arith.constant dense<0.000000e+00> : vector<16x64xf32>
    %142 = tpu.matmul %131, %141, %cst_122 {dimension_numbers = #tpu.dot_dimension_numbers<[1], [0], [0], [1], [0, 0, 1, 1], [], []>, precision = #tpu.contract_precision<fp32>} : vector<16x64xf32>, vector<64x64xf32>, vector<16x64xf32> -> vector<16x64xf32>
    %cst_123 = arith.constant dense<0.000000e+00> : vector<32x64xf32>
    %143 = tpu.matmul %139, %142, %cst_123 {dimension_numbers = #tpu.dot_dimension_numbers<[1], [0], [0], [1], [0, 0, 1, 1], [], []>, precision = #tpu.contract_precision<fp32>} : vector<32x16xf32>, vector<16x64xf32>, vector<32x64xf32> -> vector<32x64xf32>
    %144 = arith.addf %137, %143 : vector<32x64xf32>
    %c2_124 = arith.constant 2 : index
    %c0_125 = arith.constant 0 : index
    %c0_126 = arith.constant 0 : index
    %145 = vector.load %arg18[%c2_124, %c0_125, %c0_126] : memref<3x32x16xf32, #tpu.memory_space<vmem>>, vector<1x32x16xf32>
    %146 = vector.shape_cast %145 : vector<1x32x16xf32> to vector<32x16xf32>
    %c2_127 = arith.constant 2 : index
    %c0_128 = arith.constant 0 : index
    %c0_129 = arith.constant 0 : index
    %147 = vector.load %arg17[%c2_127, %c0_128, %c0_129] : memref<3x64x64xf32, #tpu.memory_space<vmem>>, vector<1x64x64xf32>
    %148 = vector.shape_cast %147 : vector<1x64x64xf32> to vector<64x64xf32>
    %cst_130 = arith.constant dense<0.000000e+00> : vector<16x64xf32>
    %149 = tpu.matmul %131, %148, %cst_130 {dimension_numbers = #tpu.dot_dimension_numbers<[1], [0], [0], [1], [0, 0, 1, 1], [], []>, precision = #tpu.contract_precision<fp32>} : vector<16x64xf32>, vector<64x64xf32>, vector<16x64xf32> -> vector<16x64xf32>
    %cst_131 = arith.constant dense<0.000000e+00> : vector<32x64xf32>
    %150 = tpu.matmul %146, %149, %cst_131 {dimension_numbers = #tpu.dot_dimension_numbers<[1], [0], [0], [1], [0, 0, 1, 1], [], []>, precision = #tpu.contract_precision<fp32>} : vector<32x16xf32>, vector<16x64xf32>, vector<32x64xf32> -> vector<32x64xf32>
    %151 = arith.addf %144, %150 : vector<32x64xf32>
    %c0_132 = arith.constant 0 : index
    %c0_133 = arith.constant 0 : index
    %152 = vector.load %arg19[%c0_132, %c0_133] : memref<1x64xf32, #tpu.memory_space<vmem>>, vector<1x64xf32>
    %153 = vector.broadcast %152 : vector<1x64xf32> to vector<32x64xf32>
    %154 = arith.addf %151, %153 : vector<32x64xf32>
    %cst_134 = arith.constant 0.000000e+00 : f32
    %155 = vector.broadcast %cst_134 : f32 to vector<32x64xf32>
    %156 = arith.maximumf %154, %155 : vector<32x64xf32>
    %c0_135 = arith.constant 0 : index
    %c0_136 = arith.constant 0 : index
    %157 = vector.load %arg22[%c0_135, %c0_136] : memref<64x4xf32, #tpu.memory_space<vmem>>, vector<64x4xf32>
    %cst_137 = arith.constant dense<0.000000e+00> : vector<32x4xf32>
    %158 = tpu.matmul %156, %157, %cst_137 {dimension_numbers = #tpu.dot_dimension_numbers<[1], [0], [0], [1], [0, 0, 1, 1], [], []>, precision = #tpu.contract_precision<fp32>} : vector<32x64xf32>, vector<64x4xf32>, vector<32x4xf32> -> vector<32x4xf32>
    %cst_138 = arith.constant dense<0.000000e+00> : vector<4xf32>
    %159 = vector.multi_reduction <add>, %158, %cst_138 [0] : vector<32x4xf32> to vector<4xf32>
    %160 = vector.shape_cast %159 : vector<4xf32> to vector<1x4xf32>
    %161 = arith.mulf %156, %156 : vector<32x64xf32>
    %cst_139 = arith.constant dense<0.000000e+00> : vector<32x4xf32>
    %162 = tpu.matmul %161, %157, %cst_139 {dimension_numbers = #tpu.dot_dimension_numbers<[1], [0], [0], [1], [0, 0, 1, 1], [], []>, precision = #tpu.contract_precision<fp32>} : vector<32x64xf32>, vector<64x4xf32>, vector<32x4xf32> -> vector<32x4xf32>
    %cst_140 = arith.constant dense<0.000000e+00> : vector<4xf32>
    %163 = vector.multi_reduction <add>, %162, %cst_140 [0] : vector<32x4xf32> to vector<4xf32>
    %164 = vector.shape_cast %163 : vector<4xf32> to vector<1x4xf32>
    %cst_141 = arith.constant 5.120000e+02 : f32
    %165 = vector.broadcast %cst_141 : f32 to vector<1x4xf32>
    %166 = arith.divf %160, %165 : vector<1x4xf32>
    %cst_142 = arith.constant 5.120000e+02 : f32
    %167 = vector.broadcast %cst_142 : f32 to vector<1x4xf32>
    %168 = arith.divf %164, %167 : vector<1x4xf32>
    %169 = arith.mulf %166, %166 : vector<1x4xf32>
    %170 = arith.subf %168, %169 : vector<1x4xf32>
    %cst_143 = arith.constant 0.000000e+00 : f32
    %171 = vector.broadcast %cst_143 : f32 to vector<1x4xf32>
    %172 = arith.maximumf %170, %171 : vector<1x4xf32>
    %cst_144 = arith.constant 9.99999974E-6 : f32
    %173 = vector.broadcast %cst_144 : f32 to vector<1x4xf32>
    %174 = arith.addf %172, %173 : vector<1x4xf32>
    %175 = math.rsqrt %174 : vector<1x4xf32>
    %c0_145 = arith.constant 0 : index
    %c0_146 = arith.constant 0 : index
    %176 = vector.load %arg23[%c0_145, %c0_146] : memref<4x64xf32, #tpu.memory_space<vmem>>, vector<4x64xf32>
    %c0_147 = arith.constant 0 : index
    %c0_148 = arith.constant 0 : index
    %177 = vector.load %arg20[%c0_147, %c0_148] : memref<1x64xf32, #tpu.memory_space<vmem>>, vector<1x64xf32>
    %cst_149 = arith.constant dense<0.000000e+00> : vector<1x64xf32>
    %178 = tpu.matmul %166, %176, %cst_149 {dimension_numbers = #tpu.dot_dimension_numbers<[1], [0], [0], [1], [0, 0, 1, 1], [], []>, precision = #tpu.contract_precision<fp32>} : vector<1x4xf32>, vector<4x64xf32>, vector<1x64xf32> -> vector<1x64xf32>
    %179 = vector.broadcast %178 : vector<1x64xf32> to vector<32x64xf32>
    %180 = arith.subf %156, %179 : vector<32x64xf32>
    %181 = vector.broadcast %177 : vector<1x64xf32> to vector<32x64xf32>
    %182 = arith.mulf %181, %180 : vector<32x64xf32>
    %cst_150 = arith.constant dense<0.000000e+00> : vector<1x64xf32>
    %183 = tpu.matmul %175, %176, %cst_150 {dimension_numbers = #tpu.dot_dimension_numbers<[1], [0], [0], [1], [0, 0, 1, 1], [], []>, precision = #tpu.contract_precision<fp32>} : vector<1x4xf32>, vector<4x64xf32>, vector<1x64xf32> -> vector<1x64xf32>
    %184 = vector.broadcast %183 : vector<1x64xf32> to vector<32x64xf32>
    %185 = arith.mulf %182, %184 : vector<32x64xf32>
    %c0_151 = arith.constant 0 : index
    %c0_152 = arith.constant 0 : index
    %186 = vector.load %arg21[%c0_151, %c0_152] : memref<1x64xf32, #tpu.memory_space<vmem>>, vector<1x64xf32>
    %187 = vector.broadcast %186 : vector<1x64xf32> to vector<32x64xf32>
    %188 = arith.addf %185, %187 : vector<32x64xf32>
    %c0_153 = arith.constant 0 : index
    %c0_154 = arith.constant 0 : index
    %c0_155 = arith.constant 0 : index
    %189 = vector.load %arg25[%c0_153, %c0_154, %c0_155] : memref<3x64x32xf32, #tpu.memory_space<vmem>>, vector<1x64x32xf32>
    %190 = vector.shape_cast %189 : vector<1x64x32xf32> to vector<64x32xf32>
    %c0_156 = arith.constant 0 : index
    %c0_157 = arith.constant 0 : index
    %c0_158 = arith.constant 0 : index
    %191 = vector.load %arg24[%c0_156, %c0_157, %c0_158] : memref<3x64x32xf32, #tpu.memory_space<vmem>>, vector<1x64x32xf32>
    %192 = vector.shape_cast %191 : vector<1x64x32xf32> to vector<64x32xf32>
    %cst_159 = arith.constant dense<0.000000e+00> : vector<32x32xf32>
    %193 = tpu.matmul %188, %192, %cst_159 {dimension_numbers = #tpu.dot_dimension_numbers<[1], [0], [0], [1], [0, 0, 1, 1], [], []>, precision = #tpu.contract_precision<fp32>} : vector<32x64xf32>, vector<64x32xf32>, vector<32x32xf32> -> vector<32x32xf32>
    %cst_160 = arith.constant dense<0.000000e+00> : vector<64x32xf32>
    %194 = tpu.matmul %190, %193, %cst_160 {dimension_numbers = #tpu.dot_dimension_numbers<[1], [0], [0], [1], [0, 0, 1, 1], [], []>, precision = #tpu.contract_precision<fp32>} : vector<64x32xf32>, vector<32x32xf32>, vector<64x32xf32> -> vector<64x32xf32>
    %c1_161 = arith.constant 1 : index
    %c0_162 = arith.constant 0 : index
    %c0_163 = arith.constant 0 : index
    %195 = vector.load %arg25[%c1_161, %c0_162, %c0_163] : memref<3x64x32xf32, #tpu.memory_space<vmem>>, vector<1x64x32xf32>
    %196 = vector.shape_cast %195 : vector<1x64x32xf32> to vector<64x32xf32>
    %c1_164 = arith.constant 1 : index
    %c0_165 = arith.constant 0 : index
    %c0_166 = arith.constant 0 : index
    %197 = vector.load %arg24[%c1_164, %c0_165, %c0_166] : memref<3x64x32xf32, #tpu.memory_space<vmem>>, vector<1x64x32xf32>
    %198 = vector.shape_cast %197 : vector<1x64x32xf32> to vector<64x32xf32>
    %cst_167 = arith.constant dense<0.000000e+00> : vector<32x32xf32>
    %199 = tpu.matmul %188, %198, %cst_167 {dimension_numbers = #tpu.dot_dimension_numbers<[1], [0], [0], [1], [0, 0, 1, 1], [], []>, precision = #tpu.contract_precision<fp32>} : vector<32x64xf32>, vector<64x32xf32>, vector<32x32xf32> -> vector<32x32xf32>
    %cst_168 = arith.constant dense<0.000000e+00> : vector<64x32xf32>
    %200 = tpu.matmul %196, %199, %cst_168 {dimension_numbers = #tpu.dot_dimension_numbers<[1], [0], [0], [1], [0, 0, 1, 1], [], []>, precision = #tpu.contract_precision<fp32>} : vector<64x32xf32>, vector<32x32xf32>, vector<64x32xf32> -> vector<64x32xf32>
    %201 = arith.addf %194, %200 : vector<64x32xf32>
    %c2_169 = arith.constant 2 : index
    %c0_170 = arith.constant 0 : index
    %c0_171 = arith.constant 0 : index
    %202 = vector.load %arg25[%c2_169, %c0_170, %c0_171] : memref<3x64x32xf32, #tpu.memory_space<vmem>>, vector<1x64x32xf32>
    %203 = vector.shape_cast %202 : vector<1x64x32xf32> to vector<64x32xf32>
    %c2_172 = arith.constant 2 : index
    %c0_173 = arith.constant 0 : index
    %c0_174 = arith.constant 0 : index
    %204 = vector.load %arg24[%c2_172, %c0_173, %c0_174] : memref<3x64x32xf32, #tpu.memory_space<vmem>>, vector<1x64x32xf32>
    %205 = vector.shape_cast %204 : vector<1x64x32xf32> to vector<64x32xf32>
    %cst_175 = arith.constant dense<0.000000e+00> : vector<32x32xf32>
    %206 = tpu.matmul %188, %205, %cst_175 {dimension_numbers = #tpu.dot_dimension_numbers<[1], [0], [0], [1], [0, 0, 1, 1], [], []>, precision = #tpu.contract_precision<fp32>} : vector<32x64xf32>, vector<64x32xf32>, vector<32x32xf32> -> vector<32x32xf32>
    %cst_176 = arith.constant dense<0.000000e+00> : vector<64x32xf32>
    %207 = tpu.matmul %203, %206, %cst_176 {dimension_numbers = #tpu.dot_dimension_numbers<[1], [0], [0], [1], [0, 0, 1, 1], [], []>, precision = #tpu.contract_precision<fp32>} : vector<64x32xf32>, vector<32x32xf32>, vector<64x32xf32> -> vector<64x32xf32>
    %208 = arith.addf %201, %207 : vector<64x32xf32>
    %c0_177 = arith.constant 0 : index
    %c0_178 = arith.constant 0 : index
    %209 = vector.load %arg26[%c0_177, %c0_178] : memref<1x32xf32, #tpu.memory_space<vmem>>, vector<1x32xf32>
    %210 = vector.broadcast %209 : vector<1x32xf32> to vector<64x32xf32>
    %211 = arith.addf %208, %210 : vector<64x32xf32>
    %212 = arith.negf %211 : vector<64x32xf32>
    %213 = math.exp %212 : vector<64x32xf32>
    %cst_179 = arith.constant 1.000000e+00 : f32
    %214 = vector.broadcast %cst_179 : f32 to vector<64x32xf32>
    %215 = arith.addf %214, %213 : vector<64x32xf32>
    %216 = arith.divf %214, %215 : vector<64x32xf32>
    %c0_180 = arith.constant 0 : index
    %c0_181 = arith.constant 0 : index
    %217 = vector.load %arg27[%c0_180, %c0_181] : memref<64x32xf32, #tpu.memory_space<vmem>>, vector<64x32xf32>
    tpu.vector_store %arg27[%c0_180, %c0_181], %216 {strides = array<i32>} : memref<64x32xf32, #tpu.memory_space<vmem>>, vector<64x32xf32>,
    return
  }
}

</mosaic_0001>

<bundles_post_ra>
// kernel: tpu_custom_call.1
= control target key start
LH: loop header
LB: loop body
LE: loop exit
PB: predicated region body
PF: predicated region fallthrough
CT: control target
= control target key end

     0   :  { %vm96_vm0 = vcmask 130048   ;;  %v27551_v0 = vmov 0.0|0.0   ;;  %vm27552_vm1 = vmmov 0   ;;  %v30863_v3 = vmov 0.0   ;;  %s30828_s1 = inlined_call_operand.vmem [shape: f32[2,16,16], index: 1, kind: input, shape index: {}]   ;;  %s30829_s0 = inlined_call_operand.vmem [shape: f32[2,16], index: 0, kind: input, shape index: {}]   ;;  %s30830_s3 = inlined_call_operand.vmem [shape: f32[3,16,32], index: 3, kind: input, shape index: {}]   ;;  %s30831_s2 = inlined_call_operand.vmem [shape: f32[2,1,16], index: 2, kind: input, shape index: {}]   ;;  %s30832_s4 = inlined_call_operand.vmem [shape: f32[3,8,4], index: 4, kind: input, shape index: {}]   ;;  %s30833_s8 = inlined_call_operand.vmem [shape: f32[32,8], index: 8, kind: input, shape index: {}]   ;;  %s30834_s5 = inlined_call_operand.vmem [shape: f32[1,32], index: 5, kind: input, shape index: {}]   ;;  %s30835_s9 = inlined_call_operand.vmem [shape: f32[8,32], index: 9, kind: input, shape index: {}]   ;;  %s30836_s10 = inlined_call_operand.vmem [shape: f32[3,32,64], index: 10, kind: input, shape index: {}]   ;;  %s30837_s6 = inlined_call_operand.vmem [shape: f32[1,32], index: 6, kind: input, shape index: {}]   ;;  %s30838_s7 = inlined_call_operand.vmem [shape: f32[1,32], index: 7, kind: input, shape index: {}]   ;;  %s30839_s11 = inlined_call_operand.vmem [shape: f32[3,16,8], index: 11, kind: input, shape index: {}]   ;;  %s30840_s15 = inlined_call_operand.vmem [shape: f32[64,8], index: 15, kind: input, shape index: {}]   ;;  %s30841_s12 = inlined_call_operand.vmem [shape: f32[1,64], index: 12, kind: input, shape index: {}]   ;;  %s30842_s16 = inlined_call_operand.vmem [shape: f32[8,64], index: 16, kind: input, shape index: {}]   ;;  %s30843_s17 = inlined_call_operand.vmem [shape: f32[3,64,64], index: 17, kind: input, shape index: {}]   ;;  %s30844_s13 = inlined_call_operand.vmem [shape: f32[1,64], index: 13, kind: input, shape index: {}]   ;;  %s30845_s14 = inlined_call_operand.vmem [shape: f32[1,64], index: 14, kind: input, shape index: {}]   ;;  %s30846_s18 = inlined_call_operand.vmem [shape: f32[3,32,16], index: 18, kind: input, shape index: {}]   ;;  %s30847_s22 = inlined_call_operand.vmem [shape: f32[64,4], index: 22, kind: input, shape index: {}]   ;;  %s30848_s19 = inlined_call_operand.vmem [shape: f32[1,64], index: 19, kind: input, shape index: {}]   ;;  %s30849_s23 = inlined_call_operand.vmem [shape: f32[4,64], index: 23, kind: input, shape index: {}]   ;;  %s30850_s24 = inlined_call_operand.vmem [shape: f32[3,64,32], index: 24, kind: input, shape index: {}]   ;;  %s30851_s20 = inlined_call_operand.vmem [shape: f32[1,64], index: 20, kind: input, shape index: {}]   ;;  %s30852_s21 = inlined_call_operand.vmem [shape: f32[1,64], index: 21, kind: input, shape index: {}]   ;;  %s30853_s25 = inlined_call_operand.vmem [shape: f32[3,64,32], index: 25, kind: input, shape index: {}]   ;;  %s30854_s26 = inlined_call_operand.vmem [shape: f32[1,32], index: 26, kind: input, shape index: {}]   ;;  %s30855_s27 = inlined_call_operand.vmem [shape: f32[64,32], index: 27, kind: output, shape index: {}]  }
   0x1   :  { %30880 = sst [smem:[#allocation3_spill]] %s30828_s1  ;;  %25515 = vmatprep.subr.bf16.mxu1 %v27551_v0  ;;  %22849 = vmatprep.mubr.msk.f32.mxu1 %vm27552_vm1, %v30863_v3  ;;  %vm559_vm2 = vcmask 123904   ;;  %vm1962_vm3 = vcmask 31744   ;;  %vm1966_vm4 = vcmask 1043456   ;;  %vm3798_vm5 = vcmask 261120  }
   0x2   :  { %30881 = sst [smem:[#allocation4_spill]] %s30829_s0  ;;  %25518 = vmatprep.subr.bf16.mxu0 %v27551_v0  ;;  %22856 = vmatprep.mubr.msk.f32.mxu0 %vm27552_vm1, %v30863_v3  ;;  %vm4287_vm6 = vcmask 64512   ;;  %vm8710_vm7 = vcmask 523264  }
   0x3   :  { %30882 = sst [smem:[#allocation5_spill]] %s30830_s3  ;;  %s30893_s0 = sld [smem:[#allocation4_spill]] }
   0x4   :  { %30883 = sst [smem:[#allocation6_spill]] %s30831_s2  ;;  %s30894_s3 = sld [smem:[#allocation5_spill]] }
   0x5   :  { %30884 = sst [smem:[#allocation7_spill]] %s30832_s4 }
   0x6   :  { %30885 = sst [smem:[#allocation8_spill]] %s30833_s8  ;;  %s30896_s2 = sld [smem:[#allocation7_spill]] }
   0x7   :  { %30886 = sst [smem:[#allocation9_spill]] %s30834_s5  ;;  %s30897_s29 = sld [smem:[#allocation8_spill]] }
   0x8   :  { %30887 = sst [smem:[#allocation10_spill]] %s30835_s9 }
   0x9   :  { %30888 = sst [smem:[#allocation11_spill]] %s30836_s10  ;;  %v86_v4 = vld [vmem:[%s30893_s0] sm:$0x3]  ;;  %s30899_s28 = sld [smem:[#allocation10_spill]] }
   0xa   :  { %30889 = sst [smem:[#allocation12_spill]] %s30837_s6  ;;  %s30892_s10 = sld [smem:[#allocation3_spill]]  ;;  %v98_v7 = vsel %vm96_vm0, %v86_v4, 0  ;;  %v1034_v41 = vld [vmem:[%s30894_s3] sm:$0xff]  ;;  %v1035_v42 = vld [vmem:[%s30894_s3 + $0x8] sm:$0xff]  ;;  %v21368_v43 = vld [vmem:[%s30894_s3 + $0x10] sm:$0xff] }
   0xb   :  { %30890 = sst [smem:[#allocation13_spill]] %s30838_s7  ;;  %v27716_v10 = vand.u32 4294901760, %v98_v7  ;;  %v1040_v44 = vand.u32 4294901760, %v1034_v41  ;;  %v1043_v45 = vand.u32 4294901760, %v1035_v42  ;;  %v21369_v46 = vld [vmem:[%s30894_s3 + $0x18] sm:$0xff]  ;;  %v1504_v47 = vand.u32 4294901760, %v21368_v43 }
   0xc   :  { %30891 = sst [smem:[#allocation14_spill]] %s30839_s11  ;;  %v1507_v48 = vand.u32 4294901760, %v21369_v46  ;;  %s30898_s6 = sld [smem:[#allocation9_spill]] }
   0xd   :  { %v168_v16 = vsub.f32 %v98_v7, %v27716_v10  ;;  %v27773_v49 = vpack.c.bf16 %v1043_v45, %v1040_v44  ;;  %v1118_v50 = vsub.f32 %v1034_v41, %v1040_v44  ;;  %v1125_v51 = vsub.f32 %v1035_v42, %v1043_v45  ;;  %s30895_s7 = sld [smem:[#allocation6_spill]]  ;;  %s30901_s11 = sld [smem:[#allocation12_spill]] }
   0xe   :  { %v1582_v52 = vsub.f32 %v21368_v43, %v1504_v47  ;;  %v27775_v53 = vpack.c.bf16 %v1507_v48, %v1504_v47  ;;  %v1589_v54 = vsub.f32 %v21369_v46, %v1507_v48  ;;  %s30902_s4 = sld [smem:[#allocation13_spill]]  ;;  %s30903_s5 = sld [smem:[#allocation14_spill]] }
   0xf   :  { %v169_v21 = vand.u32 4294901760, %v168_v16  ;;  %v1119_v55 = vand.u32 4294901760, %v1118_v50  ;;  %v1126_v56 = vand.u32 4294901760, %v1125_v51  ;;  %v25558_v7 = vpack.c.bf16 %v1125_v51, %v1118_v50 }
  0x10   :  { %v87_v1 = vld [vmem:[%s30892_s10] sm:$0xff]  ;;  %v88_v2 = vld [vmem:[%s30892_s10 + $0x8] sm:$0xff]  ;;  %v21363_v8 = vld [vmem:[%s30892_s10 + $0x10] sm:$0xff]  ;;  %v1583_v57 = vand.u32 4294901760, %v1582_v52  ;;  %v1590_v58 = vand.u32 4294901760, %v1589_v54 }
  0x11   :  { %v101_v5 = vand.u32 4294901760, %v87_v1  ;;  %v104_v6 = vand.u32 4294901760, %v88_v2  ;;  %v21364_v9 = vld [vmem:[%s30892_s10 + $0x18] sm:$0xff]  ;;  %v573_v11 = vand.u32 4294901760, %v21363_v8  ;;  %v170_v26 = vsub.f32 %v168_v16, %v169_v21 }
  0x12   :  { %v576_v12 = vand.u32 4294901760, %v21364_v9  ;;  %v1120_v59 = vsub.f32 %v1118_v50, %v1119_v55  ;;  %v1127_v60 = vsub.f32 %v1125_v51, %v1126_v56  ;;  %v1584_v61 = vsub.f32 %v1582_v52, %v1583_v57  ;;  %v21372_v50 = vld [vmem:[%s30894_s3 + $0x28] sm:$0xff] }
  0x13   :  { %v25516_v13 = vpack.c.bf16 %v104_v6, %v101_v5  ;;  %v179_v14 = vsub.f32 %v87_v1, %v101_v5  ;;  %v186_v15 = vsub.f32 %v88_v2, %v104_v6  ;;  %v651_v17 = vsub.f32 %v21363_v8, %v573_v11 }
  0x14   :  { %v658_v18 = vsub.f32 %v21364_v9, %v576_v12  ;;  %v25534_v31 = vpack.c.bf16 %v576_v12, %v573_v11  ;;  %v171_v32 = vand.u32 4294901760, %v170_v26  ;;  %v1591_v62 = vsub.f32 %v1589_v54, %v1590_v58 }
  0x15   :  { %25517 = vmatpush3.bf16.msra.mxu1 %v25516_v13  ;;  %v180_v19 = vand.u32 4294901760, %v179_v14  ;;  %v187_v20 = vand.u32 4294901760, %v186_v15  ;;  %v652_v22 = vand.u32 4294901760, %v651_v17  ;;  %v25522_v36 = vpack.c.bf16 %v186_v15, %v179_v14 }
  0x16   :  { %25533 = vmatprep.subr.bf16.mxu1 %v27551_v0  ;;  %v659_v23 = vand.u32 4294901760, %v658_v18  ;;  %v25540_v38 = vpack.c.bf16 %v658_v18, %v651_v17  ;;  %v1121_v63 = vand.u32 4294901760, %v1120_v59  ;;  %v1128_v1 = vand.u32 4294901760, %v1127_v60 }
  0x17   :  { %v181_v24 = vsub.f32 %v179_v14, %v180_v19  ;;  %v188_v25 = vsub.f32 %v186_v15, %v187_v20  ;;  %v653_v27 = vsub.f32 %v651_v17, %v652_v22  ;;  %v25528_v39 = vpack.c.bf16 %v187_v20, %v180_v19 }
  0x18   :  { %v660_v28 = vsub.f32 %v658_v18, %v659_v23  ;;  %22850 = vmatmul.mubr.f32.vlgmr.msra.gmra.mrb[0].mxu1 %v171_v32  ;;  %v25546_v40 = vpack.c.bf16 %v659_v23, %v652_v22  ;;  %v1585_v2 = vand.u32 4294901760, %v1584_v61  ;;  %v1592_v4 = vand.u32 4294901760, %v1591_v62  ;;  %v21366_v18 = vld [vmem:[%s30895_s7 + $0x1] ss:$0 sm:$0xff] }
  0x19   :  { %v182_v29 = vand.u32 4294901760, %v181_v24  ;;  %v189_v30 = vand.u32 4294901760, %v188_v25  ;;  %v654_v33 = vand.u32 4294901760, %v653_v27  ;;  %25535 = vmatpush3.bf16.msra.mxu1 %v25534_v31  ;;  %22891 = vmatprep.mubr.msk.f32.mxu1 %vm27552_vm1, %v30863_v3  ;;  %v25555_v5 = vpack.c.bf16 %v1128_v1, %v1121_v63 }
  0x1a   :  { %v661_v34 = vand.u32 4294901760, %v660_v28  ;;  %25536 = vmatprep.subr.bf16.mxu1 %v27551_v0  ;;  %v25573_v6 = vpack.c.bf16 %v1592_v4, %v1585_v2  ;;  %v25576_v8 = vpack.c.bf16 %v1589_v54, %v1582_v52  ;;  %v25564_v9 = vpack.c.bf16 %v1126_v56, %v1119_v55 }
  0x1b   :  { %v25519_v35 = vpack.c.bf16 %v189_v30, %v182_v29  ;;  %v21367_v29 = vld [vmem:[%s30896_s2 + $0x8] sm:$0xff]  ;;  %v2877_v54 = vand.u32 4294901760, %v21372_v50 }
  0x1c   :  { %v25537_v37 = vpack.c.bf16 %v661_v34, %v654_v33  ;;  %22892 = vmatmul.mubr.f32.vlgmr.msra.gmra.mrb[2].mxu1 %v171_v32  ;;  %v1964_v30 = vsel %vm1962_vm3, %v21367_v29, 0  ;;  %v1033_v33 = vld [vmem:[%s30896_s2] sm:$0xff] }
  0x1d   :  { %25520 = vmatpush3.bf16.msra.mxu0 %v25519_v35  ;;  %22898 = vmatprep.mubr.msk.f32.mxu1 %vm27552_vm1, %v30863_v3  ;;  %v2417_v35 = vsel %vm1962_vm3, %v1033_v33, 0  ;;  %v27888_v60 = vsub.f32 %v21372_v50, %v2877_v54 }
  0x1e   :  { %25521 = vmatprep.subr.bf16.mxu0 %v27551_v0  ;;  %25538 = vmatpush3.bf16.msra.mxu1 %v25537_v37  ;;  %v27861_v37 = vand.u32 4294901760, %v2417_v35 }
  0x1f   :  { %25539 = vmatprep.subr.bf16.mxu1 %v27551_v0  ;;  %v2960_v1 = vand.u32 4294901760, %v27888_v60 }
  0x20   :  { %22857 = vmatmul.mubr.f32.vlgmr.msra.gmra.mrb[0].mxu0 %v27716_v10  ;;  %v27866_v46 = vsub.f32 %v2417_v35, %v27861_v37 }
  0x21   :  { %25523 = vmatpush3.bf16.msra.mxu0 %v25522_v36  ;;  %22863 = vmatprep.mubr.msk.f32.mxu0 %vm27552_vm1, %v30863_v3 }
  0x22   :  { %25524 = vmatprep.subr.bf16.mxu0 %v27551_v0  ;;  %v2490_v52 = vand.u32 4294901760, %v27866_v46 }
  0x24   :  { %22899 = vmatmul.mubr.f32.vlgmr.msra.gmra.mrb[2].mxu1 %v27716_v10 }
  0x25   :  { %25541 = vmatpush3.bf16.msra.mxu1 %v25540_v38  ;;  %22905 = vmatprep.mubr.msk.f32.mxu1 %vm27552_vm1, %v30863_v3 }
  0x26   :  { %25542 = vmatprep.subr.bf16.mxu1 %v27551_v0 }
  0x28   :  { %22864 = vmatmul.mubr.f32.vlgmr.msra.gmra.mrb[0].mxu0 %v168_v16 }
  0x29   :  { %25526 = vmatpush3.bf16.msra.mxu0 %v25516_v13  ;;  %22870 = vmatprep.mubr.msk.f32.mxu0 %vm27552_vm1, %v30863_v3 }
  0x2a   :  { %25527 = vmatprep.subr.bf16.mxu0 %v27551_v0 }
  0x2c   :  { %22906 = vmatmul.mubr.f32.vlgmr.msra.gmra.mrb[2].mxu1 %v168_v16 }
  0x2d   :  { %25544 = vmatpush3.bf16.msra.mxu1 %v25534_v31  ;;  %22912 = vmatprep.mubr.msk.f32.mxu1 %vm27552_vm1, %v30863_v3 }
  0x2e   :  { %25545 = vmatprep.subr.bf16.mxu1 %v27551_v0 }
  0x30   :  { %22871 = vmatmul.mubr.f32.vlgmr.msra.gmra.mrb[0].mxu0 %v169_v21 }
  0x31   :  { %25529 = vmatpush3.bf16.msra.mxu0 %v25528_v39  ;;  %22877 = vmatprep.mubr.msk.f32.mxu0 %vm27552_vm1, %v30863_v3 }
  0x32   :  { %25530 = vmatprep.subr.bf16.mxu0 %v27551_v0 }
  0x34   :  { %22913 = vmatmul.mubr.f32.vlgmr.msra.gmra.mrb[2].mxu1 %v169_v21 }
  0x35   :  { %25547 = vmatpush3.bf16.msra.mxu1 %v25546_v40  ;;  %22919 = vmatprep.mubr.msk.f32.mxu1 %vm27552_vm1, %v30863_v3 }
  0x36   :  { %25548 = vmatprep.subr.bf16.mxu1 %v27551_v0 }
  0x38   :  { %22878 = vmatmul.mubr.f32.vlgmr.msra.gmra.mrb[0].mxu0 %v27716_v10 }
  0x39   :  { %25532 = vmatpush3.bf16.msra.mxu0 %v25516_v13  ;;  %22884 = vmatprep.mubr.msk.f32.mxu0 %vm27552_vm1, %v30863_v3  ;;  %v21362_v13 = vld [vmem:[%s30895_s7] ss:$0 sm:$0xff] }
  0x3a   :  { %25551 = vmatprep.subr.bf16.mxu0 %v27551_v0 }
  0x3c   :  { %22920 = vmatmul.mubr.f32.vlgmr.msra.gmra.mrb[2].mxu1 %v27716_v10 }
  0x3d   :  { %25550 = vmatpush3.bf16.msra.mxu1 %v25534_v31  ;;  %22926 = vmatprep.mubr.msk.f32.mxu1 %vm27552_vm1, %v30863_v3  ;;  %v27854_v31 = vand.u32 4294901760, %v1964_v30 }
  0x3e   :  { %25569 = vmatprep.subr.bf16.mxu1 %v27551_v0 }
  0x3f   :  { %v2037_v32 = vsub.f32 %v1964_v30, %v27854_v31 }
  0x40   :  { %22885 = vmatmul.mubr.f32.vlgmr.msra.gmra.mrb[0].mxu0 %v27716_v10 }
  0x41   :  { %22933 = vmatprep.mubr.msk.f32.mxu0 %vm27552_vm1, %v30863_v3  ;;  %25553 = vmatpush3.bf16.msra.mxu0 %v27773_v49  ;;  %v2038_v34 = vand.u32 4294901760, %v2037_v32 }
  0x42   :  { %25554 = vmatprep.subr.bf16.mxu0 %v27551_v0 }
  0x43   :  { %v2039_v36 = vsub.f32 %v2037_v32, %v2038_v34 }
  0x44   :  { %22927 = vmatmul.mubr.f32.vlgmr.msra.gmra.mrb[2].mxu1 %v27716_v10  ;;  %v25582_v10 = vpack.c.bf16 %v1590_v58, %v1583_v57  ;;  %v2491_v58 = vsub.f32 %v27866_v46, %v2490_v52 }
  0x45   :  { %22975 = vmatprep.mubr.msk.f32.mxu1 %vm27552_vm1, %v30863_v3  ;;  %25571 = vmatpush3.bf16.msra.mxu1 %v27775_v53  ;;  %v2040_v44 = vand.u32 4294901760, %v2039_v36 }
  0x46   :  { %25572 = vmatprep.subr.bf16.mxu1 %v27551_v0  ;;  %v2492_v62 = vand.u32 4294901760, %v2491_v58 }
  0xeb   :  { %v173_v11 = vpop.f32.mrb[0].mxu1 }
  0xec   :  { %v22851_v12 = vpop.f32.mrb[1].mxu1  ;;  %v174_v14 = vadd.f32 %v21362_v13, %v173_v11 }
 0x113   :  { %v555_v15 = vpop.f32.mrb[0].mxu0 }
 0x114   :  { %v26962_v16 = vadd.f32 %v555_v15, %v174_v14  ;;  %v22886_v17 = vpop.f32.mrb[1].mxu0 }
 0x116   :  { %560 = vst.msk [vmem:[#allocation2] sm:$0x3] %vm559_vm2, %v26962_v16 }
 0x117   :  { %v1027_v19 = vpop.f32.mrb[2].mxu1 }
 0x118   :  { %v26963_v20 = vadd.f32 %v21366_v18, %v1027_v19  ;;  %v22928_v21 = vpop.f32.mrb[3].mxu1 }
 0x11a   :  { %1031 = vst.msk [vmem:[#allocation2 + $0x2] sm:$0x3] %vm559_vm2, %v26963_v20 }
 0x121   :  { %v1032_v22 = vld [vmem:[#allocation2] sm:$0xf] }
 0x122   :  { %v1037_v23 = vsel %vm96_vm0, %v1032_v22, 0 }
 0x123   :  { %v27788_v24 = vand.u32 4294901760, %v1037_v23 }
 0x125   :  { %v27791_v25 = vsub.f32 %v1037_v23, %v27788_v24 }
 0x127   :  { %v27794_v26 = vand.u32 4294901760, %v27791_v25 }
 0x129   :  { %v1109_v27 = vsub.f32 %v27791_v25, %v27794_v26 }
 0x12b   :  { %v27798_v28 = vand.u32 4294901760, %v1109_v27 }
 0x12d   :  { %22934 = vmatmul.mubr.f32.vlgmr.msra.gmra.mrb[2].mxu0 %v27798_v28  ;;  %22976 = vmatmul.mubr.f32.vlgmr.msra.gmra.mrb[4].mxu1 %v27798_v28 }
 0x12e   :  { %25556 = vmatpush3.bf16.msra.mxu0 %v25555_v5  ;;  %25574 = vmatpush3.bf16.msra.mxu1 %v25573_v6  ;;  %v2961_v5 = vsub.f32 %v27888_v60, %v2960_v1 }
 0x12f   :  { %22940 = vmatprep.mubr.msk.f32.mxu0 %vm27552_vm1, %v30863_v3  ;;  %22982 = vmatprep.mubr.msk.f32.mxu1 %vm27552_vm1, %v30863_v3 }
 0x130   :  { %25557 = vmatprep.subr.bf16.mxu0 %v27551_v0  ;;  %25575 = vmatprep.subr.bf16.mxu1 %v27551_v0 }
 0x135   :  { %22941 = vmatmul.mubr.f32.vlgmr.msra.gmra.mrb[2].mxu0 %v27788_v24  ;;  %22983 = vmatmul.mubr.f32.vlgmr.msra.gmra.mrb[4].mxu1 %v27788_v24 }
 0x136   :  { %25559 = vmatpush3.bf16.msra.mxu0 %v25558_v7  ;;  %25577 = vmatpush3.bf16.msra.mxu1 %v25576_v8 }
 0x137   :  { %22947 = vmatprep.mubr.msk.f32.mxu0 %vm27552_vm1, %v30863_v3  ;;  %22989 = vmatprep.mubr.msk.f32.mxu1 %vm27552_vm1, %v30863_v3 }
 0x138   :  { %25560 = vmatprep.subr.bf16.mxu0 %v27551_v0  ;;  %25578 = vmatprep.subr.bf16.mxu1 %v27551_v0 }
 0x13d   :  { %22948 = vmatmul.mubr.f32.vlgmr.msra.gmra.mrb[2].mxu0 %v27791_v25  ;;  %22990 = vmatmul.mubr.f32.vlgmr.msra.gmra.mrb[4].mxu1 %v27791_v25 }
 0x13e   :  { %25562 = vmatpush3.bf16.msra.mxu0 %v27773_v49  ;;  %25580 = vmatpush3.bf16.msra.mxu1 %v27775_v53 }
 0x13f   :  { %22954 = vmatprep.mubr.msk.f32.mxu0 %vm27552_vm1, %v30863_v3  ;;  %22996 = vmatprep.mubr.msk.f32.mxu1 %vm27552_vm1, %v30863_v3 }
 0x140   :  { %25563 = vmatprep.subr.bf16.mxu0 %v27551_v0  ;;  %25581 = vmatprep.subr.bf16.mxu1 %v27551_v0 }
 0x145   :  { %22955 = vmatmul.mubr.f32.vlgmr.msra.gmra.mrb[2].mxu0 %v27794_v26  ;;  %22997 = vmatmul.mubr.f32.vlgmr.msra.gmra.mrb[4].mxu1 %v27794_v26 }
 0x146   :  { %25565 = vmatpush3.bf16.msra.mxu0 %v25564_v9  ;;  %25583 = vmatpush3.bf16.msra.mxu1 %v25582_v10  ;;  %v2962_v9 = vand.u32 4294901760, %v2961_v5 }
 0x147   :  { %22961 = vmatprep.mubr.msk.f32.mxu0 %vm27552_vm1, %v30863_v3  ;;  %23003 = vmatprep.mubr.msk.f32.mxu1 %vm27552_vm1, %v30863_v3 }
 0x148   :  { %25566 = vmatprep.subr.bf16.mxu0 %v27551_v0  ;;  %25584 = vmatprep.subr.bf16.mxu1 %v27551_v0 }
 0x14d   :  { %22962 = vmatmul.mubr.f32.vlgmr.msra.gmra.mrb[2].mxu0 %v27788_v24  ;;  %23004 = vmatmul.mubr.f32.vlgmr.msra.gmra.mrb[4].mxu1 %v27788_v24 }
 0x14e   :  { %25568 = vmatpush3.bf16.msra.mxu0 %v27773_v49  ;;  %25586 = vmatpush3.bf16.msra.mxu1 %v27775_v53  ;;  %v21371_v49 = vld [vmem:[%s30894_s3 + $0x20] sm:$0xff] }
 0x14f   :  { %22968 = vmatprep.mubr.msk.f32.mxu0 %vm27552_vm1, %v30863_v3  ;;  %23010 = vmatprep.mubr.msk.f32.mxu1 %vm27552_vm1, %v30863_v3  ;;  %v2874_v53 = vand.u32 4294901760, %v21371_v49 }
 0x150   :  { %23013 = vmatprep.subr.mxu0 %v30863_v3  ;;  %23018 = vmatprep.subr.mxu1 %v30863_v3 }
 0x151   :  { %v27886_v59 = vsub.f32 %v21371_v49, %v2874_v53  ;;  %v25588_v7 = vpack.c.bf16 %v2877_v54, %v2874_v53 }
 0x153   :  { %v2953_v63 = vand.u32 4294901760, %v27886_v59  ;;  %v25594_v11 = vpack.c.bf16 %v27888_v60, %v27886_v59 }
 0x155   :  { %22969 = vmatmul.mubr.f32.vlgmr.msra.gmra.mrb[2].mxu0 %v27788_v24  ;;  %23011 = vmatmul.mubr.f32.vlgmr.msra.gmra.mrb[4].mxu1 %v27788_v24  ;;  %v2954_v4 = vsub.f32 %v27886_v59, %v2953_v63  ;;  %v25600_v12 = vpack.c.bf16 %v2960_v1, %v2953_v63  ;;  %v3794_v63 = vld [vmem:[%s30897_s29] sm:$0xff]  ;;  %v3795_v1 = vld [vmem:[%s30897_s29 + $0x8] sm:$0xff] }
 0x156   :  { %23015 = vmatprep.mubr.msk.f32.mxu0 %vm27552_vm1, %v30863_v3  ;;  %23020 = vmatprep.mubr.msk.f32.mxu1 %vm27552_vm1, %v30863_v3 }
 0x157   :  { %v2955_v8 = vand.u32 4294901760, %v2954_v4  ;;  %v3806_v4 = vand.u32 4294901760, %v3795_v1 }
 0x159   :  { %v25591_v10 = vpack.c.bf16 %v2962_v9, %v2955_v8  ;;  %v3890_v9 = vsub.f32 %v3795_v1, %v3806_v4 }
 0x228   :  { %v1494_v38 = vpop.f32.mrb[2].mxu0  ;;  %v1958_v39 = vpop.f32.mrb[4].mxu1 }
 0x229   :  { %v2420_v40 = vsel %vm1966_vm4, %v1494_v38, 0  ;;  %v1968_v41 = vsel %vm1966_vm4, %v1958_v39, 0  ;;  %v22970_v42 = vpop.f32.mrb[3].mxu0  ;;  %v23012_v43 = vpop.f32.mrb[5].mxu1 }
 0x22a   :  { %v1971_v45 = vand.u32 4294901760, %v1968_v41  ;;  %v27868_v47 = vand.u32 4294901760, %v2420_v40 }
 0x22c   :  { %v2048_v48 = vsub.f32 %v1968_v41, %v1971_v45  ;;  %23014 = vmatpush3.msra.mxu0 %v1971_v45  ;;  %v2500_v55 = vsub.f32 %v2420_v40, %v27868_v47 }
 0x22d   :  { %23016 = vmatmul.mubr.f32.vlgmr.msra.gmra.mrb[4].mxu0 %v2040_v44  ;;  %23023 = vmatprep.subr.mxu0 %v30863_v3 }
 0x22e   :  { %v2049_v51 = vand.u32 4294901760, %v2048_v48  ;;  %23024 = vmatpush3.msra.mxu0 %v2048_v48  ;;  %23025 = vmatprep.mubr.msk.f32.mxu0 %vm27552_vm1, %v30863_v3  ;;  %v2501_v61 = vand.u32 4294901760, %v2500_v55 }
 0x22f   :  { %23033 = vmatprep.subr.mxu0 %v30863_v3 }
 0x230   :  { %v2050_v56 = vsub.f32 %v2048_v48, %v2049_v51  ;;  %v2502_v2 = vsub.f32 %v2500_v55, %v2501_v61  ;;  %v21370_v48 = vld [vmem:[%s30896_s2 + $0x10] sm:$0xff] }
 0x231   :  { %23026 = vmatmul.mubr.f32.vlgmr.msra.gmra.mrb[6].mxu0 %v2037_v32  ;;  %v3333_v49 = vsel %vm1962_vm3, %v21370_v48, 0 }
 0x232   :  { %v2051_v57 = vand.u32 4294901760, %v2050_v56  ;;  %23034 = vmatpush3.msra.mxu0 %v2049_v51  ;;  %23035 = vmatprep.mubr.msk.f32.mxu0 %vm27552_vm1, %v30863_v3  ;;  %v2503_v6 = vand.u32 4294901760, %v2502_v2  ;;  %v3404_v50 = vand.u32 4294901760, %v3333_v49  ;;  %v3803_v2 = vand.u32 4294901760, %v3794_v63 }
 0x233   :  { %23043 = vmatprep.subr.mxu0 %v30863_v3 }
 0x234   :  { %23019 = vmatpush3.msra.mxu1 %v2051_v57  ;;  %v3405_v51 = vsub.f32 %v3333_v49, %v3404_v50  ;;  %v27990_v5 = vpack.c.bf16 %v3806_v4, %v3803_v2  ;;  %v3883_v8 = vsub.f32 %v3794_v63, %v3803_v2 }
 0x235   :  { %23021 = vmatmul.mubr.f32.vlgmr.msra.gmra.mrb[6].mxu1 %v27854_v31  ;;  %23028 = vmatprep.subr.mxu1 %v30863_v3 }
 0x236   :  { %23036 = vmatmul.mubr.f32.vlgmr.msra.gmra.mrb[8].mxu0 %v27854_v31  ;;  %23029 = vmatpush3.msra.mxu1 %v1971_v45 }
 0x237   :  { %23044 = vmatpush3.msra.mxu0 %v27868_v47  ;;  %23030 = vmatprep.mubr.msk.f32.mxu1 %vm27552_vm1, %v30863_v3 }
 0x238   :  { %23038 = vmatprep.subr.mxu1 %v30863_v3  ;;  %23045 = vmatprep.mubr.msk.f32.mxu0 %vm27552_vm1, %v30863_v3 }
 0x239   :  { %23053 = vmatprep.subr.mxu0 %v30863_v3  ;;  %23031 = vmatmul.mubr.f32.vlgmr.msra.gmra.mrb[8].mxu1 %v2038_v34 }
 0x23a   :  { %23039 = vmatpush3.msra.mxu1 %v1971_v45  ;;  %23046 = vmatmul.mubr.f32.vlgmr.msra.gmra.mrb[10].mxu0 %v2492_v62 }
 0x23b   :  { %23054 = vmatpush3.msra.mxu0 %v2500_v55  ;;  %23040 = vmatprep.mubr.msk.f32.mxu1 %vm27552_vm1, %v30863_v3 }
 0x23c   :  { %23048 = vmatprep.subr.mxu1 %v30863_v3  ;;  %23055 = vmatprep.mubr.msk.f32.mxu0 %vm27552_vm1, %v30863_v3 }
 0x23d   :  { %23063 = vmatprep.subr.mxu0 %v30863_v3  ;;  %23041 = vmatmul.mubr.f32.vlgmr.msra.gmra.mrb[10].mxu1 %v27854_v31 }
 0x23e   :  { %23049 = vmatpush3.msra.mxu1 %v2503_v6  ;;  %23056 = vmatmul.mubr.f32.vlgmr.msra.gmra.mrb[12].mxu0 %v27866_v46  ;;  %v3796_v6 = vld [vmem:[%s30897_s29 + $0x10] sm:$0xff] }
 0x23f   :  { %23064 = vmatpush3.msra.mxu0 %v2501_v61  ;;  %23050 = vmatprep.mubr.msk.f32.mxu1 %vm27552_vm1, %v30863_v3 }
 0x240   :  { %23058 = vmatprep.subr.mxu1 %v30863_v3  ;;  %23065 = vmatprep.mubr.msk.f32.mxu0 %vm27552_vm1, %v30863_v3 }
 0x241   :  { %23051 = vmatmul.mubr.f32.vlgmr.msra.gmra.mrb[12].mxu1 %v27861_v37  ;;  %25587 = vmatprep.subr.bf16.mxu0 %v27551_v0 }
 0x242   :  { %23059 = vmatpush3.msra.mxu1 %v27868_v47  ;;  %23066 = vmatmul.mubr.f32.vlgmr.msra.gmra.mrb[14].mxu0 %v27861_v37 }
 0x243   :  { %25589 = vmatpush3.bf16.msra.mxu0 %v25588_v7  ;;  %23060 = vmatprep.mubr.msk.f32.mxu1 %vm27552_vm1, %v30863_v3 }
 0x244   :  { %23068 = vmatprep.subr.mxu1 %v30863_v3  ;;  %23077 = vmatprep.mubr.msk.f32.mxu0 %vm27552_vm1, %v30863_v3 }
 0x245   :  { %23061 = vmatmul.mubr.f32.vlgmr.msra.gmra.mrb[14].mxu1 %v2490_v52  ;;  %25590 = vmatprep.subr.bf16.mxu0 %v27551_v0  ;;  %v3406_v52 = vand.u32 4294901760, %v3405_v51 }
 0x246   :  { %23069 = vmatpush3.msra.mxu1 %v27868_v47  ;;  %23078 = vmatmul.mubr.f32.vlgmr.msra.gmra.mrb[16].mxu0 %v27798_v28 }
 0x247   :  { %23070 = vmatprep.mubr.msk.f32.mxu1 %vm27552_vm1, %v30863_v3  ;;  %25592 = vmatpush3.bf16.msra.mxu0 %v25591_v10  ;;  %v3407_v53 = vsub.f32 %v3405_v51, %v3406_v52  ;;  %v3809_v10 = vand.u32 4294901760, %v3796_v6 }
 0x248   :  { %23084 = vmatprep.mubr.msk.f32.mxu0 %vm27552_vm1, %v30863_v3  ;;  %25593 = vmatprep.subr.bf16.mxu0 %v27551_v0 }
 0x249   :  { %23071 = vmatmul.mubr.f32.vlgmr.msra.gmra.mrb[16].mxu1 %v27861_v37  ;;  %23115 = vmatprep.subr.mxu1 %v30863_v3  ;;  %v3408_v57 = vand.u32 4294901760, %v3407_v53 }
 0x24a   :  { %23117 = vmatprep.mubr.msk.f32.mxu1 %vm27552_vm1, %v30863_v3 }
 0x24e   :  { %23085 = vmatmul.mubr.f32.vlgmr.msra.gmra.mrb[16].mxu0 %v27788_v24 }
 0x24f   :  { %25595 = vmatpush3.bf16.msra.mxu0 %v25594_v11  ;;  %23091 = vmatprep.mubr.msk.f32.mxu0 %vm27552_vm1, %v30863_v3 }
 0x250   :  { %25596 = vmatprep.subr.bf16.mxu0 %v27551_v0 }
 0x256   :  { %23092 = vmatmul.mubr.f32.vlgmr.msra.gmra.mrb[16].mxu0 %v27791_v25 }
 0x257   :  { %25598 = vmatpush3.bf16.msra.mxu0 %v25588_v7  ;;  %23098 = vmatprep.mubr.msk.f32.mxu0 %vm27552_vm1, %v30863_v3 }
 0x258   :  { %25599 = vmatprep.subr.bf16.mxu0 %v27551_v0 }
 0x25e   :  { %23099 = vmatmul.mubr.f32.vlgmr.msra.gmra.mrb[16].mxu0 %v27794_v26 }
 0x25f   :  { %25601 = vmatpush3.bf16.msra.mxu0 %v25600_v12  ;;  %23105 = vmatprep.mubr.msk.f32.mxu0 %vm27552_vm1, %v30863_v3  ;;  %v3884_v12 = vand.u32 4294901760, %v3883_v8 }
 0x260   :  { %25602 = vmatprep.subr.bf16.mxu0 %v27551_v0 }
 0x266   :  { %23106 = vmatmul.mubr.f32.vlgmr.msra.gmra.mrb[16].mxu0 %v27788_v24 }
 0x267   :  { %25604 = vmatpush3.bf16.msra.mxu0 %v25588_v7  ;;  %23112 = vmatprep.mubr.msk.f32.mxu0 %vm27552_vm1, %v30863_v3  ;;  %v3797_v7 = vld [vmem:[%s30897_s29 + $0x18] sm:$0xff]  ;;  %s30900_s29 = sld [smem:[#allocation11_spill]] }
 0x268   :  { %25605 = vmatprep.subr.bf16.mxu0 %v27551_v0  ;;  %v3812_v11 = vand.u32 4294901760, %v3797_v7 }
 0x26e   :  { %23113 = vmatmul.mubr.f32.vlgmr.msra.gmra.mrb[16].mxu0 %v27788_v24 }
 0x26f   :  { %23153 = vmatprep.mubr.msk.f32.mxu0 %vm27552_vm1, %v30863_v3  ;;  %25607 = vmatpush3.bf16.msra.mxu0 %v27990_v5 }
 0x270   :  { %25608 = vmatprep.subr.bf16.mxu0 %v27551_v0 }
 0x300   :  { %v2042_v13 = vpop.f32.mrb[4].mxu0 }
 0x301   :  { %v23017_v14 = vpop.f32.mrb[5].mxu0 }
 0x302   :  { %v28001_v14 = vpack.c.bf16 %v3812_v11, %v3809_v10 }
 0x304   :  { %v2192_v15 = vpop.f32.mrb[6].mxu0  ;;  %25610 = vmatpush3.bf16.msra.mxu0 %v28001_v14 }
 0x305   :  { %v23027_v16 = vpop.f32.mrb[7].mxu0  ;;  %25611 = vmatprep.subr.bf16.mxu0 %v27551_v0 }
 0x308   :  { %v2118_v17 = vpop.f32.mrb[6].mxu1 }
 0x309   :  { %v2119_v18 = vadd.f32 %v2118_v17, %v2042_v13  ;;  %v2340_v19 = vpop.f32.mrb[8].mxu0  ;;  %v23022_v20 = vpop.f32.mrb[7].mxu1  ;;  %v3891_v13 = vand.u32 4294901760, %v3890_v9  ;;  %v3897_v17 = vsub.f32 %v3796_v6, %v3809_v10 }
 0x30a   :  { %v23037_v21 = vpop.f32.mrb[9].mxu0 }
 0x30b   :  { %v2193_v22 = vadd.f32 %v2192_v15, %v2119_v18  ;;  %v3885_v15 = vsub.f32 %v3883_v8, %v3884_v12  ;;  %v3892_v16 = vsub.f32 %v3890_v9, %v3891_v13  ;;  %v3904_v18 = vsub.f32 %v3797_v7, %v3812_v11 }
 0x30c   :  { %v2266_v23 = vpop.f32.mrb[8].mxu1  ;;  %v3898_v21 = vand.u32 4294901760, %v3897_v17 }
 0x30d   :  { %v2267_v25 = vadd.f32 %v2266_v23, %v2193_v22  ;;  %v2494_v26 = vpop.f32.mrb[10].mxu0  ;;  %v23032_v27 = vpop.f32.mrb[9].mxu1  ;;  %v3893_v20 = vand.u32 4294901760, %v3892_v16  ;;  %v3905_v22 = vand.u32 4294901760, %v3904_v18 }
 0x30e   :  { %v23047_v28 = vpop.f32.mrb[11].mxu0 }
 0x30f   :  { %v2341_v29 = vadd.f32 %v2340_v19, %v2267_v25  ;;  %v3886_v19 = vand.u32 4294901760, %v3885_v15  ;;  %v3899_v25 = vsub.f32 %v3897_v17, %v3898_v21 }
 0x310   :  { %v2412_v24 = vpop.f32.mrb[10].mxu1 }
 0x311   :  { %v2413_v30 = vadd.f32 %v2412_v24, %v2341_v29  ;;  %v2644_v31 = vpop.f32.mrb[12].mxu0  ;;  %v23042_v32 = vpop.f32.mrb[11].mxu1  ;;  %v25612_v23 = vpack.c.bf16 %v3893_v20, %v3886_v19  ;;  %v3900_v27 = vand.u32 4294901760, %v3899_v25  ;;  %v25618_v24 = vpack.c.bf16 %v3890_v9, %v3883_v8 }
 0x312   :  { %v23057_v33 = vpop.f32.mrb[13].mxu0  ;;  %v28010_v32 = vpack.c.bf16 %v3905_v22, %v3898_v21 }
 0x313   :  { %v2495_v34 = vadd.f32 %v2494_v26, %v2413_v30  ;;  %v3906_v26 = vsub.f32 %v3904_v18, %v3905_v22  ;;  %v25621_v30 = vpack.c.bf16 %v3904_v18, %v3897_v17 }
 0x314   :  { %v2570_v35 = vpop.f32.mrb[12].mxu1 }
 0x315   :  { %v2571_v36 = vadd.f32 %v2570_v35, %v2495_v34  ;;  %v2792_v37 = vpop.f32.mrb[14].mxu0  ;;  %v23052_v38 = vpop.f32.mrb[13].mxu1  ;;  %v3907_v28 = vand.u32 4294901760, %v3906_v26 }
 0x316   :  { %v23067_v39 = vpop.f32.mrb[15].mxu0 }
 0x317   :  { %v2645_v40 = vadd.f32 %v2644_v31, %v2571_v36  ;;  %v25615_v29 = vpack.c.bf16 %v3907_v28, %v3900_v27  ;;  %v28008_v31 = vpack.c.bf16 %v3891_v13, %v3884_v12 }
 0x318   :  { %v2718_v41 = vpop.f32.mrb[14].mxu1 }
 0x319   :  { %v2719_v42 = vadd.f32 %v2718_v41, %v2645_v40  ;;  %v23062_v43 = vpop.f32.mrb[15].mxu1 }
 0x31b   :  { %v2793_v44 = vadd.f32 %v2792_v37, %v2719_v42 }
 0x31c   :  { %v2864_v45 = vpop.f32.mrb[16].mxu1 }
 0x31d   :  { %v27959_v46 = vadd.f32 %v2864_v45, %v2793_v44  ;;  %v23072_v47 = vpop.f32.mrb[17].mxu1 }
 0x341   :  { %v3328_v54 = vpop.f32.mrb[16].mxu0 }
 0x342   :  { %v3336_v55 = vsel %vm1966_vm4, %v3328_v54, 0  ;;  %v23114_v56 = vpop.f32.mrb[17].mxu0 }
 0x343   :  { %v3339_v58 = vand.u32 4294901760, %v3336_v55 }
 0x345   :  { %v3416_v59 = vsub.f32 %v3336_v55, %v3339_v58  ;;  %23116 = vmatpush3.msra.mxu1 %v3339_v58 }
 0x346   :  { %23118 = vmatmul.mubr.f32.vlgmr.msra.gmra.mrb[18].mxu1 %v3408_v57  ;;  %23120 = vmatprep.subr.mxu1 %v30863_v3 }
 0x347   :  { %v3417_v60 = vand.u32 4294901760, %v3416_v59  ;;  %23122 = vmatprep.mubr.msk.f32.mxu1 %vm27552_vm1, %v30863_v3 }
 0x349   :  { %v3418_v61 = vsub.f32 %v3416_v59, %v3417_v60 }
 0x34b   :  { %v3419_v62 = vand.u32 4294901760, %v3418_v61 }
 0x34d   :  { %23121 = vmatpush3.msra.mxu1 %v3419_v62 }
 0x34e   :  { %23123 = vmatmul.mubr.f32.vlgmr.msra.gmra.mrb[20].mxu1 %v3404_v50  ;;  %23125 = vmatprep.subr.mxu1 %v30863_v3 }
 0x34f   :  { %23126 = vmatpush3.msra.mxu1 %v3416_v59  ;;  %23127 = vmatprep.mubr.msk.f32.mxu1 %vm27552_vm1, %v30863_v3 }
 0x350   :  { %23130 = vmatprep.subr.mxu1 %v30863_v3 }
 0x352   :  { %23128 = vmatmul.mubr.f32.vlgmr.msra.gmra.mrb[22].mxu1 %v3405_v51  ;;  %v21373_v51 = vld [vmem:[%s30898_s6] ss:$0 sm:$0xff] }
 0x353   :  { %23131 = vmatpush3.msra.mxu1 %v3339_v58  ;;  %23132 = vmatprep.mubr.msk.f32.mxu1 %vm27552_vm1, %v30863_v3 }
 0x354   :  { %23135 = vmatprep.subr.mxu1 %v30863_v3 }
 0x356   :  { %23133 = vmatmul.mubr.f32.vlgmr.msra.gmra.mrb[24].mxu1 %v3406_v52 }
 0x357   :  { %23136 = vmatpush3.msra.mxu1 %v3417_v60  ;;  %23137 = vmatprep.mubr.msk.f32.mxu1 %vm27552_vm1, %v30863_v3 }
 0x358   :  { %23140 = vmatprep.subr.mxu1 %v30863_v3 }
 0x35a   :  { %23138 = vmatmul.mubr.f32.vlgmr.msra.gmra.mrb[26].mxu1 %v3404_v50 }
 0x35b   :  { %23141 = vmatpush3.msra.mxu1 %v3339_v58  ;;  %23142 = vmatprep.mubr.msk.f32.mxu1 %vm27552_vm1, %v30863_v3 }
 0x35c   :  { %25641 = vmatprep.subr.bf16.mxu1 %v27551_v0 }
 0x35e   :  { %23143 = vmatmul.mubr.f32.vlgmr.msra.gmra.mrb[28].mxu1 %v3404_v50 }
 0x35f   :  { %23219 = vmatprep.mubr.msk.f32.mxu1 %vm27552_vm1, %v30863_v3  ;;  %25643 = vmatpush3.bf16.msra.mxu1 %v27990_v5 }
 0x360   :  { %25644 = vmatprep.subr.bf16.mxu1 %v27551_v0 }
 0x363   :  { %25646 = vmatpush3.bf16.msra.mxu1 %v28001_v14 }
 0x364   :  { %25647 = vmatprep.subr.bf16.mxu1 %v27551_v0 }
 0x419   :  { %v3410_v33 = vpop.f32.mrb[18].mxu1 }
 0x41a   :  { %v23119_v34 = vpop.f32.mrb[19].mxu1 }
 0x421   :  { %v3486_v35 = vpop.f32.mrb[20].mxu1 }
 0x422   :  { %v3487_v36 = vadd.f32 %v3486_v35, %v3410_v33  ;;  %v23124_v37 = vpop.f32.mrb[21].mxu1 }
 0x425   :  { %v3560_v38 = vpop.f32.mrb[22].mxu1 }
 0x426   :  { %v3561_v39 = vadd.f32 %v3560_v38, %v3487_v36  ;;  %v23129_v40 = vpop.f32.mrb[23].mxu1 }
 0x429   :  { %v3634_v41 = vpop.f32.mrb[24].mxu1 }
 0x42a   :  { %v3635_v42 = vadd.f32 %v3634_v41, %v3561_v39  ;;  %v23134_v43 = vpop.f32.mrb[25].mxu1 }
 0x42d   :  { %v3708_v44 = vpop.f32.mrb[26].mxu1 }
 0x42e   :  { %v3709_v45 = vadd.f32 %v3708_v44, %v3635_v42  ;;  %v23139_v47 = vpop.f32.mrb[27].mxu1 }
 0x431   :  { %v3780_v48 = vpop.f32.mrb[28].mxu1 }
 0x432   :  { %v3781_v49 = vadd.f32 %v3780_v48, %v3709_v45  ;;  %v23144_v50 = vpop.f32.mrb[29].mxu1 }
 0x433   :  { %v21379_v50 = vld [vmem:[%s30900_s29 + $0x28] sm:$0xff] }
 0x434   :  { %v3784_v52 = vadd.f32 %v3781_v49, %v27959_v46  ;;  %v21378_v49 = vld [vmem:[%s30900_s29 + $0x20] sm:$0xff] }
 0x436   :  { %v3792_v53 = vadd.f32 %v21373_v51, %v3784_v52  ;;  %v6227_v51 = vand.u32 4294901760, %v21378_v49  ;;  %v6230_v52 = vand.u32 4294901760, %v21379_v50 }
 0x438   :  { %v28016_v54 = vmax.f32 %v3792_v53, 0.0  ;;  %v5726_v53 = vld [vmem:[%s30900_s29] sm:$0xff] }
 0x43a   :  { %v3800_v55 = vsel %vm3798_vm5, %v28016_v54, 0  ;;  %v4295_v56 = vmul.f32 %v28016_v54, %v28016_v54 }
 0x43b   :  { %v28022_v57 = vand.u32 4294901760, %v3800_v55 }
 0x43c   :  { %v4297_v58 = vsel %vm3798_vm5, %v4295_v56, 0  ;;  %v5734_v56 = vand.u32 4294901760, %v5726_v53 }
 0x43d   :  { %v3872_v59 = vsub.f32 %v3800_v55, %v28022_v57  ;;  %v28026_v60 = vand.u32 4294901760, %v4297_v58  ;;  %v5727_v55 = vld [vmem:[%s30900_s29 + $0x8] sm:$0xff] }
 0x43f   :  { %v3873_v61 = vand.u32 4294901760, %v3872_v59  ;;  %v4369_v46 = vsub.f32 %v4297_v58, %v28026_v60  ;;  %v28155_v58 = vpack.c.bf16 %v6230_v52, %v6227_v51 }
 0x441   :  { %v3874_v62 = vsub.f32 %v3872_v59, %v3873_v61  ;;  %v4370_v63 = vand.u32 4294901760, %v4369_v46 }
 0x443   :  { %v3875_v1 = vand.u32 4294901760, %v3874_v62  ;;  %v4371_v2 = vsub.f32 %v4369_v46, %v4370_v63 }
 0x445   :  { %23154 = vmatmul.mubr.f32.vlgmr.msra.gmra.mrb[18].mxu0 %v3875_v1  ;;  %v4372_v4 = vand.u32 4294901760, %v4371_v2  ;;  %v21381_v1 = vld [vmem:[%s30900_s29 + $0x38] sm:$0xff]  ;;  %v5728_v2 = vld [vmem:[%s30900_s29 + $0x10] sm:$0xff] }
 0x446   :  { %25613 = vmatpush3.bf16.msra.mxu0 %v25612_v23  ;;  %23164 = vmatprep.mubr.msk.f32.mxu0 %vm27552_vm1, %v30863_v3 }
 0x447   :  { %23220 = vmatmul.mubr.f32.vlgmr.msra.gmra.mrb[30].mxu1 %v4372_v4  ;;  %25614 = vmatprep.subr.bf16.mxu0 %v27551_v0 }
 0x448   :  { %25649 = vmatpush3.bf16.msra.mxu1 %v25612_v23  ;;  %23230 = vmatprep.mubr.msk.f32.mxu1 %vm27552_vm1, %v30863_v3 }
 0x449   :  { %25650 = vmatprep.subr.bf16.mxu1 %v27551_v0 }
 0x44a   :  { %25616 = vmatpush3.bf16.msra.mxu0 %v25615_v29 }
 0x44b   :  { %25617 = vmatprep.subr.bf16.mxu0 %v27551_v0 }
 0x44c   :  { %25652 = vmatpush3.bf16.msra.mxu1 %v25615_v29 }
 0x44d   :  { %23165 = vmatmul.mubr.f32.vlgmr.msra.gmra.mrb[18].mxu0 %v28022_v57  ;;  %25653 = vmatprep.subr.bf16.mxu1 %v27551_v0 }
 0x44e   :  { %25619 = vmatpush3.bf16.msra.mxu0 %v25618_v24  ;;  %23175 = vmatprep.mubr.msk.f32.mxu0 %vm27552_vm1, %v30863_v3 }
 0x44f   :  { %23231 = vmatmul.mubr.f32.vlgmr.msra.gmra.mrb[30].mxu1 %v28026_v60  ;;  %25620 = vmatprep.subr.bf16.mxu0 %v27551_v0 }
 0x450   :  { %25655 = vmatpush3.bf16.msra.mxu1 %v25618_v24  ;;  %23241 = vmatprep.mubr.msk.f32.mxu1 %vm27552_vm1, %v30863_v3 }
 0x451   :  { %25656 = vmatprep.subr.bf16.mxu1 %v27551_v0 }
 0x452   :  { %25622 = vmatpush3.bf16.msra.mxu0 %v25621_v30 }
 0x453   :  { %25623 = vmatprep.subr.bf16.mxu0 %v27551_v0 }
 0x454   :  { %25658 = vmatpush3.bf16.msra.mxu1 %v25621_v30 }
 0x455   :  { %23176 = vmatmul.mubr.f32.vlgmr.msra.gmra.mrb[18].mxu0 %v3872_v59  ;;  %25659 = vmatprep.subr.bf16.mxu1 %v27551_v0  ;;  %v28157_v59 = vsub.f32 %v21378_v49, %v6227_v51 }
 0x456   :  { %25625 = vmatpush3.bf16.msra.mxu0 %v27990_v5  ;;  %23186 = vmatprep.mubr.msk.f32.mxu0 %vm27552_vm1, %v30863_v3 }
 0x457   :  { %23242 = vmatmul.mubr.f32.vlgmr.msra.gmra.mrb[30].mxu1 %v4369_v46  ;;  %25626 = vmatprep.subr.bf16.mxu0 %v27551_v0  ;;  %v28163_v46 = vsub.f32 %v5726_v53, %v5734_v56  ;;  %v5250_v53 = vlaneseq }
 0x458   :  { %25661 = vmatpush3.bf16.msra.mxu1 %v27990_v5  ;;  %23252 = vmatprep.mubr.msk.f32.mxu1 %vm27552_vm1, %v30863_v3 }
 0x459   :  { %25662 = vmatprep.subr.bf16.mxu1 %v27551_v0 }
 0x45a   :  { %25628 = vmatpush3.bf16.msra.mxu0 %v28001_v14 }
 0x45b   :  { %25629 = vmatprep.subr.bf16.mxu0 %v27551_v0 }
 0x45c   :  { %25664 = vmatpush3.bf16.msra.mxu1 %v28001_v14 }
 0x45d   :  { %23187 = vmatmul.mubr.f32.vlgmr.msra.gmra.mrb[18].mxu0 %v3873_v61  ;;  %25665 = vmatprep.subr.bf16.mxu1 %v27551_v0 }
 0x45e   :  { %25631 = vmatpush3.bf16.msra.mxu0 %v28008_v31  ;;  %23197 = vmatprep.mubr.msk.f32.mxu0 %vm27552_vm1, %v30863_v3 }
 0x45f   :  { %23253 = vmatmul.mubr.f32.vlgmr.msra.gmra.mrb[30].mxu1 %v4370_v63  ;;  %25632 = vmatprep.subr.bf16.mxu0 %v27551_v0  ;;  %v21380_v63 = vld [vmem:[%s30900_s29 + $0x30] sm:$0xff] }
 0x460   :  { %25667 = vmatpush3.bf16.msra.mxu1 %v28008_v31  ;;  %23263 = vmatprep.mubr.msk.f32.mxu1 %vm27552_vm1, %v30863_v3  ;;  %v6233_v4 = vand.u32 4294901760, %v21380_v63 }
 0x461   :  { %25668 = vmatprep.subr.bf16.mxu1 %v27551_v0 }
 0x462   :  { %25634 = vmatpush3.bf16.msra.mxu0 %v28010_v32 }
 0x463   :  { %25635 = vmatprep.subr.bf16.mxu0 %v27551_v0 }
 0x464   :  { %25670 = vmatpush3.bf16.msra.mxu1 %v28010_v32 }
 0x465   :  { %23198 = vmatmul.mubr.f32.vlgmr.msra.gmra.mrb[18].mxu0 %v28022_v57  ;;  %25671 = vmatprep.subr.bf16.mxu1 %v27551_v0 }
 0x466   :  { %25637 = vmatpush3.bf16.msra.mxu0 %v27990_v5  ;;  %23208 = vmatprep.mubr.msk.f32.mxu0 %vm27552_vm1, %v30863_v3 }
 0x467   :  { %23264 = vmatmul.mubr.f32.vlgmr.msra.gmra.mrb[30].mxu1 %v28026_v60  ;;  %25638 = vmatprep.subr.bf16.mxu0 %v27551_v0 }
 0x468   :  { %25673 = vmatpush3.bf16.msra.mxu1 %v27990_v5  ;;  %23274 = vmatprep.mubr.msk.f32.mxu1 %vm27552_vm1, %v30863_v3  ;;  %v4799_v5 = vld [vmem:[%s30899_s28] sm:$0xff] }
 0x469   :  { %25674 = vmatprep.subr.bf16.mxu1 %v27551_v0  ;;  %v28094_v6 = vand.u32 4294901760, %v4799_v5 }
 0x46a   :  { %25640 = vmatpush3.bf16.msra.mxu0 %v28001_v14 }
 0x46b   :  { %23277 = vmatprep.subr.mxu0 %v30863_v3  ;;  %v4882_v25 = vsub.f32 %v4799_v5, %v28094_v6  ;;  %v6236_v5 = vand.u32 4294901760, %v21381_v1 }
 0x46c   :  { %25676 = vmatpush3.bf16.msra.mxu1 %v28001_v14 }
 0x46d   :  { %23209 = vmatmul.mubr.f32.vlgmr.msra.gmra.mrb[18].mxu0 %v28022_v57  ;;  %23307 = vmatprep.subr.mxu1 %v30863_v3  ;;  %v4883_v30 = vand.u32 4294901760, %v4882_v25  ;;  %v5737_v57 = vand.u32 4294901760, %v5727_v55 }
 0x46e   :  { %23279 = vmatprep.mubr.msk.f32.mxu0 %vm27552_vm1, %v30863_v3  ;;  %23278 = vmatpush3.msra.mxu0 %v28094_v6 }
 0x46f   :  { %23275 = vmatmul.mubr.f32.vlgmr.msra.gmra.mrb[30].mxu1 %v28026_v60  ;;  %23282 = vmatprep.subr.mxu0 %v30863_v3  ;;  %v4884_v35 = vsub.f32 %v4882_v25, %v4883_v30  ;;  %v28159_v60 = vsub.f32 %v21379_v50, %v6230_v52  ;;  %v28161_v61 = vpack.c.bf16 %v5737_v57, %v5734_v56  ;;  %v5251_v56 = vshrl.u32 %v5250_v53, 7 }
 0x470   :  { %23309 = vmatprep.mubr.msk.f32.mxu1 %vm27552_vm1, %v30863_v3  ;;  %23308 = vmatpush3.msra.mxu1 %v28094_v6  ;;  %v28165_v62 = vsub.f32 %v5727_v55, %v5737_v57 }
 0x471   :  { %23312 = vmatprep.subr.mxu1 %v30863_v3  ;;  %v4885_v39 = vand.u32 4294901760, %v4884_v35  ;;  %v28231_v57 = vsub.s32 0, %v5251_v56 }
 0x540   :  { %v4283_v7 = vpop.f32.mrb[18].mxu0 }
 0x541   :  { %v4288_v8 = vsel %vm4287_vm6, %v4283_v7, 0.0  ;;  %v23210_v9 = vpop.f32.mrb[19].mxu0  ;;  %v5740_v7 = vand.u32 4294901760, %v5728_v2 }
 0x542   :  { %v4289_v10 = vrot.slane %v4288_v8, 4  ;;  %v4780_v11 = vpop.f32.mrb[30].mxu1 }
 0x543   :  { %v4784_v12 = vsel %vm4287_vm6, %v4780_v11, 0.0  ;;  %v23276_v13 = vpop.f32.mrb[31].mxu1  ;;  %v5815_v11 = vand.u32 4294901760, %v28163_v46 }
 0x544   :  { %v4290_v14 = vadd.f32 %v4289_v10, %v4288_v8  ;;  %v4785_v15 = vrot.slane %v4784_v12, 4  ;;  %v6308_v8 = vand.u32 4294901760, %v28157_v59  ;;  %v6315_v10 = vand.u32 4294901760, %v28159_v60 }
 0x545   :  { %v28187_v13 = vpack.c.bf16 %v6236_v5, %v6233_v4 }
 0x546   :  { %v4291_v16 = vrot.slane %v4290_v14, 2  ;;  %v4786_v17 = vadd.f32 %v4785_v15, %v4784_v12  ;;  %v5822_v12 = vand.u32 4294901760, %v28165_v62  ;;  %v28191_v15 = vsub.f32 %v21381_v1, %v6236_v5 }
 0x548   :  { %v4292_v18 = vadd.f32 %v4291_v16, %v4290_v14  ;;  %v4787_v19 = vrot.slane %v4786_v17, 2  ;;  %v28189_v14 = vsub.f32 %v21380_v63, %v6233_v4  ;;  %v28193_v16 = vsub.f32 %v5728_v2, %v5740_v7  ;;  %v21375_v4 = vld [vmem:[%s30902_s4] ss:$0 sm:$0xff] }
 0x549   :  { %v28225_v49 = vpack.c.bf16 %v5822_v12, %v5815_v11 }
 0x54a   :  { %v4293_v20 = vrot.slane %v4292_v18, 1  ;;  %v4788_v21 = vadd.f32 %v4787_v19, %v4786_v17  ;;  %v6309_v19 = vsub.f32 %v28157_v59, %v6308_v8 }
 0x54c   :  { %v4294_v22 = vadd.f32 %v4293_v20, %v4292_v18  ;;  %v4789_v23 = vrot.slane %v4788_v21, 1  ;;  %v6316_v20 = vsub.f32 %v28159_v60, %v6315_v10 }
 0x54e   :  { %v4792_v26 = vmul.f32 0.03125, %v4294_v22  ;;  %v4790_v27 = vadd.f32 %v4789_v23, %v4788_v21  ;;  %v5816_v21 = vsub.f32 %v28163_v46, %v5815_v11  ;;  %v5823_v22 = vsub.f32 %v28165_v62, %v5822_v12  ;;  %v21384_v12 = vld [vmem:[%s30900_s29 + $0x40] sm:$0xff] }
 0x54f   :  { %v6322_v23 = vand.u32 4294901760, %v28189_v14 }
 0x550   :  { %v4794_v28 = vmul.f32 %v4792_v26, %v4792_v26  ;;  %v4802_v29 = vsel %vm4287_vm6, %v4792_v26, 0  ;;  %v4793_v24 = vmul.f32 0.03125, %v4790_v27  ;;  %v6310_v26 = vand.u32 4294901760, %v6309_v19  ;;  %v21387_v19 = vld [vmem:[%s30900_s29 + $0x58] sm:$0xff] }
 0x551   :  { %v4870_v31 = vand.u32 4294901760, %v4802_v29  ;;  %v6317_v27 = vand.u32 4294901760, %v6316_v20 }
 0x552   :  { %v4795_v32 = vsub.f32 %v4793_v24, %v4794_v28  ;;  %v5829_v28 = vand.u32 4294901760, %v28193_v16  ;;  %v5817_v24 = vand.u32 4294901760, %v5816_v21 }
 0x553   :  { %v4871_v33 = vsub.f32 %v4802_v29, %v4870_v31 }
 0x554   :  { %v4796_v34 = vmax.f32 %v4795_v32, 0.0 }
 0x555   :  { %v4872_v36 = vand.u32 4294901760, %v4871_v33 }
 0x556   :  { %v4797_v37 = vadd.f32 1e-05, %v4796_v34  ;;  %v5830_v34 = vsub.f32 %v28193_v16, %v5829_v28 }
 0x557   :  { %v4873_v38 = vsub.f32 %v4871_v33, %v4872_v36 }
 0x558   :  { %27513 = vrsqrt.f32 %v4797_v37 }
 0x559   :  { %v4874_v40 = vand.u32 4294901760, %v4873_v38 }
 0x55b   :  { %23280 = vmatmul.mubr.f32.vlgmr.msra.gmra.mrb[20].mxu0 %v4874_v40 }
 0x55c   :  { %23283 = vmatpush3.msra.mxu0 %v4885_v39  ;;  %23284 = vmatprep.mubr.msk.f32.mxu0 %vm27552_vm1, %v30863_v3 }
 0x55d   :  { %23287 = vmatprep.subr.mxu0 %v30863_v3 }
 0x562   :  { %v27514_v41 = vpop.eup %27513 }
 0x563   :  { %23285 = vmatmul.mubr.f32.vlgmr.msra.gmra.mrb[20].mxu0 %v4870_v31  ;;  %v5263_v42 = vsel %vm4287_vm6, %v27514_v41, 0 }
 0x564   :  { %23288 = vmatpush3.msra.mxu0 %v4882_v25  ;;  %23289 = vmatprep.mubr.msk.f32.mxu0 %vm27552_vm1, %v30863_v3  ;;  %v5331_v43 = vand.u32 4294901760, %v5263_v42 }
 0x565   :  { %23292 = vmatprep.subr.mxu0 %v30863_v3 }
 0x566   :  { %v5332_v44 = vsub.f32 %v5263_v42, %v5331_v43 }
 0x568   :  { %v5333_v45 = vand.u32 4294901760, %v5332_v44 }
 0x56a   :  { %v5334_v47 = vsub.f32 %v5332_v44, %v5333_v45 }
 0x56b   :  { %23290 = vmatmul.mubr.f32.vlgmr.msra.gmra.mrb[20].mxu0 %v4871_v33  ;;  %v25720_v33 = vpack.c.bf16 %v6317_v27, %v6310_v26 }
 0x56c   :  { %v5335_v48 = vand.u32 4294901760, %v5334_v47  ;;  %23293 = vmatpush3.msra.mxu0 %v28094_v6  ;;  %23294 = vmatprep.mubr.msk.f32.mxu0 %vm27552_vm1, %v30863_v3 }
 0x56d   :  { %23297 = vmatprep.subr.mxu0 %v30863_v3 }
 0x56e   :  { %23310 = vmatmul.mubr.f32.vlgmr.msra.gmra.mrb[32].mxu1 %v5335_v48  ;;  %v28223_v48 = vpack.c.bf16 %v6315_v10, %v6308_v8 }
 0x56f   :  { %23313 = vmatpush3.msra.mxu1 %v4885_v39  ;;  %23314 = vmatprep.mubr.msk.f32.mxu1 %vm27552_vm1, %v30863_v3  ;;  %v5831_v39 = vand.u32 4294901760, %v5830_v34 }
 0x570   :  { %23317 = vmatprep.subr.mxu1 %v30863_v3 }
 0x573   :  { %23295 = vmatmul.mubr.f32.vlgmr.msra.gmra.mrb[20].mxu0 %v4872_v36 }
 0x574   :  { %23298 = vmatpush3.msra.mxu0 %v4883_v30  ;;  %23299 = vmatprep.mubr.msk.f32.mxu0 %vm27552_vm1, %v30863_v3 }
 0x575   :  { %23302 = vmatprep.subr.mxu0 %v30863_v3 }
 0x576   :  { %23315 = vmatmul.mubr.f32.vlgmr.msra.gmra.mrb[32].mxu1 %v5331_v43 }
 0x577   :  { %23318 = vmatpush3.msra.mxu1 %v4882_v25  ;;  %23319 = vmatprep.mubr.msk.f32.mxu1 %vm27552_vm1, %v30863_v3  ;;  %v6329_v25 = vand.u32 4294901760, %v28191_v15 }
 0x578   :  { %23322 = vmatprep.subr.mxu1 %v30863_v3 }
 0x579   :  { %v6330_v32 = vsub.f32 %v28191_v15, %v6329_v25  ;;  %v28227_v50 = vpack.c.bf16 %v6329_v25, %v6322_v23 }
 0x57b   :  { %23300 = vmatmul.mubr.f32.vlgmr.msra.gmra.mrb[20].mxu0 %v4870_v31  ;;  %v6331_v38 = vand.u32 4294901760, %v6330_v32 }
 0x57c   :  { %23303 = vmatpush3.msra.mxu0 %v28094_v6  ;;  %23304 = vmatprep.mubr.msk.f32.mxu0 %vm27552_vm1, %v30863_v3 }
 0x57d   :  { %25677 = vmatprep.subr.bf16.mxu0 %v27551_v0 }
 0x57e   :  { %23320 = vmatmul.mubr.f32.vlgmr.msra.gmra.mrb[32].mxu1 %v5332_v44  ;;  %v25690_v44 = vpack.c.bf16 %v28165_v62, %v28163_v46  ;;  %v21374_v46 = vld [vmem:[%s30901_s11] ss:$0 sm:$0xff] }
 0x57f   :  { %23323 = vmatpush3.msra.mxu1 %v28094_v6  ;;  %23324 = vmatprep.mubr.msk.f32.mxu1 %vm27552_vm1, %v30863_v3 }
 0x580   :  { %23327 = vmatprep.subr.mxu1 %v30863_v3 }
 0x583   :  { %23305 = vmatmul.mubr.f32.vlgmr.msra.gmra.mrb[20].mxu0 %v4870_v31  ;;  %v6323_v31 = vsub.f32 %v28189_v14, %v6322_v23  ;;  %v7719_v23 = vand.u32 4294901760, %v21387_v19 }
 0x584   :  { %23345 = vmatprep.mubr.msk.f32.mxu0 %vm27552_vm1, %v30863_v3  ;;  %25679 = vmatpush3.bf16.msra.mxu0 %v28161_v61 }
 0x585   :  { %25680 = vmatprep.subr.bf16.mxu0 %v27551_v0  ;;  %v6324_v37 = vand.u32 4294901760, %v6323_v31  ;;  %v7811_v26 = vsub.f32 %v21387_v19, %v7719_v23 }
 0x586   :  { %23325 = vmatmul.mubr.f32.vlgmr.msra.gmra.mrb[32].mxu1 %v5333_v45  ;;  %v25729_v45 = vpack.c.bf16 %v28191_v15, %v28189_v14  ;;  %v21385_v14 = vld [vmem:[%s30900_s29 + $0x48] sm:$0xff]  ;;  %v7710_v15 = vand.u32 4294901760, %v21384_v12 }
 0x587   :  { %23328 = vmatpush3.msra.mxu1 %v4883_v30  ;;  %23329 = vmatprep.mubr.msk.f32.mxu1 %vm27552_vm1, %v30863_v3  ;;  %v5824_v30 = vand.u32 4294901760, %v5823_v22  ;;  %v25723_v41 = vpack.c.bf16 %v6331_v38, %v6324_v37 }
 0x588   :  { %23332 = vmatprep.subr.mxu1 %v30863_v3  ;;  %v7790_v20 = vsub.f32 %v21384_v12, %v7710_v15 }
 0x589   :  { %v25684_v36 = vpack.c.bf16 %v5824_v30, %v5817_v24  ;;  %v7812_v30 = vand.u32 4294901760, %v7811_v26 }
 0x58a   :  { %v7791_v27 = vand.u32 4294901760, %v7790_v20 }
 0x58b   :  { %v7813_v34 = vsub.f32 %v7811_v26, %v7812_v30 }
 0x58e   :  { %23330 = vmatmul.mubr.f32.vlgmr.msra.gmra.mrb[32].mxu1 %v5331_v43 }
 0x58f   :  { %23333 = vmatpush3.msra.mxu1 %v28094_v6  ;;  %23334 = vmatprep.mubr.msk.f32.mxu1 %vm27552_vm1, %v30863_v3  ;;  %v5729_v6 = vld [vmem:[%s30900_s29 + $0x18] sm:$0xff] }
 0x590   :  { %25713 = vmatprep.subr.bf16.mxu1 %v27551_v0  ;;  %v5743_v9 = vand.u32 4294901760, %v5729_v6 }
 0x592   :  { %v28195_v17 = vpack.c.bf16 %v5743_v9, %v5740_v7  ;;  %v28197_v18 = vsub.f32 %v5729_v6, %v5743_v9 }
 0x594   :  { %25682 = vmatpush3.bf16.msra.mxu0 %v28195_v17  ;;  %v5836_v29 = vand.u32 4294901760, %v28197_v18  ;;  %v25693_v47 = vpack.c.bf16 %v28197_v18, %v28193_v16  ;;  %v7713_v16 = vand.u32 4294901760, %v21385_v14 }
 0x595   :  { %25683 = vmatprep.subr.bf16.mxu0 %v27551_v0 }
 0x596   :  { %23335 = vmatmul.mubr.f32.vlgmr.msra.gmra.mrb[32].mxu1 %v5331_v43  ;;  %v5837_v35 = vsub.f32 %v28197_v18, %v5836_v29  ;;  %v25726_v43 = vpack.c.bf16 %v28159_v60, %v28157_v59  ;;  %v28229_v51 = vpack.c.bf16 %v5836_v29, %v5829_v28  ;;  %v21386_v18 = vld [vmem:[%s30900_s29 + $0x50] sm:$0xff]  ;;  %v7797_v21 = vsub.f32 %v21385_v14, %v7713_v16  ;;  %v5725_v14 = vld [vmem:[%s30903_s5 + $0x8] sm:$0xff] }
 0x597   :  { %23411 = vmatprep.mubr.msk.f32.mxu1 %vm27552_vm1, %v30863_v3  ;;  %25715 = vmatpush3.bf16.msra.mxu1 %v28155_v58  ;;  %v7716_v22 = vand.u32 4294901760, %v21386_v18  ;;  %v25750_v29 = vpack.c.bf16 %v7713_v16, %v7710_v15 }
 0x598   :  { %25716 = vmatprep.subr.bf16.mxu1 %v27551_v0  ;;  %v5838_v40 = vand.u32 4294901760, %v5837_v35  ;;  %v7798_v28 = vand.u32 4294901760, %v7797_v21  ;;  %v25762_v38 = vpack.c.bf16 %v7797_v21, %v7790_v20 }
 0x599   :  { %v7804_v25 = vsub.f32 %v21386_v18, %v7716_v22  ;;  %v25753_v31 = vpack.c.bf16 %v7719_v23, %v7716_v22  ;;  %v7210_v18 = vsel %vm4287_vm6, %v5725_v14, 0 }
 0x59a   :  { %v25687_v42 = vpack.c.bf16 %v5838_v40, %v5831_v39  ;;  %v25774_v40 = vpack.c.bf16 %v7798_v28, %v7791_v27 }
 0x59b   :  { %25718 = vmatpush3.bf16.msra.mxu1 %v28187_v13  ;;  %v7805_v24 = vand.u32 4294901760, %v7804_v25  ;;  %v25765_v39 = vpack.c.bf16 %v7811_v26, %v7804_v25 }
 0x59c   :  { %25719 = vmatprep.subr.bf16.mxu1 %v27551_v0 }
 0x656   :  { %v5246_v52 = vpop.f32.mrb[20].mxu0 }
 0x657   :  { %v23306_v55 = vpop.f32.mrb[21].mxu0  ;;  %v5253_v59 = vrot.slane %v5246_v52, %v28231_v57 }
 0x659   :  { %v5254_v60 = vsub.f32 %v28016_v54, %v5253_v59 }
 0x65b   :  { %v5261_v63 = vmul.f32 %v21374_v46, %v5254_v60 }
 0x669   :  { %v5707_v62 = vpop.f32.mrb[32].mxu1 }
 0x66a   :  { %v5714_v1 = vrot.slane %v5707_v62, %v28231_v57  ;;  %v23336_v2 = vpop.f32.mrb[33].mxu1 }
 0x66c   :  { %v5715_v5 = vmul.f32 %v5714_v1, %v5261_v63 }
 0x66e   :  { %v5723_v6 = vadd.f32 %v21375_v4, %v5715_v5 }
 0x670   :  { %v5731_v7 = vsel %vm3798_vm5, %v5723_v6, 0  ;;  %v28370_v6 = vld [vmem:[%s30840_s15] sm:$0xff] }
 0x671   :  { %v28243_v8 = vand.u32 4294901760, %v5731_v7 }
 0x673   :  { %v28246_v54 = vsub.f32 %v5731_v7, %v28243_v8  ;;  %v28375_v7 = vld [vmem:[%s30840_s15 + $0x8] sm:$0xff] }
 0x675   :  { %v28249_v9 = vand.u32 4294901760, %v28246_v54 }
 0x677   :  { %v5805_v10 = vsub.f32 %v28246_v54, %v28249_v9 }
 0x679   :  { %v28253_v11 = vand.u32 4294901760, %v5805_v10  ;;  %v5724_v10 = vld [vmem:[%s30903_s5] sm:$0xff] }
 0x67b   :  { %23346 = vmatmul.mubr.f32.vlgmr.msra.gmra.mrb[22].mxu0 %v28253_v11  ;;  %23412 = vmatmul.mubr.f32.vlgmr.msra.gmra.mrb[34].mxu1 %v28253_v11 }
 0x67c   :  { %25721 = vmatpush3.bf16.msra.mxu1 %v25720_v33  ;;  %25685 = vmatpush3.bf16.msra.mxu0 %v25684_v36  ;;  %v7814_v36 = vand.u32 4294901760, %v7813_v34 }
 0x67d   :  { %25722 = vmatprep.subr.bf16.mxu1 %v27551_v0  ;;  %25686 = vmatprep.subr.bf16.mxu0 %v27551_v0 }
 0x67e   :  { %23356 = vmatprep.mubr.msk.f32.mxu0 %vm27552_vm1, %v30863_v3  ;;  %23422 = vmatprep.mubr.msk.f32.mxu1 %vm27552_vm1, %v30863_v3 }
 0x680   :  { %25724 = vmatpush3.bf16.msra.mxu1 %v25723_v41  ;;  %25688 = vmatpush3.bf16.msra.mxu0 %v25687_v42  ;;  %v25777_v41 = vpack.c.bf16 %v7812_v30, %v7805_v24  ;;  %v21376_v42 = vld [vmem:[%s30903_s5 + $0x10] sm:$0xff] }
 0x681   :  { %25725 = vmatprep.subr.bf16.mxu1 %v27551_v0  ;;  %25689 = vmatprep.subr.bf16.mxu0 %v27551_v0 }
 0x683   :  { %23357 = vmatmul.mubr.f32.vlgmr.msra.gmra.mrb[22].mxu0 %v28243_v8  ;;  %23423 = vmatmul.mubr.f32.vlgmr.msra.gmra.mrb[34].mxu1 %v28243_v8 }
 0x684   :  { %25727 = vmatpush3.bf16.msra.mxu1 %v25726_v43  ;;  %25691 = vmatpush3.bf16.msra.mxu0 %v25690_v44  ;;  %v6712_v43 = vsel %vm4287_vm6, %v21376_v42, 0 }
 0x685   :  { %25728 = vmatprep.subr.bf16.mxu1 %v27551_v0  ;;  %25692 = vmatprep.subr.bf16.mxu0 %v27551_v0  ;;  %v6783_v44 = vand.u32 4294901760, %v6712_v43 }
 0x686   :  { %23367 = vmatprep.mubr.msk.f32.mxu0 %vm27552_vm1, %v30863_v3  ;;  %23433 = vmatprep.mubr.msk.f32.mxu1 %vm27552_vm1, %v30863_v3 }
 0x688   :  { %25730 = vmatpush3.bf16.msra.mxu1 %v25729_v45  ;;  %25694 = vmatpush3.bf16.msra.mxu0 %v25693_v47  ;;  %v6784_v45 = vsub.f32 %v6712_v43, %v6783_v44 }
 0x689   :  { %25731 = vmatprep.subr.bf16.mxu1 %v27551_v0  ;;  %25695 = vmatprep.subr.bf16.mxu0 %v27551_v0 }
 0x68a   :  { %v6785_v47 = vand.u32 4294901760, %v6784_v45 }
 0x68b   :  { %23368 = vmatmul.mubr.f32.vlgmr.msra.gmra.mrb[22].mxu0 %v28246_v54  ;;  %23434 = vmatmul.mubr.f32.vlgmr.msra.gmra.mrb[34].mxu1 %v28246_v54 }
 0x68c   :  { %25733 = vmatpush3.bf16.msra.mxu1 %v28155_v58  ;;  %25697 = vmatpush3.bf16.msra.mxu0 %v28161_v61 }
 0x68d   :  { %25734 = vmatprep.subr.bf16.mxu1 %v27551_v0  ;;  %25698 = vmatprep.subr.bf16.mxu0 %v27551_v0 }
 0x68e   :  { %23378 = vmatprep.mubr.msk.f32.mxu0 %vm27552_vm1, %v30863_v3  ;;  %23444 = vmatprep.mubr.msk.f32.mxu1 %vm27552_vm1, %v30863_v3 }
 0x690   :  { %25736 = vmatpush3.bf16.msra.mxu1 %v28187_v13  ;;  %25700 = vmatpush3.bf16.msra.mxu0 %v28195_v17 }
 0x691   :  { %25737 = vmatprep.subr.bf16.mxu1 %v27551_v0  ;;  %25701 = vmatprep.subr.bf16.mxu0 %v27551_v0 }
 0x693   :  { %23379 = vmatmul.mubr.f32.vlgmr.msra.gmra.mrb[22].mxu0 %v28249_v9  ;;  %23445 = vmatmul.mubr.f32.vlgmr.msra.gmra.mrb[34].mxu1 %v28249_v9 }
 0x694   :  { %25739 = vmatpush3.bf16.msra.mxu1 %v28223_v48  ;;  %25703 = vmatpush3.bf16.msra.mxu0 %v28225_v49  ;;  %v6786_v48 = vsub.f32 %v6784_v45, %v6785_v47 }
 0x695   :  { %25740 = vmatprep.subr.bf16.mxu1 %v27551_v0  ;;  %25704 = vmatprep.subr.bf16.mxu0 %v27551_v0 }
 0x696   :  { %23389 = vmatprep.mubr.msk.f32.mxu0 %vm27552_vm1, %v30863_v3  ;;  %23455 = vmatprep.mubr.msk.f32.mxu1 %vm27552_vm1, %v30863_v3  ;;  %v6787_v49 = vand.u32 4294901760, %v6786_v48 }
 0x698   :  { %25742 = vmatpush3.bf16.msra.mxu1 %v28227_v50  ;;  %25706 = vmatpush3.bf16.msra.mxu0 %v28229_v51  ;;  %v21377_v50 = vld [vmem:[%s30903_s5 + $0x18] sm:$0xff] }
 0x699   :  { %25743 = vmatprep.subr.bf16.mxu1 %v27551_v0  ;;  %25707 = vmatprep.subr.bf16.mxu0 %v27551_v0 }
 0x69b   :  { %23390 = vmatmul.mubr.f32.vlgmr.msra.gmra.mrb[22].mxu0 %v28243_v8  ;;  %23456 = vmatmul.mubr.f32.vlgmr.msra.gmra.mrb[34].mxu1 %v28243_v8 }
 0x69c   :  { %25745 = vmatpush3.bf16.msra.mxu1 %v28155_v58  ;;  %25709 = vmatpush3.bf16.msra.mxu0 %v28161_v61  ;;  %v7792_v58 = vsub.f32 %v7790_v20, %v7791_v27  ;;  %v7799_v61 = vsub.f32 %v7797_v21, %v7798_v28  ;;  %v7288_v20 = vand.u32 4294901760, %v7210_v18 }
 0x69d   :  { %25746 = vmatprep.subr.bf16.mxu1 %v27551_v0  ;;  %25710 = vmatprep.subr.bf16.mxu0 %v27551_v0 }
 0x69e   :  { %23400 = vmatprep.mubr.msk.f32.mxu0 %vm27552_vm1, %v30863_v3  ;;  %23466 = vmatprep.mubr.msk.f32.mxu1 %vm27552_vm1, %v30863_v3  ;;  %v7793_v32 = vand.u32 4294901760, %v7792_v58  ;;  %v7800_v33 = vand.u32 4294901760, %v7799_v61  ;;  %v7289_v23 = vsub.f32 %v7210_v18, %v7288_v20 }
 0x6a0   :  { %25748 = vmatpush3.bf16.msra.mxu1 %v28187_v13  ;;  %25712 = vmatpush3.bf16.msra.mxu0 %v28195_v17  ;;  %v7806_v13 = vsub.f32 %v7804_v25, %v7805_v24  ;;  %v25756_v17 = vpack.c.bf16 %v7800_v33, %v7793_v32  ;;  %v7290_v27 = vand.u32 4294901760, %v7289_v23 }
 0x6a1   :  { %25749 = vmatprep.subr.bf16.mxu1 %v27551_v0 }
 0x6a2   :  { %v7807_v35 = vand.u32 4294901760, %v7806_v13  ;;  %v7291_v58 = vsub.f32 %v7289_v23, %v7290_v27  ;;  %v21383_v13 = vld [vmem:[%s30903_s5 + $0x28] sm:$0xff] }
 0x6a3   :  { %23401 = vmatmul.mubr.f32.vlgmr.msra.gmra.mrb[22].mxu0 %v28243_v8  ;;  %23467 = vmatmul.mubr.f32.vlgmr.msra.gmra.mrb[34].mxu1 %v28243_v8 }
 0x6a4   :  { %25751 = vmatpush3.bf16.msra.mxu1 %v25750_v29  ;;  %23537 = vmatprep.mubr.msk.f32.mxu1 %vm27552_vm1, %v30863_v3  ;;  %v25759_v37 = vpack.c.bf16 %v7814_v36, %v7807_v35  ;;  %v7292_v30 = vand.u32 4294901760, %v7291_v58  ;;  %v8198_v35 = vsel %vm4287_vm6, %v21383_v13, 0 }
 0x6a5   :  { %25752 = vmatprep.subr.bf16.mxu1 %v27551_v0  ;;  %23471 = vmatprep.mubr.f32.mxu0 %v6787_v49  ;;  %v8704_v49 = vld [vmem:[%s30840_s15 + $0x10] sm:$0xff] }
 0x6a8   :  { %25754 = vmatpush3.bf16.msra.mxu1 %v25753_v31 }
 0x6a9   :  { %25755 = vmatprep.subr.bf16.mxu1 %v27551_v0 }
 0x6ab   :  { %23538 = vmatmul.mubr.f32.vlgmr.msra.gmra.mrb[36].mxu1 %v28253_v11  ;;  %v7207_v11 = vsel %vm4287_vm6, %v5724_v10, 0 }
 0x6ac   :  { %25757 = vmatpush3.bf16.msra.mxu1 %v25756_v17  ;;  %23548 = vmatprep.mubr.msk.f32.mxu1 %vm27552_vm1, %v30863_v3  ;;  %v7278_v12 = vand.u32 4294901760, %v7207_v11 }
 0x6ad   :  { %25758 = vmatprep.subr.bf16.mxu1 %v27551_v0 }
 0x6ae   :  { %v7279_v16 = vsub.f32 %v7207_v11, %v7278_v12 }
 0x6b0   :  { %25760 = vmatpush3.bf16.msra.mxu1 %v25759_v37  ;;  %v7280_v21 = vand.u32 4294901760, %v7279_v16  ;;  %v8276_v37 = vand.u32 4294901760, %v8198_v35 }
 0x6b1   :  { %25761 = vmatprep.subr.bf16.mxu1 %v27551_v0 }
 0x6b2   :  { %v7281_v25 = vsub.f32 %v7279_v16, %v7280_v21 }
 0x6b3   :  { %23549 = vmatmul.mubr.f32.vlgmr.msra.gmra.mrb[36].mxu1 %v28243_v8 }
 0x6b4   :  { %25763 = vmatpush3.bf16.msra.mxu1 %v25762_v38  ;;  %23559 = vmatprep.mubr.msk.f32.mxu1 %vm27552_vm1, %v30863_v3  ;;  %v7282_v28 = vand.u32 4294901760, %v7281_v25 }
 0x6b5   :  { %25764 = vmatprep.subr.bf16.mxu1 %v27551_v0 }
 0x6b8   :  { %25766 = vmatpush3.bf16.msra.mxu1 %v25765_v39 }
 0x6b9   :  { %25767 = vmatprep.subr.bf16.mxu1 %v27551_v0 }
 0x6bb   :  { %23560 = vmatmul.mubr.f32.vlgmr.msra.gmra.mrb[36].mxu1 %v28246_v54  ;;  %v8721_v54 = vand.u32 4294901760, %v28375_v7 }
 0x6bc   :  { %25769 = vmatpush3.bf16.msra.mxu1 %v25750_v29  ;;  %23570 = vmatprep.mubr.msk.f32.mxu1 %vm27552_vm1, %v30863_v3 }
 0x6bd   :  { %25770 = vmatprep.subr.bf16.mxu1 %v27551_v0 }
 0x6c0   :  { %25772 = vmatpush3.bf16.msra.mxu1 %v25753_v31 }
 0x6c1   :  { %25773 = vmatprep.subr.bf16.mxu1 %v27551_v0 }
 0x6c3   :  { %23571 = vmatmul.mubr.f32.vlgmr.msra.gmra.mrb[36].mxu1 %v28249_v9 }
 0x6c4   :  { %25775 = vmatpush3.bf16.msra.mxu1 %v25774_v40  ;;  %23581 = vmatprep.mubr.msk.f32.mxu1 %vm27552_vm1, %v30863_v3  ;;  %v8277_v40 = vsub.f32 %v8198_v35, %v8276_v37 }
 0x6c5   :  { %25776 = vmatprep.subr.bf16.mxu1 %v27551_v0 }
 0x6c6   :  { %v8278_v43 = vand.u32 4294901760, %v8277_v40 }
 0x6c8   :  { %25778 = vmatpush3.bf16.msra.mxu1 %v25777_v41 }
 0x6c9   :  { %25779 = vmatprep.subr.bf16.mxu1 %v27551_v0 }
 0x6cb   :  { %23582 = vmatmul.mubr.f32.vlgmr.msra.gmra.mrb[36].mxu1 %v28243_v8 }
 0x6cc   :  { %25781 = vmatpush3.bf16.msra.mxu1 %v25750_v29  ;;  %23592 = vmatprep.mubr.msk.f32.mxu1 %vm27552_vm1, %v30863_v3 }
 0x6cd   :  { %25782 = vmatprep.subr.bf16.mxu1 %v27551_v0  ;;  %v6715_v0 = vsel %vm4287_vm6, %v21377_v50, 0  ;;  %v8705_v50 = vld [vmem:[%s30840_s15 + $0x18] sm:$0xff] }
 0x6ce   :  { %v6793_v51 = vand.u32 4294901760, %v6715_v0 }
 0x6d0   :  { %25784 = vmatpush3.bf16.msra.mxu1 %v25753_v31  ;;  %v6794_v52 = vsub.f32 %v6715_v0, %v6793_v51  ;;  %v21382_v31 = vld [vmem:[%s30903_s5 + $0x20] sm:$0xff]  ;;  %v8724_v0 = vand.u32 4294901760, %v8704_v49 }
 0x6d1   :  { %v8195_v32 = vsel %vm4287_vm6, %v21382_v31, 0 }
 0x6d2   :  { %v6795_v53 = vand.u32 4294901760, %v6794_v52  ;;  %v8266_v33 = vand.u32 4294901760, %v8195_v32 }
 0x6d3   :  { %23593 = vmatmul.mubr.f32.vlgmr.msra.gmra.mrb[36].mxu1 %v28243_v8  ;;  %v8718_v8 = vand.u32 4294901760, %v28370_v6 }
 0x6d4   :  { %v6796_v55 = vsub.f32 %v6794_v52, %v6795_v53  ;;  %v8267_v17 = vsub.f32 %v8195_v32, %v8266_v33 }
 0x6d5   :  { %v28383_v9 = vpack.c.bf16 %v8721_v54, %v8718_v8 }
 0x6d6   :  { %v6797_v63 = vand.u32 4294901760, %v6796_v55  ;;  %v8268_v38 = vand.u32 4294901760, %v8267_v17  ;;  %v8707_v55 = vld [vmem:[%s30840_s15 + $0x28] sm:$0xff] }
 0x6d7   :  { %25786 = vmatprep.subr.bf16.mxu1 %v28383_v9 }
 0x6d8   :  { %25788 = vmatpush3.bf16.msra.mxu1 %v28383_v9  ;;  %v8269_v41 = vsub.f32 %v8267_v17, %v8268_v38 }
 0x776   :  { %v6214_v56 = vpop.f32.mrb[22].mxu0  ;;  %v6707_v59 = vpop.f32.mrb[34].mxu1 }
 0x777   :  { %v6718_v60 = vand.u32 4294901760, %v6707_v59  ;;  %v23402_v46 = vpop.f32.mrb[23].mxu0  ;;  %v23468_v62 = vpop.f32.mrb[35].mxu1  ;;  %v7213_v15 = vand.u32 4294901760, %v6214_v56 }
 0x778   :  { %v8708_v46 = vld [vmem:[%s30840_s15 + $0x30] sm:$0xff]  ;;  %v8709_v62 = vld [vmem:[%s30840_s15 + $0x38] sm:$0xff] }
 0x779   :  { %v6805_v1 = vsub.f32 %v6707_v59, %v6718_v60  ;;  %23469 = vmatprep.subr.mxu0 %v6718_v60  ;;  %v7300_v19 = vsub.f32 %v6214_v56, %v7213_v15  ;;  %v8733_v59 = vand.u32 4294901760, %v8707_v55 }
 0x77a   :  { %23470 = vmatpush3.msra.mxu0 %v6718_v60 }
 0x77b   :  { %23472 = vmatmul.mubr.f32.vlgmr.msra.gmra.mrb[24].mxu0 %v6797_v63  ;;  %v6806_v2 = vand.u32 4294901760, %v6805_v1  ;;  %v7301_v22 = vand.u32 4294901760, %v7300_v19  ;;  %v8736_v63 = vand.u32 4294901760, %v8708_v46 }
 0x77c   :  { %23476 = vmatprep.mubr.f32.mxu0 %v6783_v44 }
 0x77d   :  { %v6807_v4 = vsub.f32 %v6805_v1, %v6806_v2  ;;  %v7302_v26 = vsub.f32 %v7300_v19, %v7301_v22  ;;  %v8854_v58 = vsub.f32 %v8708_v46, %v8736_v63 }
 0x77f   :  { %v6808_v5 = vand.u32 4294901760, %v6807_v4  ;;  %v7303_v29 = vand.u32 4294901760, %v7302_v26  ;;  %v8812_v4 = vsub.f32 %v28370_v6, %v8718_v8  ;;  %v8855_v31 = vand.u32 4294901760, %v8854_v58 }
 0x781   :  { %23474 = vmatprep.subr.mxu0 %v6808_v5  ;;  %v8813_v10 = vand.u32 4294901760, %v8812_v4  ;;  %v8856_v13 = vsub.f32 %v8854_v58, %v8855_v31 }
 0x782   :  { %23475 = vmatpush3.msra.mxu0 %v6808_v5  ;;  %v8819_v5 = vsub.f32 %v28375_v7, %v8721_v54 }
 0x783   :  { %23477 = vmatmul.mubr.f32.vlgmr.msra.gmra.mrb[24].mxu0 %v6793_v51  ;;  %23479 = vmatprep.subr.mxu0 %v6805_v1  ;;  %v8857_v35 = vand.u32 4294901760, %v8856_v13 }
 0x784   :  { %23480 = vmatpush3.msra.mxu0 %v6805_v1  ;;  %23481 = vmatprep.mubr.f32.mxu0 %v6784_v45  ;;  %v8739_v1 = vand.u32 4294901760, %v8709_v62  ;;  %v8820_v11 = vand.u32 4294901760, %v8819_v5 }
 0x785   :  { %23484 = vmatprep.subr.mxu0 %v6718_v60 }
 0x786   :  { %v8821_v14 = vsub.f32 %v8819_v5, %v8820_v11 }
 0x78b   :  { %23482 = vmatmul.mubr.f32.vlgmr.msra.gmra.mrb[24].mxu0 %v6794_v52 }
 0x78c   :  { %23485 = vmatpush3.msra.mxu0 %v6718_v60  ;;  %23486 = vmatprep.mubr.f32.mxu0 %v6785_v47  ;;  %v8279_v47 = vsub.f32 %v8277_v40, %v8278_v43 }
 0x78d   :  { %23489 = vmatprep.subr.mxu0 %v6806_v2 }
 0x78e   :  { %v8280_v48 = vand.u32 4294901760, %v8279_v47  ;;  %v21388_v47 = vld [vmem:[%s30841_s12] ss:$0 sm:$0xff] }
 0x793   :  { %23487 = vmatmul.mubr.f32.vlgmr.msra.gmra.mrb[24].mxu0 %v6795_v53  ;;  %v8706_v53 = vld [vmem:[%s30840_s15 + $0x20] sm:$0xff] }
 0x794   :  { %23490 = vmatpush3.msra.mxu0 %v6806_v2  ;;  %23491 = vmatprep.mubr.f32.mxu0 %v6783_v44  ;;  %v8730_v56 = vand.u32 4294901760, %v8706_v53  ;;  %v28435_v2 = vpack.c.bf16 %v8739_v1, %v8736_v63 }
 0x795   :  { %23494 = vmatprep.subr.mxu0 %v6718_v60 }
 0x79b   :  { %23492 = vmatmul.mubr.f32.vlgmr.msra.gmra.mrb[24].mxu0 %v6793_v51 }
 0x79c   :  { %23495 = vmatpush3.msra.mxu0 %v6718_v60  ;;  %23496 = vmatprep.mubr.f32.mxu0 %v6783_v44  ;;  %v8270_v44 = vand.u32 4294901760, %v8269_v41  ;;  %v28423_v60 = vpack.c.bf16 %v8733_v59, %v8730_v56 }
 0x79d   :  { %23499 = vmatprep.subr.mxu0 %v7213_v15 }
 0x7a3   :  { %23497 = vmatmul.mubr.f32.vlgmr.msra.gmra.mrb[24].mxu0 %v6793_v51  ;;  %v8727_v51 = vand.u32 4294901760, %v8705_v50 }
 0x7a4   :  { %23500 = vmatpush3.msra.mxu0 %v7213_v15  ;;  %23501 = vmatprep.mubr.f32.mxu0 %v7282_v28 }
 0x7a5   :  { %23504 = vmatprep.subr.mxu0 %v7303_v29  ;;  %v28411_v52 = vpack.c.bf16 %v8727_v51, %v8724_v0  ;;  %v8833_v6 = vsub.f32 %v8705_v50, %v8727_v51 }
 0x7a6   :  { %v8190_v61 = vpop.f32.mrb[36].mxu1 }
 0x7a7   :  { %v23594_v24 = vpop.f32.mrb[37].mxu1  ;;  %v8201_v34 = vand.u32 4294901760, %v8190_v61  ;;  %25790 = vmatprep.subr.bf16.mxu1 %v28411_v52  ;;  %v8834_v7 = vand.u32 4294901760, %v8833_v6 }
 0x7a8   :  { %25792 = vmatpush3.bf16.msra.mxu1 %v28411_v52 }
 0x7a9   :  { %v8288_v36 = vsub.f32 %v8190_v61, %v8201_v34  ;;  %25794 = vmatprep.subr.bf16.mxu1 %v28423_v60  ;;  %v8861_v61 = vsub.f32 %v8709_v62, %v8739_v1 }
 0x7ab   :  { %23502 = vmatmul.mubr.f32.vlgmr.msra.gmra.mrb[24].mxu0 %v7292_v30  ;;  %v8289_v39 = vand.u32 4294901760, %v8288_v36  ;;  %v8862_v32 = vand.u32 4294901760, %v8861_v61  ;;  %v28463_v41 = vpack.c.bf16 %v8861_v61, %v8854_v58 }
 0x7ac   :  { %23505 = vmatpush3.msra.mxu0 %v7303_v29  ;;  %23506 = vmatprep.mubr.f32.mxu0 %v7278_v12 }
 0x7ad   :  { %23509 = vmatprep.subr.mxu0 %v7300_v19  ;;  %v8290_v42 = vsub.f32 %v8288_v36, %v8289_v39  ;;  %25796 = vmatpush3.bf16.msra.mxu1 %v28423_v60 }
 0x7ae   :  { %25798 = vmatprep.subr.bf16.mxu1 %v28435_v2 }
 0x7af   :  { %v8291_v45 = vand.u32 4294901760, %v8290_v42  ;;  %v28465_v42 = vpack.c.bf16 %v8820_v11, %v8813_v10 }
 0x7b1   :  { %25800 = vmatpush3.bf16.msra.mxu1 %v28435_v2 }
 0x7b3   :  { %23507 = vmatmul.mubr.f32.vlgmr.msra.gmra.mrb[24].mxu0 %v7288_v20 }
 0x7b4   :  { %23510 = vmatpush3.msra.mxu0 %v7300_v19  ;;  %23511 = vmatprep.mubr.f32.mxu0 %v7279_v16  ;;  %v8822_v16 = vand.u32 4294901760, %v8821_v14 }
 0x7b5   :  { %23514 = vmatprep.subr.mxu0 %v7213_v15 }
 0x7bb   :  { %23512 = vmatmul.mubr.f32.vlgmr.msra.gmra.mrb[24].mxu0 %v7289_v23 }
 0x7bc   :  { %23515 = vmatpush3.msra.mxu0 %v7213_v15  ;;  %23516 = vmatprep.mubr.f32.mxu0 %v7280_v21  ;;  %v8840_v21 = vsub.f32 %v8706_v53, %v8730_v56 }
 0x7bd   :  { %23519 = vmatprep.subr.mxu0 %v7301_v22 }
 0x7be   :  { %v8841_v26 = vand.u32 4294901760, %v8840_v21 }
 0x7c0   :  { %v8842_v29 = vsub.f32 %v8840_v21, %v8841_v26 }
 0x7c2   :  { %v8843_v30 = vand.u32 4294901760, %v8842_v29 }
 0x7c3   :  { %23517 = vmatmul.mubr.f32.vlgmr.msra.gmra.mrb[24].mxu0 %v7290_v27 }
 0x7c4   :  { %23520 = vmatpush3.msra.mxu0 %v7301_v22  ;;  %23521 = vmatprep.mubr.f32.mxu0 %v7278_v12  ;;  %v8847_v22 = vsub.f32 %v8707_v55, %v8733_v59 }
 0x7c5   :  { %23524 = vmatprep.subr.mxu0 %v7213_v15 }
 0x7c6   :  { %v8848_v27 = vand.u32 4294901760, %v8847_v22 }
 0x7c8   :  { %v8849_v24 = vsub.f32 %v8847_v22, %v8848_v27 }
 0x7cb   :  { %23522 = vmatmul.mubr.f32.vlgmr.msra.gmra.mrb[24].mxu0 %v7288_v20 }
 0x7cc   :  { %23525 = vmatpush3.msra.mxu0 %v7213_v15  ;;  %23526 = vmatprep.mubr.f32.mxu0 %v7278_v12  ;;  %v8814_v12 = vsub.f32 %v8812_v4, %v8813_v10  ;;  %v8826_v15 = vsub.f32 %v8704_v49, %v8724_v0 }
 0x7cd   :  { %23595 = vmatprep.subr.mxu0 %v8201_v34 }
 0x7ce   :  { %v8815_v8 = vand.u32 4294901760, %v8814_v12  ;;  %v8827_v18 = vand.u32 4294901760, %v8826_v15 }
 0x7d0   :  { %v28448_v54 = vpack.c.bf16 %v8822_v16, %v8815_v8  ;;  %v8828_v19 = vsub.f32 %v8826_v15, %v8827_v18 }
 0x7d2   :  { %25802 = vmatprep.subr.bf16.mxu1 %v28448_v54  ;;  %v8829_v23 = vand.u32 4294901760, %v8828_v19 }
 0x7d3   :  { %23527 = vmatmul.mubr.f32.vlgmr.msra.gmra.mrb[24].mxu0 %v7288_v20  ;;  %v8835_v20 = vsub.f32 %v8833_v6, %v8834_v7 }
 0x7d4   :  { %23596 = vmatpush3.msra.mxu0 %v8201_v34  ;;  %23597 = vmatprep.mubr.f32.mxu0 %v8270_v44  ;;  %v28469_v44 = vpack.c.bf16 %v8848_v27, %v8841_v26 }
 0x7d5   :  { %23600 = vmatprep.subr.mxu0 %v8291_v45  ;;  %v8836_v25 = vand.u32 4294901760, %v8835_v20 }
 0x7d7   :  { %v28451_v28 = vpack.c.bf16 %v8836_v25, %v8829_v23 }
 0x7db   :  { %23598 = vmatmul.mubr.f32.vlgmr.msra.gmra.mrb[24].mxu0 %v8280_v48 }
 0x7dc   :  { %23601 = vmatpush3.msra.mxu0 %v8291_v45  ;;  %23602 = vmatprep.mubr.f32.mxu0 %v8266_v33  ;;  %v28471_v45 = vpack.c.bf16 %v8862_v32, %v8855_v31 }
 0x7dd   :  { %23605 = vmatprep.subr.mxu0 %v8288_v36 }
 0x7e3   :  { %23603 = vmatmul.mubr.f32.vlgmr.msra.gmra.mrb[24].mxu0 %v8276_v37 }
 0x7e4   :  { %23606 = vmatpush3.msra.mxu0 %v8288_v36  ;;  %23607 = vmatprep.mubr.f32.mxu0 %v8267_v17 }
 0x7e5   :  { %23610 = vmatprep.subr.mxu0 %v8201_v34 }
 0x7eb   :  { %23608 = vmatmul.mubr.f32.vlgmr.msra.gmra.mrb[24].mxu0 %v8277_v40  ;;  %v28461_v40 = vpack.c.bf16 %v8847_v22, %v8840_v21 }
 0x7ec   :  { %23611 = vmatpush3.msra.mxu0 %v8201_v34  ;;  %23612 = vmatprep.mubr.f32.mxu0 %v8268_v38  ;;  %v28457_v38 = vpack.c.bf16 %v8819_v5, %v8812_v4 }
 0x7ed   :  { %23615 = vmatprep.subr.mxu0 %v8289_v39 }
 0x7f3   :  { %23613 = vmatmul.mubr.f32.vlgmr.msra.gmra.mrb[24].mxu0 %v8278_v43  ;;  %v28467_v43 = vpack.c.bf16 %v8834_v7, %v8827_v18 }
 0x7f4   :  { %23616 = vmatpush3.msra.mxu0 %v8289_v39  ;;  %23617 = vmatprep.mubr.f32.mxu0 %v8266_v33  ;;  %v28459_v39 = vpack.c.bf16 %v8833_v6, %v8826_v15 }
 0x7f5   :  { %23620 = vmatprep.subr.mxu0 %v8201_v34 }
 0x7fb   :  { %23618 = vmatmul.mubr.f32.vlgmr.msra.gmra.mrb[24].mxu0 %v8276_v37 }
 0x7fc   :  { %23621 = vmatpush3.msra.mxu0 %v8201_v34  ;;  %23622 = vmatprep.mubr.f32.mxu0 %v8266_v33  ;;  %v8850_v33 = vand.u32 4294901760, %v8849_v24  ;;  %v8863_v34 = vsub.f32 %v8861_v61, %v8862_v32 }
 0x7fd   :  { %25962 = vmatprep.subr.bf16.mxu0 %v28383_v9 }
 0x7fe   :  { %v28453_v17 = vpack.c.bf16 %v8850_v33, %v8843_v30  ;;  %v8864_v36 = vand.u32 4294901760, %v8863_v34 }
 0x803   :  { %23623 = vmatmul.mubr.f32.vlgmr.msra.gmra.mrb[24].mxu0 %v8276_v37  ;;  %v28455_v37 = vpack.c.bf16 %v8864_v36, %v8857_v35 }
 0x804   :  { %25964 = vmatpush3.bf16.msra.mxu0 %v28383_v9 }
 0x805   :  { %25966 = vmatprep.subr.bf16.mxu0 %v28411_v52 }
 0x808   :  { %25968 = vmatpush3.bf16.msra.mxu0 %v28411_v52 }
 0x809   :  { %25970 = vmatprep.subr.bf16.mxu0 %v28423_v60 }
 0x80c   :  { %25972 = vmatpush3.bf16.msra.mxu0 %v28423_v60 }
 0x80d   :  { %25974 = vmatprep.subr.bf16.mxu0 %v28435_v2 }
 0x810   :  { %25976 = vmatpush3.bf16.msra.mxu0 %v28435_v2 }
 0x811   :  { %23883 = vmatprep.subr.mxu0 %v30863_v3 }
 0x8d6   :  { %v23624_v48 = vpop.f32.mrb[24].mxu0 }
 0x8d7   :  { %v8699_v49 = vadd.f32 %v23624_v48, %v21388_v47  ;;  %v8679_v50 = vpop.f32.mrb[25].mxu0 }
 0x8d8   :  { %v8698_v0 = vadd.f32 %v21388_v47, %v8679_v50 }
 0x8d9   :  { %v28476_v51 = vmax.f32 %v8699_v49, 0.0 }
 0x8da   :  { %v28478_v53 = vmax.f32 %v8698_v0, 0.0 }
 0x8db   :  { %v8715_v55 = vsel %vm8710_vm7, %v28476_v51, 0  ;;  %v9307_v56 = vmul.f32 %v28476_v51, %v28476_v51 }
 0x8dc   :  { %v28484_v59 = vand.u32 4294901760, %v8715_v55  ;;  %v8712_v46 = vsel %vm8710_vm7, %v28478_v53, 0  ;;  %v9306_v62 = vmul.f32 %v28478_v53, %v28478_v53 }
 0x8dd   :  { %v28491_v63 = vsel %vm8710_vm7, %v9307_v56, 0  ;;  %v8790_v1 = vand.u32 4294901760, %v8712_v46 }
 0x8de   :  { %v8801_v4 = vsub.f32 %v8715_v55, %v28484_v59  ;;  %v9309_v5 = vsel %vm8710_vm7, %v9306_v62, 0  ;;  %v28498_v12 = vand.u32 4294901760, %v28491_v63 }
 0x8df   :  { %v8791_v10 = vsub.f32 %v8712_v46, %v8790_v1  ;;  %v28495_v11 = vand.u32 4294901760, %v9309_v5 }
 0x8e0   :  { %v8802_v14 = vand.u32 4294901760, %v8801_v4  ;;  %v9398_v22 = vsub.f32 %v28491_v63, %v28498_v12 }
 0x8e1   :  { %23850 = vmatprep.mubr.f32.mxu0 %v28495_v11  ;;  %v8792_v15 = vand.u32 4294901760, %v8791_v10  ;;  %v9388_v7 = vsub.f32 %v9309_v5, %v28495_v11 }
 0x8e2   :  { %23851 = vmatmul.mubr.f32.vlgmr.msra.gmra.mrb[26].mxu0 %v28498_v12  ;;  %v8803_v6 = vsub.f32 %v8801_v4, %v8802_v14  ;;  %v9399_v23 = vand.u32 4294901760, %v9398_v22 }
 0x8e3   :  { %v8793_v8 = vsub.f32 %v8791_v10, %v8792_v15  ;;  %23885 = vmatprep.mubr.msk.f32.mxu0 %vm27552_vm1, %v30863_v3  ;;  %v9389_v19 = vand.u32 4294901760, %v9388_v7 }
 0x8e4   :  { %v8804_v18 = vand.u32 4294901760, %v8803_v6  ;;  %v9400_v25 = vsub.f32 %v9398_v22, %v9399_v23 }
 0x8e5   :  { %v8794_v16 = vand.u32 4294901760, %v8793_v8  ;;  %v9390_v20 = vsub.f32 %v9388_v7, %v9389_v19 }
 0x8e6   :  { %v9401_v26 = vand.u32 4294901760, %v9400_v25 }
 0x8e7   :  { %23641 = vmatprep.mubr.f32.mxu1 %v8794_v16  ;;  %v9391_v21 = vand.u32 4294901760, %v9390_v20 }
 0x8e8   :  { %23642 = vmatmul.mubr.f32.vlgmr.msra.gmra.mrb[38].mxu1 %v8804_v18  ;;  %v10844_v18 = vld [vmem:[%s30843_s17] sm:$0xff] }
 0x8e9   :  { %25804 = vmatpush3.bf16.msra.mxu1 %v28448_v54  ;;  %23660 = vmatprep.mubr.f32.mxu1 %v8790_v1  ;;  %v10859_v20 = vand.u32 4294901760, %v10844_v18 }
 0x8ea   :  { %25806 = vmatprep.subr.bf16.mxu1 %v28451_v28 }
 0x8ed   :  { %25808 = vmatpush3.bf16.msra.mxu1 %v28451_v28 }
 0x8ee   :  { %25810 = vmatprep.subr.bf16.mxu1 %v28453_v17 }
 0x8f1   :  { %25812 = vmatpush3.bf16.msra.mxu1 %v28453_v17 }
 0x8f2   :  { %25814 = vmatprep.subr.bf16.mxu1 %v28455_v37 }
 0x8f5   :  { %25816 = vmatpush3.bf16.msra.mxu1 %v28455_v37 }
 0x8f6   :  { %25818 = vmatprep.subr.bf16.mxu1 %v28457_v38 }
 0x8f8   :  { %23661 = vmatmul.mubr.f32.vlgmr.msra.gmra.mrb[38].mxu1 %v28484_v59 }
 0x8f9   :  { %25820 = vmatpush3.bf16.msra.mxu1 %v28457_v38  ;;  %23679 = vmatprep.mubr.f32.mxu1 %v8791_v10 }
 0x8fa   :  { %25822 = vmatprep.subr.bf16.mxu1 %v28459_v39 }
 0x8fd   :  { %25824 = vmatpush3.bf16.msra.mxu1 %v28459_v39 }
 0x8fe   :  { %25826 = vmatprep.subr.bf16.mxu1 %v28461_v40 }
 0x901   :  { %25828 = vmatpush3.bf16.msra.mxu1 %v28461_v40 }
 0x902   :  { %25830 = vmatprep.subr.bf16.mxu1 %v28463_v41 }
 0x905   :  { %25832 = vmatpush3.bf16.msra.mxu1 %v28463_v41 }
 0x906   :  { %25834 = vmatprep.subr.bf16.mxu1 %v28383_v9 }
 0x908   :  { %23680 = vmatmul.mubr.f32.vlgmr.msra.gmra.mrb[38].mxu1 %v8801_v4 }
 0x909   :  { %25836 = vmatpush3.bf16.msra.mxu1 %v28383_v9  ;;  %23698 = vmatprep.mubr.f32.mxu1 %v8792_v15 }
 0x90a   :  { %25838 = vmatprep.subr.bf16.mxu1 %v28411_v52 }
 0x90d   :  { %25840 = vmatpush3.bf16.msra.mxu1 %v28411_v52 }
 0x90e   :  { %25842 = vmatprep.subr.bf16.mxu1 %v28423_v60 }
 0x911   :  { %25844 = vmatpush3.bf16.msra.mxu1 %v28423_v60 }
 0x912   :  { %25846 = vmatprep.subr.bf16.mxu1 %v28435_v2 }
 0x915   :  { %25848 = vmatpush3.bf16.msra.mxu1 %v28435_v2 }
 0x916   :  { %25850 = vmatprep.subr.bf16.mxu1 %v28465_v42 }
 0x918   :  { %23699 = vmatmul.mubr.f32.vlgmr.msra.gmra.mrb[38].mxu1 %v8802_v14 }
 0x919   :  { %25852 = vmatpush3.bf16.msra.mxu1 %v28465_v42  ;;  %23717 = vmatprep.mubr.f32.mxu1 %v8790_v1 }
 0x91a   :  { %25854 = vmatprep.subr.bf16.mxu1 %v28467_v43 }
 0x91d   :  { %25856 = vmatpush3.bf16.msra.mxu1 %v28467_v43 }
 0x91e   :  { %25858 = vmatprep.subr.bf16.mxu1 %v28469_v44 }
 0x921   :  { %25860 = vmatpush3.bf16.msra.mxu1 %v28469_v44 }
 0x922   :  { %25862 = vmatprep.subr.bf16.mxu1 %v28471_v45 }
 0x925   :  { %25864 = vmatpush3.bf16.msra.mxu1 %v28471_v45 }
 0x926   :  { %25866 = vmatprep.subr.bf16.mxu1 %v28383_v9 }
 0x928   :  { %23718 = vmatmul.mubr.f32.vlgmr.msra.gmra.mrb[38].mxu1 %v28484_v59 }
 0x929   :  { %25868 = vmatpush3.bf16.msra.mxu1 %v28383_v9  ;;  %23736 = vmatprep.mubr.f32.mxu1 %v8790_v1 }
 0x92a   :  { %25870 = vmatprep.subr.bf16.mxu1 %v28411_v52 }
 0x92d   :  { %25872 = vmatpush3.bf16.msra.mxu1 %v28411_v52 }
 0x92e   :  { %25874 = vmatprep.subr.bf16.mxu1 %v28423_v60 }
 0x931   :  { %25876 = vmatpush3.bf16.msra.mxu1 %v28423_v60 }
 0x932   :  { %25878 = vmatprep.subr.bf16.mxu1 %v28435_v2 }
 0x935   :  { %25880 = vmatpush3.bf16.msra.mxu1 %v28435_v2 }
 0x936   :  { %25882 = vmatprep.subr.bf16.mxu1 %v28383_v9 }
 0x938   :  { %23737 = vmatmul.mubr.f32.vlgmr.msra.gmra.mrb[38].mxu1 %v28484_v59 }
 0x939   :  { %25884 = vmatpush3.bf16.msra.mxu1 %v28383_v9  ;;  %23755 = vmatprep.mubr.f32.mxu1 %v9391_v21 }
 0x93a   :  { %25886 = vmatprep.subr.bf16.mxu1 %v28411_v52 }
 0x93d   :  { %25888 = vmatpush3.bf16.msra.mxu1 %v28411_v52 }
 0x93e   :  { %25890 = vmatprep.subr.bf16.mxu1 %v28423_v60 }
 0x941   :  { %25892 = vmatpush3.bf16.msra.mxu1 %v28423_v60 }
 0x942   :  { %25894 = vmatprep.subr.bf16.mxu1 %v28435_v2 }
 0x945   :  { %25896 = vmatpush3.bf16.msra.mxu1 %v28435_v2 }
 0x946   :  { %25898 = vmatprep.subr.bf16.mxu1 %v28448_v54 }
 0x948   :  { %23756 = vmatmul.mubr.f32.vlgmr.msra.gmra.mrb[40].mxu1 %v9401_v26 }
 0x949   :  { %25900 = vmatpush3.bf16.msra.mxu1 %v28448_v54  ;;  %23774 = vmatprep.mubr.f32.mxu1 %v28495_v11 }
 0x94a   :  { %25902 = vmatprep.subr.bf16.mxu1 %v28451_v28 }
 0x94d   :  { %25904 = vmatpush3.bf16.msra.mxu1 %v28451_v28 }
 0x94e   :  { %25906 = vmatprep.subr.bf16.mxu1 %v28453_v17 }
 0x951   :  { %25908 = vmatpush3.bf16.msra.mxu1 %v28453_v17 }
 0x952   :  { %25910 = vmatprep.subr.bf16.mxu1 %v28455_v37 }
 0x955   :  { %25912 = vmatpush3.bf16.msra.mxu1 %v28455_v37 }
 0x956   :  { %25914 = vmatprep.subr.bf16.mxu1 %v28457_v38 }
 0x958   :  { %23775 = vmatmul.mubr.f32.vlgmr.msra.gmra.mrb[40].mxu1 %v28498_v12 }
 0x959   :  { %25916 = vmatpush3.bf16.msra.mxu1 %v28457_v38  ;;  %23793 = vmatprep.mubr.f32.mxu1 %v9388_v7  ;;  %v10845_v7 = vld [vmem:[%s30843_s17 + $0x8] sm:$0xff] }
 0x95a   :  { %25918 = vmatprep.subr.bf16.mxu1 %v28459_v39  ;;  %v10862_v21 = vand.u32 4294901760, %v10845_v7 }
 0x95c   :  { %v28661_v26 = vpack.c.bf16 %v10862_v21, %v10859_v20 }
 0x95d   :  { %25920 = vmatpush3.bf16.msra.mxu1 %v28459_v39 }
 0x95e   :  { %25922 = vmatprep.subr.bf16.mxu1 %v28461_v40 }
 0x961   :  { %25924 = vmatpush3.bf16.msra.mxu1 %v28461_v40 }
 0x962   :  { %25926 = vmatprep.subr.bf16.mxu1 %v28463_v41 }
 0x965   :  { %25928 = vmatpush3.bf16.msra.mxu1 %v28463_v41 }
 0x966   :  { %25930 = vmatprep.subr.bf16.mxu1 %v28383_v9 }
 0x968   :  { %23794 = vmatmul.mubr.f32.vlgmr.msra.gmra.mrb[40].mxu1 %v9398_v22  ;;  %v21396_v22 = vld [vmem:[%s30843_s17 + $0x48] sm:$0xff] }
 0x969   :  { %25932 = vmatpush3.bf16.msra.mxu1 %v28383_v9  ;;  %23812 = vmatprep.mubr.f32.mxu1 %v9389_v19  ;;  %v9911_v9 = vld [vmem:[%s30842_s16] sm:$0xff]  ;;  %v11456_v25 = vand.u32 4294901760, %v21396_v22 }
 0x96a   :  { %25934 = vmatprep.subr.bf16.mxu1 %v28411_v52  ;;  %v21395_v19 = vld [vmem:[%s30843_s17 + $0x40] sm:$0xff] }
 0x96d   :  { %25936 = vmatpush3.bf16.msra.mxu1 %v28411_v52  ;;  %v28599_v52 = vand.u32 4294901760, %v9911_v9 }
 0x96e   :  { %25938 = vmatprep.subr.bf16.mxu1 %v28423_v60 }
 0x96f   :  { %23884 = vmatpush3.msra.mxu0 %v28599_v52  ;;  %v9994_v13 = vsub.f32 %v9911_v9, %v28599_v52 }
 0x970   :  { %23888 = vmatprep.subr.mxu0 %v30863_v3 }
 0x971   :  { %25940 = vmatpush3.bf16.msra.mxu1 %v28423_v60  ;;  %v28609_v35 = vand.u32 4294901760, %v9994_v13 }
 0x972   :  { %25942 = vmatprep.subr.bf16.mxu1 %v28435_v2 }
 0x973   :  { %v9996_v38 = vsub.f32 %v9994_v13, %v28609_v35 }
 0x975   :  { %25944 = vmatpush3.bf16.msra.mxu1 %v28435_v2  ;;  %v9997_v41 = vand.u32 4294901760, %v9996_v38  ;;  %v28708_v38 = vsub.f32 %v10845_v7, %v10862_v21 }
 0x976   :  { %25946 = vmatprep.subr.bf16.mxu1 %v28465_v42 }
 0x978   :  { %23813 = vmatmul.mubr.f32.vlgmr.msra.gmra.mrb[40].mxu1 %v9399_v23  ;;  %v11453_v23 = vand.u32 4294901760, %v21395_v19 }
 0x979   :  { %25948 = vmatpush3.bf16.msra.mxu1 %v28465_v42  ;;  %23831 = vmatprep.mubr.f32.mxu1 %v28495_v11 }
 0x97a   :  { %25950 = vmatprep.subr.bf16.mxu1 %v28467_v43  ;;  %v28663_v9 = vpack.c.bf16 %v11456_v25, %v11453_v23 }
 0x97d   :  { %25952 = vmatpush3.bf16.msra.mxu1 %v28467_v43 }
 0x97e   :  { %25954 = vmatprep.subr.bf16.mxu1 %v28469_v44 }
 0x981   :  { %25956 = vmatpush3.bf16.msra.mxu1 %v28469_v44 }
 0x982   :  { %25958 = vmatprep.subr.bf16.mxu1 %v28471_v45 }
 0x985   :  { %25960 = vmatpush3.bf16.msra.mxu1 %v28471_v45 }
 0x986   :  { %23853 = vmatprep.subr.mxu1 %v30863_v3 }
 0x988   :  { %23832 = vmatmul.mubr.f32.vlgmr.msra.gmra.mrb[40].mxu1 %v28498_v12 }
 0x989   :  { %23855 = vmatprep.mubr.msk.f32.mxu1 %vm27552_vm1, %v30863_v3  ;;  %23854 = vmatpush3.msra.mxu1 %v28599_v52 }
 0x98a   :  { %23858 = vmatprep.subr.mxu1 %v30863_v3 }
 0x9b5   :  { %v23852_v60 = vpop.f32.mrb[26].mxu0 }
 0x9b6   :  { %v9884_v2 = vpop.f32.mrb[27].mxu0 }
 0xa0b   :  { %v23738_v54 = vpop.f32.mrb[38].mxu1 }
 0xa0c   :  { %v9298_v27 = vsel %vm4287_vm6, %v23738_v54, 0.0  ;;  %v9287_v28 = vpop.f32.mrb[39].mxu1 }
 0xa0d   :  { %v9297_v29 = vsel %vm4287_vm6, %v9287_v28, 0.0  ;;  %v21398_v28 = vld [vmem:[%s30843_s17 + $0x58] sm:$0xff] }
 0xa0e   :  { %v9299_v58 = vadd.f32 %v9298_v27, %v9297_v29 }
 0xa10   :  { %v9300_v61 = vrot.slane %v9299_v58, 4 }
 0xa12   :  { %v9301_v24 = vadd.f32 %v9300_v61, %v9299_v58  ;;  %v11462_v58 = vand.u32 4294901760, %v21398_v28 }
 0xa14   :  { %v9302_v30 = vrot.slane %v9301_v24, 2 }
 0xa16   :  { %v9303_v31 = vadd.f32 %v9302_v30, %v9301_v24  ;;  %v10848_v30 = vld [vmem:[%s30843_s17 + $0x20] sm:$0xff] }
 0xa18   :  { %v9304_v32 = vrot.slane %v9303_v31, 1 }
 0xa1a   :  { %v9305_v33 = vadd.f32 %v9304_v32, %v9303_v31  ;;  %v10849_v31 = vld [vmem:[%s30843_s17 + $0x28] sm:$0xff]  ;;  %v28694_v32 = vld [vmem:[%s30843_s17 + $0x60] sm:$0xff] }
 0xa1c   :  { %v9904_v34 = vmul.f32 0.0078125, %v9305_v33  ;;  %v10871_v33 = vand.u32 4294901760, %v10848_v30 }
 0xa1e   :  { %v9914_v17 = vsel %vm4287_vm6, %v9904_v34, 0  ;;  %v9906_v63 = vmul.f32 %v9904_v34, %v9904_v34  ;;  %v21400_v34 = vld [vmem:[%s30843_s17 + $0x68] sm:$0xff] }
 0xa1f   :  { %v9982_v36 = vand.u32 4294901760, %v9914_v17 }
 0xa21   :  { %v9983_v37 = vsub.f32 %v9914_v17, %v9982_v36  ;;  %v11465_v17 = vand.u32 4294901760, %v28694_v32 }
 0xa23   :  { %v9984_v39 = vand.u32 4294901760, %v9983_v37 }
 0xa25   :  { %v9985_v40 = vsub.f32 %v9983_v37, %v9984_v39 }
 0xa27   :  { %v9986_v42 = vand.u32 4294901760, %v9985_v40 }
 0xa29   :  { %23856 = vmatmul.mubr.f32.vlgmr.msra.gmra.mrb[42].mxu1 %v9986_v42  ;;  %v10851_v42 = vld [vmem:[%s30843_s17 + $0x38] sm:$0xff] }
 0xa2a   :  { %23859 = vmatpush3.msra.mxu1 %v9997_v41  ;;  %23860 = vmatprep.mubr.msk.f32.mxu1 %vm27552_vm1, %v30863_v3 }
 0xa2b   :  { %23863 = vmatprep.subr.mxu1 %v30863_v3 }
 0xa31   :  { %23861 = vmatmul.mubr.f32.vlgmr.msra.gmra.mrb[42].mxu1 %v9982_v36 }
 0xa32   :  { %23864 = vmatpush3.msra.mxu1 %v9994_v13  ;;  %23865 = vmatprep.mubr.msk.f32.mxu1 %vm27552_vm1, %v30863_v3 }
 0xa33   :  { %23868 = vmatprep.subr.mxu1 %v30863_v3 }
 0xa39   :  { %23866 = vmatmul.mubr.f32.vlgmr.msra.gmra.mrb[42].mxu1 %v9983_v37  ;;  %v28706_v37 = vsub.f32 %v10844_v18, %v10859_v20 }
 0xa3a   :  { %23869 = vmatpush3.msra.mxu1 %v28599_v52  ;;  %23870 = vmatprep.mubr.msk.f32.mxu1 %vm27552_vm1, %v30863_v3 }
 0xa3b   :  { %23873 = vmatprep.subr.mxu1 %v30863_v3 }
 0xa41   :  { %23871 = vmatmul.mubr.f32.vlgmr.msra.gmra.mrb[42].mxu1 %v9984_v39  ;;  %v28710_v39 = vsub.f32 %v21395_v19, %v11453_v23  ;;  %v28780_v23 = vsub.f32 %v10848_v30, %v10871_v33 }
 0xa42   :  { %23874 = vmatpush3.msra.mxu1 %v28609_v35  ;;  %23875 = vmatprep.mubr.msk.f32.mxu1 %vm27552_vm1, %v30863_v3 }
 0xa43   :  { %23878 = vmatprep.subr.mxu1 %v30863_v3 }
 0xa49   :  { %23876 = vmatmul.mubr.f32.vlgmr.msra.gmra.mrb[42].mxu1 %v9982_v36 }
 0xa4a   :  { %23879 = vmatpush3.msra.mxu1 %v28599_v52  ;;  %23880 = vmatprep.mubr.msk.f32.mxu1 %vm27552_vm1, %v30863_v3 }
 0xa4b   :  { %25978 = vmatprep.subr.bf16.mxu1 %v28661_v26 }
 0xa51   :  { %23881 = vmatmul.mubr.f32.vlgmr.msra.gmra.mrb[42].mxu1 %v9982_v36 }
 0xa52   :  { %25980 = vmatpush3.bf16.msra.mxu1 %v28661_v26 }
 0xa5b   :  { %v23833_v43 = vpop.f32.mrb[40].mxu1 }
 0xa5c   :  { %v26964_v44 = vadd.f32 %v23852_v60, %v23833_v43  ;;  %v9799_v45 = vpop.f32.mrb[41].mxu1  ;;  %v10847_v60 = vld [vmem:[%s30843_s17 + $0x18] sm:$0xff]  ;;  %v28723_v43 = vld [vmem:[%s30843_s17 + $0x70] sm:$0xff] }
 0xa5d   :  { %v26965_v47 = vadd.f32 %v9884_v2, %v9799_v45  ;;  %v21397_v2 = vld [vmem:[%s30843_s17 + $0x50] sm:$0xff]  ;;  %v10868_v27 = vand.u32 4294901760, %v10847_v60 }
 0xa5e   :  { %v9895_v48 = vsel %vm4287_vm6, %v26964_v44, 0.0  ;;  %v11459_v29 = vand.u32 4294901760, %v21397_v2  ;;  %v28725_v44 = vsub.f32 %v21396_v22, %v11456_v25 }
 0xa5f   :  { %v9894_v49 = vsel %vm4287_vm6, %v26965_v47, 0.0  ;;  %v10880_v47 = vand.u32 4294901760, %v10851_v42 }
 0xa60   :  { %v9896_v50 = vadd.f32 %v9895_v48, %v9894_v49  ;;  %v28683_v24 = vpack.c.bf16 %v11462_v58, %v11459_v29  ;;  %v28731_v48 = vld [vmem:[%s30843_s17 + $0x78] sm:$0xff]  ;;  %v11471_v49 = vand.u32 4294901760, %v28723_v43 }
 0xa62   :  { %v9897_v0 = vrot.slane %v9896_v50, 4 }
 0xa64   :  { %v9898_v55 = vadd.f32 %v9897_v0, %v9896_v50  ;;  %v10954_v50 = vand.u32 4294901760, %v28706_v37  ;;  %v11474_v0 = vand.u32 4294901760, %v28731_v48 }
 0xa66   :  { %v9899_v56 = vrot.slane %v9898_v55, 2 }
 0xa68   :  { %v9900_v59 = vadd.f32 %v9899_v56, %v9898_v55  ;;  %v10961_v55 = vand.u32 4294901760, %v28708_v38  ;;  %v11548_v56 = vand.u32 4294901760, %v28710_v39 }
 0xa6a   :  { %v9901_v46 = vrot.slane %v9900_v59, 1 }
 0xa6c   :  { %v9902_v62 = vadd.f32 %v9901_v46, %v9900_v59  ;;  %v30868_v59 = vand.u32 4294901760, %v28725_v44 }
 0xa6e   :  { %v9905_v1 = vmul.f32 0.0078125, %v9902_v62  ;;  %v10955_v62 = vsub.f32 %v28706_v37, %v10954_v50 }
 0xa70   :  { %v9907_v4 = vsub.f32 %v9905_v1, %v9906_v63  ;;  %v28749_v63 = vpack.c.bf16 %v11474_v0, %v11471_v49  ;;  %v10962_v1 = vsub.f32 %v28708_v38, %v10961_v55 }
 0xa72   :  { %v9908_v5 = vmax.f32 %v9907_v4, 0.0  ;;  %v11549_v4 = vsub.f32 %v28710_v39, %v11548_v56 }
 0xa74   :  { %v9909_v10 = vadd.f32 1e-05, %v9908_v5  ;;  %v11556_v5 = vsub.f32 %v28725_v44, %v30868_v59 }
 0xa76   :  { %27515 = vrsqrt.f32 %v9909_v10  ;;  %v10956_v10 = vand.u32 4294901760, %v10955_v62 }
 0xa80   :  { %v27516_v11 = vpop.eup %27515 }
 0xa81   :  { %v10377_v12 = vsel %vm4287_vm6, %v27516_v11, 0 }
 0xa82   :  { %v10445_v14 = vand.u32 4294901760, %v10377_v12 }
 0xa84   :  { %v10446_v15 = vsub.f32 %v10377_v12, %v10445_v14  ;;  %v28763_v12 = vsub.f32 %v10847_v60, %v10868_v27 }
 0xa86   :  { %v10447_v6 = vand.u32 4294901760, %v10446_v15  ;;  %v30866_v7 = vand.u32 4294901760, %v28763_v12 }
 0xa88   :  { %v10448_v8 = vsub.f32 %v10446_v15, %v10447_v6 }
 0xa8a   :  { %v10449_v16 = vand.u32 4294901760, %v10448_v8  ;;  %v11557_v8 = vand.u32 4294901760, %v11556_v5 }
 0xa8c   :  { %23886 = vmatmul.mubr.f32.vlgmr.msra.gmra.mrb[28].mxu0 %v10449_v16  ;;  %v28769_v16 = vsub.f32 %v21398_v28, %v11462_v58  ;;  %v11575_v28 = vsub.f32 %v28694_v32, %v11465_v17 }
 0xa8d   :  { %23889 = vmatpush3.msra.mxu0 %v9997_v41  ;;  %23890 = vmatprep.mubr.msk.f32.mxu0 %vm27552_vm1, %v30863_v3  ;;  %v10850_v41 = vld [vmem:[%s30843_s17 + $0x30] sm:$0xff] }
 0xa8e   :  { %23893 = vmatprep.subr.mxu0 %v30863_v3  ;;  %v10877_v45 = vand.u32 4294901760, %v10850_v41  ;;  %v11569_v22 = vand.u32 4294901760, %v28769_v16  ;;  %v11576_v5 = vand.u32 4294901760, %v11575_v28 }
 0xa90   :  { %v28742_v46 = vpack.c.bf16 %v10880_v47, %v10877_v45 }
 0xa94   :  { %23891 = vmatmul.mubr.f32.vlgmr.msra.gmra.mrb[28].mxu0 %v10445_v14 }
 0xa95   :  { %23894 = vmatpush3.msra.mxu0 %v9994_v13  ;;  %23895 = vmatprep.mubr.msk.f32.mxu0 %vm27552_vm1, %v30863_v3  ;;  %v10874_v13 = vand.u32 4294901760, %v10849_v31 }
 0xa96   :  { %23898 = vmatprep.subr.mxu0 %v30863_v3 }
 0xa97   :  { %v28704_v36 = vpack.c.bf16 %v10874_v13, %v10871_v33 }
 0xa9c   :  { %23896 = vmatmul.mubr.f32.vlgmr.msra.gmra.mrb[28].mxu0 %v10446_v15  ;;  %v10963_v15 = vand.u32 4294901760, %v10962_v1 }
 0xa9d   :  { %23899 = vmatpush3.msra.mxu0 %v28599_v52  ;;  %23900 = vmatprep.mubr.msk.f32.mxu0 %vm27552_vm1, %v30863_v3 }
 0xa9e   :  { %23903 = vmatprep.subr.mxu0 %v30863_v3  ;;  %v28775_v20 = vpack.c.bf16 %v10963_v15, %v10956_v10  ;;  %v10995_v15 = vsub.f32 %v10850_v41, %v10877_v45 }
 0xaa4   :  { %23901 = vmatmul.mubr.f32.vlgmr.msra.gmra.mrb[28].mxu0 %v10447_v6  ;;  %v11550_v6 = vand.u32 4294901760, %v11549_v4 }
 0xaa5   :  { %23904 = vmatpush3.msra.mxu0 %v28609_v35  ;;  %23905 = vmatprep.mubr.msk.f32.mxu0 %vm27552_vm1, %v30863_v3  ;;  %v11468_v35 = vand.u32 4294901760, %v21400_v34 }
 0xaa6   :  { %23908 = vmatprep.subr.mxu0 %v30863_v3  ;;  %v28777_v21 = vpack.c.bf16 %v11557_v8, %v11550_v6  ;;  %v11002_v6 = vsub.f32 %v10851_v42, %v10880_v47 }
 0xaa7   :  { %v28712_v40 = vpack.c.bf16 %v11468_v35, %v11465_v17  ;;  %v10996_v17 = vand.u32 4294901760, %v10995_v15 }
 0xaa9   :  { %v10997_v41 = vsub.f32 %v10995_v15, %v10996_v17 }
 0xaac   :  { %23906 = vmatmul.mubr.f32.vlgmr.msra.gmra.mrb[28].mxu0 %v10445_v14 }
 0xaad   :  { %23909 = vmatpush3.msra.mxu0 %v28599_v52  ;;  %23910 = vmatprep.mubr.msk.f32.mxu0 %vm27552_vm1, %v30863_v3  ;;  %v10846_v52 = vld [vmem:[%s30843_s17 + $0x10] sm:$0xff] }
 0xaae   :  { %v10865_v54 = vand.u32 4294901760, %v10846_v52  ;;  %26074 = vmatprep.subr.bf16.mxu0 %v28663_v9 }
 0xab0   :  { %v28681_v61 = vpack.c.bf16 %v10868_v27, %v10865_v54  ;;  %v28761_v11 = vsub.f32 %v10846_v52, %v10865_v54  ;;  %v10976_v52 = vsub.f32 %v28763_v12, %v30866_v7  ;;  %v11570_v54 = vsub.f32 %v28769_v16, %v11569_v22 }
 0xab1   :  { %v10982_v27 = vand.u32 4294901760, %v28780_v23 }
 0xab2   :  { %25982 = vmatprep.subr.bf16.mxu1 %v28681_v61  ;;  %v30867_v18 = vand.u32 4294901760, %v28761_v11  ;;  %v10977_v30 = vand.u32 4294901760, %v10976_v52  ;;  %v11571_v1 = vand.u32 4294901760, %v11570_v54  ;;  %v11596_v54 = vsub.f32 %v28731_v48, %v11474_v0 }
 0xab3   :  { %25984 = vmatpush3.bf16.msra.mxu1 %v28681_v61  ;;  %v10983_v4 = vsub.f32 %v28780_v23, %v10982_v27  ;;  %v28819_v48 = vpack.c.bf16 %v28725_v44, %v28710_v39  ;;  %v28823_v0 = vpack.c.bf16 %v28763_v12, %v28761_v11 }
 0xab4   :  { %23911 = vmatmul.mubr.f32.vlgmr.msra.gmra.mrb[28].mxu0 %v10445_v14  ;;  %25986 = vmatprep.subr.bf16.mxu1 %v28704_v36  ;;  %v28765_v14 = vsub.f32 %v21397_v2, %v11459_v29  ;;  %v10969_v25 = vsub.f32 %v28761_v11, %v30867_v18  ;;  %v10988_v2 = vsub.f32 %v10849_v31, %v10874_v13 }
 0xab5   :  { %26076 = vmatpush3.bf16.msra.mxu0 %v28663_v9  ;;  %v11582_v29 = vsub.f32 %v21400_v34, %v11468_v35  ;;  %v10984_v3 = vand.u32 4294901760, %v10983_v4  ;;  %v11003_v35 = vand.u32 4294901760, %v11002_v6 }
 0xab6   :  { %26078 = vmatprep.subr.bf16.mxu0 %v28683_v24  ;;  %v30865_v19 = vand.u32 4294901760, %v28765_v14  ;;  %v10970_v58 = vand.u32 4294901760, %v10969_v25  ;;  %v10989_v62 = vand.u32 4294901760, %v10988_v2  ;;  %v11589_v25 = vsub.f32 %v28723_v43, %v11471_v49 }
 0xab7   :  { %25988 = vmatpush3.bf16.msra.mxu1 %v28704_v36  ;;  %v11583_v31 = vand.u32 4294901760, %v11582_v29  ;;  %v11004_v42 = vsub.f32 %v11002_v6, %v11003_v35 }
 0xab8   :  { %25990 = vmatprep.subr.bf16.mxu1 %v28742_v46  ;;  %v11563_v60 = vsub.f32 %v28765_v14, %v30865_v19  ;;  %v28797_v13 = vpack.c.bf16 %v10977_v30, %v10970_v58  ;;  %v10990_v10 = vsub.f32 %v10988_v2, %v10989_v62  ;;  %v11577_v19 = vsub.f32 %v11575_v28, %v11576_v5 }
 0xab9   :  { %26080 = vmatpush3.bf16.msra.mxu0 %v28683_v24  ;;  %v11584_v32 = vsub.f32 %v11582_v29, %v11583_v31  ;;  %v11590_v45 = vand.u32 4294901760, %v11589_v25  ;;  %v11597_v30 = vand.u32 4294901760, %v11596_v54 }
 0xaba   :  { %26082 = vmatprep.subr.bf16.mxu0 %v28712_v40  ;;  %v11564_v33 = vand.u32 4294901760, %v11563_v60  ;;  %v10991_v34 = vand.u32 4294901760, %v10990_v10  ;;  %v11578_v52 = vand.u32 4294901760, %v11577_v19 }
 0xabb   :  { %25992 = vmatpush3.bf16.msra.mxu1 %v28742_v46  ;;  %v11585_v60 = vand.u32 4294901760, %v11584_v32  ;;  %v11591_v4 = vsub.f32 %v11589_v25, %v11590_v45  ;;  %v11598_v7 = vsub.f32 %v11596_v54, %v11597_v30  ;;  %v28832_v32 = vpack.c.bf16 %v11582_v29, %v11575_v28 }
 0xabc   :  { %25994 = vmatprep.subr.bf16.mxu1 %v28775_v20  ;;  %v28799_v8 = vpack.c.bf16 %v11571_v1, %v11564_v33  ;;  %v28805_v58 = vpack.c.bf16 %v10991_v34, %v10984_v3  ;;  %v10998_v33 = vand.u32 4294901760, %v10997_v41  ;;  %v11005_v1 = vand.u32 4294901760, %v11004_v42 }
 0xabd   :  { %26084 = vmatpush3.bf16.msra.mxu0 %v28712_v40  ;;  %v28807_v47 = vpack.c.bf16 %v11585_v60, %v11578_v52  ;;  %v11592_v43 = vand.u32 4294901760, %v11591_v4  ;;  %v11599_v49 = vand.u32 4294901760, %v11598_v7  ;;  %v28815_v3 = vpack.c.bf16 %v28708_v38, %v28706_v37 }
 0xabe   :  { %26086 = vmatprep.subr.bf16.mxu0 %v28749_v63  ;;  %v28809_v59 = vpack.c.bf16 %v11005_v1, %v10998_v33  ;;  %v28830_v7 = vpack.c.bf16 %v10988_v2, %v28780_v23  ;;  %v28834_v34 = vpack.c.bf16 %v11002_v6, %v10995_v15  ;;  %v28836_v52 = vpack.c.bf16 %v11596_v54, %v11589_v25 }
 0xabf   :  { %v28811_v19 = vpack.c.bf16 %v11599_v49, %v11592_v43  ;;  %v28842_v60 = vpack.c.bf16 %v10961_v55, %v10954_v50  ;;  %v30905_v23 = vand.u32 4294901760, %v28761_v11  ;;  %v30906_v2 = vand.u32 4294901760, %v28763_v12  ;;  %v21389_v11 = vld [vmem:[%s30844_s13] ss:$0 sm:$0xff] }
 0xac0   :  { %v30907_v29 = vand.u32 4294901760, %v28765_v14  ;;  %v28860_v37 = vpack.c.bf16 %v10989_v62, %v10982_v27  ;;  %v28862_v38 = vpack.c.bf16 %v11583_v31, %v11576_v5  ;;  %v28864_v50 = vpack.c.bf16 %v11003_v35, %v10996_v17  ;;  %v21390_v5 = vld [vmem:[%s30845_s14] ss:$0 sm:$0xff] }
 0xac1   :  { %26088 = vmatpush3.bf16.msra.mxu0 %v28749_v63  ;;  %v28854_v28 = vpack.c.bf16 %v30906_v2, %v30905_v23  ;;  %v28866_v39 = vpack.c.bf16 %v11597_v30, %v11590_v45  ;;  %v21411_v49 = vld [vmem:[%s30843_s17 + $0xa0] sm:$0xff] }
 0xac2   :  { %26090 = vmatprep.subr.bf16.mxu0 %v28777_v21  ;;  %v28858_v15 = vpack.c.bf16 %v11569_v22, %v30907_v29 }
 0xb24   :  { %v10358_v10 = vpop.f32.mrb[42].mxu1 }
 0xb25   :  { %v23882_v18 = vpop.f32.mrb[43].mxu1 }
 0xb26   :  { %v28827_v18 = vpack.c.bf16 %v28769_v16, %v28765_v14  ;;  %v30904_v16 = vand.u32 4294901760, %v28725_v44  ;;  %v10365_v44 = vrot.slane %v10358_v10, %v28231_v57 }
 0xb28   :  { %v28848_v41 = vpack.c.bf16 %v30904_v16, %v11548_v56  ;;  %v10366_v55 = vsub.f32 %v28478_v53, %v10365_v44  ;;  %v10367_v56 = vsub.f32 %v28476_v51, %v10365_v44 }
 0xb2a   :  { %v10374_v14 = vmul.f32 %v21389_v11, %v10366_v55  ;;  %v10375_v22 = vmul.f32 %v21389_v11, %v10367_v56 }
 0xb87   :  { %v10821_v12 = vpop.f32.mrb[28].mxu0 }
 0xb88   :  { %v10828_v27 = vrot.slane %v10821_v12, %v28231_v57  ;;  %v23912_v62 = vpop.f32.mrb[29].mxu0 }
 0xb8a   :  { %v10829_v31 = vmul.f32 %v10828_v27, %v10374_v14  ;;  %v10830_v6 = vmul.f32 %v10828_v27, %v10375_v22 }
 0xb8c   :  { %v10838_v17 = vadd.f32 %v21390_v5, %v10829_v31  ;;  %v10839_v53 = vadd.f32 %v21390_v5, %v10830_v6 }
 0xb8e   :  { %v10853_v51 = vsel %vm8710_vm7, %v10838_v17, 0  ;;  %v10856_v35 = vsel %vm8710_vm7, %v10839_v53, 0 }
 0xb8f   :  { %v28880_v25 = vand.u32 4294901760, %v10853_v51  ;;  %v28882_v54 = vand.u32 4294901760, %v10856_v35 }
 0xb91   :  { %v28885_v42 = vsub.f32 %v10853_v51, %v28880_v25  ;;  %v28888_v45 = vsub.f32 %v10856_v35, %v28882_v54 }
 0xb93   :  { %v28891_v30 = vand.u32 4294901760, %v28885_v42  ;;  %v28894_v33 = vand.u32 4294901760, %v28888_v45 }
 0xb95   :  { %v10934_v1 = vsub.f32 %v28885_v42, %v28891_v30  ;;  %v10944_v4 = vsub.f32 %v28888_v45, %v28894_v33 }
 0xb97   :  { %v28900_v10 = vand.u32 4294901760, %v10934_v1  ;;  %v28902_v43 = vand.u32 4294901760, %v10944_v4 }
 0xb99   :  { %23929 = vmatprep.mubr.f32.mxu1 %v28900_v10  ;;  %24043 = vmatprep.mubr.f32.mxu0 %v28900_v10 }
 0xb9a   :  { %23930 = vmatmul.mubr.f32.vlgmr.msra.gmra.mrb[44].mxu1 %v28902_v43  ;;  %24044 = vmatmul.mubr.f32.vlgmr.msra.gmra.mrb[30].mxu0 %v28902_v43 }
 0xb9b   :  { %25996 = vmatpush3.bf16.msra.mxu1 %v28775_v20  ;;  %26092 = vmatpush3.bf16.msra.mxu0 %v28777_v21  ;;  %v21408_v20 = vld [vmem:[%s30843_s17 + $0x88] sm:$0xff]  ;;  %v21409_v21 = vld [vmem:[%s30843_s17 + $0x90] sm:$0xff] }
 0xb9c   :  { %23948 = vmatprep.mubr.f32.mxu1 %v28880_v25  ;;  %24062 = vmatprep.mubr.f32.mxu0 %v28880_v25 }
 0xb9d   :  { %25998 = vmatprep.subr.bf16.mxu1 %v28797_v13  ;;  %26094 = vmatprep.subr.bf16.mxu0 %v28799_v8 }
 0xb9f   :  { %26000 = vmatpush3.bf16.msra.mxu1 %v28797_v13  ;;  %26096 = vmatpush3.bf16.msra.mxu0 %v28799_v8  ;;  %v21410_v13 = vld [vmem:[%s30843_s17 + $0x98] sm:$0xff] }
 0xba0   :  { %26002 = vmatprep.subr.bf16.mxu1 %v28805_v58  ;;  %26098 = vmatprep.subr.bf16.mxu0 %v28807_v47 }
 0xba3   :  { %26004 = vmatpush3.bf16.msra.mxu1 %v28805_v58  ;;  %26100 = vmatpush3.bf16.msra.mxu0 %v28807_v47  ;;  %v13253_v58 = vand.u32 4294901760, %v21409_v21  ;;  %v13256_v47 = vand.u32 4294901760, %v21410_v13 }
 0xba4   :  { %26006 = vmatprep.subr.bf16.mxu1 %v28809_v59  ;;  %26102 = vmatprep.subr.bf16.mxu0 %v28811_v19 }
 0xba7   :  { %26008 = vmatpush3.bf16.msra.mxu1 %v28809_v59  ;;  %26104 = vmatpush3.bf16.msra.mxu0 %v28811_v19  ;;  %v21407_v59 = vld [vmem:[%s30843_s17 + $0x80] sm:$0xff]  ;;  %v21414_v19 = vld [vmem:[%s30843_s17 + $0xb8] sm:$0xff] }
 0xba8   :  { %26010 = vmatprep.subr.bf16.mxu1 %v28815_v3  ;;  %26106 = vmatprep.subr.bf16.mxu0 %v28819_v48 }
 0xbaa   :  { %23949 = vmatmul.mubr.f32.vlgmr.msra.gmra.mrb[44].mxu1 %v28882_v54  ;;  %24063 = vmatmul.mubr.f32.vlgmr.msra.gmra.mrb[30].mxu0 %v28882_v54 }
 0xbab   :  { %26012 = vmatpush3.bf16.msra.mxu1 %v28815_v3  ;;  %23967 = vmatprep.mubr.f32.mxu1 %v28885_v42 }
 0xbac   :  { %26108 = vmatpush3.bf16.msra.mxu0 %v28819_v48  ;;  %24081 = vmatprep.mubr.f32.mxu0 %v28885_v42 }
 0xbad   :  { %26014 = vmatprep.subr.bf16.mxu1 %v28823_v0  ;;  %26110 = vmatprep.subr.bf16.mxu0 %v28827_v18 }
 0xbaf   :  { %26016 = vmatpush3.bf16.msra.mxu1 %v28823_v0  ;;  %v29036_v0 = vsub.f32 %v21409_v21, %v13253_v58 }
 0xbb0   :  { %26112 = vmatpush3.bf16.msra.mxu0 %v28827_v18  ;;  %26018 = vmatprep.subr.bf16.mxu1 %v28830_v7  ;;  %v29038_v18 = vsub.f32 %v21410_v13, %v13256_v47 }
 0xbb1   :  { %26114 = vmatprep.subr.bf16.mxu0 %v28832_v32  ;;  %v13356_v16 = vand.u32 4294901760, %v29036_v0 }
 0xbb3   :  { %26020 = vmatpush3.bf16.msra.mxu1 %v28830_v7 }
 0xbb4   :  { %26116 = vmatpush3.bf16.msra.mxu0 %v28832_v32  ;;  %26022 = vmatprep.subr.bf16.mxu1 %v28834_v34 }
 0xbb5   :  { %26118 = vmatprep.subr.bf16.mxu0 %v28836_v52 }
 0xbb7   :  { %26024 = vmatpush3.bf16.msra.mxu1 %v28834_v34  ;;  %v13268_v34 = vand.u32 4294901760, %v21414_v19 }
 0xbb8   :  { %26120 = vmatpush3.bf16.msra.mxu0 %v28836_v52  ;;  %26026 = vmatprep.subr.bf16.mxu1 %v28661_v26 }
 0xbb9   :  { %26122 = vmatprep.subr.bf16.mxu0 %v28663_v9  ;;  %v29076_v56 = vsub.f32 %v21414_v19, %v13268_v34 }
 0xbba   :  { %23968 = vmatmul.mubr.f32.vlgmr.msra.gmra.mrb[44].mxu1 %v28888_v45 }
 0xbbb   :  { %24082 = vmatmul.mubr.f32.vlgmr.msra.gmra.mrb[30].mxu0 %v28888_v45  ;;  %26028 = vmatpush3.bf16.msra.mxu1 %v28661_v26  ;;  %v13391_v5 = vand.u32 4294901760, %v29076_v56 }
 0xbbc   :  { %23986 = vmatprep.mubr.f32.mxu1 %v28891_v30  ;;  %26124 = vmatpush3.bf16.msra.mxu0 %v28663_v9 }
 0xbbd   :  { %24100 = vmatprep.mubr.f32.mxu0 %v28891_v30  ;;  %26030 = vmatprep.subr.bf16.mxu1 %v28681_v61  ;;  %v13392_v51 = vsub.f32 %v29076_v56, %v13391_v5 }
 0xbbe   :  { %26126 = vmatprep.subr.bf16.mxu0 %v28683_v24 }
 0xbbf   :  { %26032 = vmatpush3.bf16.msra.mxu1 %v28681_v61  ;;  %v13393_v4 = vand.u32 4294901760, %v13392_v51 }
 0xbc0   :  { %26128 = vmatpush3.bf16.msra.mxu0 %v28683_v24  ;;  %26034 = vmatprep.subr.bf16.mxu1 %v28704_v36 }
 0xbc1   :  { %26130 = vmatprep.subr.bf16.mxu0 %v28712_v40 }
 0xbc3   :  { %26036 = vmatpush3.bf16.msra.mxu1 %v28704_v36 }
 0xbc4   :  { %26132 = vmatpush3.bf16.msra.mxu0 %v28712_v40  ;;  %26038 = vmatprep.subr.bf16.mxu1 %v28742_v46 }
 0xbc5   :  { %26134 = vmatprep.subr.bf16.mxu0 %v28749_v63 }
 0xbc7   :  { %26040 = vmatpush3.bf16.msra.mxu1 %v28742_v46 }
 0xbc8   :  { %26136 = vmatpush3.bf16.msra.mxu0 %v28749_v63  ;;  %26042 = vmatprep.subr.bf16.mxu1 %v28842_v60 }
 0xbc9   :  { %26138 = vmatprep.subr.bf16.mxu0 %v28848_v41 }
 0xbca   :  { %23987 = vmatmul.mubr.f32.vlgmr.msra.gmra.mrb[44].mxu1 %v28894_v33 }
 0xbcb   :  { %24101 = vmatmul.mubr.f32.vlgmr.msra.gmra.mrb[30].mxu0 %v28894_v33  ;;  %26044 = vmatpush3.bf16.msra.mxu1 %v28842_v60 }
 0xbcc   :  { %24005 = vmatprep.mubr.f32.mxu1 %v28880_v25  ;;  %26140 = vmatpush3.bf16.msra.mxu0 %v28848_v41  ;;  %v13363_v41 = vand.u32 4294901760, %v29038_v18 }
 0xbcd   :  { %24119 = vmatprep.mubr.f32.mxu0 %v28880_v25  ;;  %26046 = vmatprep.subr.bf16.mxu1 %v28854_v28 }
 0xbce   :  { %26142 = vmatprep.subr.bf16.mxu0 %v28858_v15 }
 0xbcf   :  { %26048 = vmatpush3.bf16.msra.mxu1 %v28854_v28 }
 0xbd0   :  { %26144 = vmatpush3.bf16.msra.mxu0 %v28858_v15  ;;  %26050 = vmatprep.subr.bf16.mxu1 %v28860_v37 }
 0xbd1   :  { %26146 = vmatprep.subr.bf16.mxu0 %v28862_v38 }
 0xbd3   :  { %26052 = vmatpush3.bf16.msra.mxu1 %v28860_v37 }
 0xbd4   :  { %26148 = vmatpush3.bf16.msra.mxu0 %v28862_v38  ;;  %26054 = vmatprep.subr.bf16.mxu1 %v28864_v50  ;;  %v13357_v38 = vsub.f32 %v29036_v0, %v13356_v16 }
 0xbd5   :  { %26150 = vmatprep.subr.bf16.mxu0 %v28866_v39 }
 0xbd6   :  { %v13358_v12 = vand.u32 4294901760, %v13357_v38 }
 0xbd7   :  { %26056 = vmatpush3.bf16.msra.mxu1 %v28864_v50  ;;  %v13364_v50 = vsub.f32 %v29038_v18, %v13363_v41 }
 0xbd8   :  { %26152 = vmatpush3.bf16.msra.mxu0 %v28866_v39  ;;  %26058 = vmatprep.subr.bf16.mxu1 %v28661_v26 }
 0xbd9   :  { %26154 = vmatprep.subr.bf16.mxu0 %v28663_v9  ;;  %v13365_v14 = vand.u32 4294901760, %v13364_v50 }
 0xbda   :  { %24006 = vmatmul.mubr.f32.vlgmr.msra.gmra.mrb[44].mxu1 %v28882_v54 }
 0xbdb   :  { %24120 = vmatmul.mubr.f32.vlgmr.msra.gmra.mrb[30].mxu0 %v28882_v54  ;;  %26060 = vmatpush3.bf16.msra.mxu1 %v28661_v26  ;;  %v13247_v26 = vand.u32 4294901760, %v21407_v59  ;;  %v26237_v31 = vpack.c.bf16 %v13365_v14, %v13358_v12 }
 0xbdc   :  { %24024 = vmatprep.mubr.f32.mxu1 %v28880_v25  ;;  %26156 = vmatpush3.bf16.msra.mxu0 %v28663_v9  ;;  %v13250_v9 = vand.u32 4294901760, %v21408_v20 }
 0xbdd   :  { %24138 = vmatprep.mubr.f32.mxu0 %v28880_v25  ;;  %26062 = vmatprep.subr.bf16.mxu1 %v28681_v61 }
 0xbde   :  { %26158 = vmatprep.subr.bf16.mxu0 %v28683_v24  ;;  %v29018_v8 = vpack.c.bf16 %v13250_v9, %v13247_v26 }
 0xbdf   :  { %26064 = vmatpush3.bf16.msra.mxu1 %v28681_v61  ;;  %v29013_v61 = vsub.f32 %v21407_v59, %v13247_v26 }
 0xbe0   :  { %26160 = vmatpush3.bf16.msra.mxu0 %v28683_v24  ;;  %26066 = vmatprep.subr.bf16.mxu1 %v28704_v36  ;;  %v29015_v24 = vsub.f32 %v21408_v20, %v13250_v9 }
 0xbe1   :  { %26162 = vmatprep.subr.bf16.mxu0 %v28712_v40  ;;  %v13342_v3 = vand.u32 4294901760, %v29013_v61 }
 0xbe2   :  { %v13349_v48 = vand.u32 4294901760, %v29015_v24  ;;  %v26249_v59 = vpack.c.bf16 %v29015_v24, %v29013_v61 }
 0xbe3   :  { %26068 = vmatpush3.bf16.msra.mxu1 %v28704_v36  ;;  %v21412_v36 = vld [vmem:[%s30843_s17 + $0xa8] sm:$0xff]  ;;  %v13343_v52 = vsub.f32 %v29013_v61, %v13342_v3 }
 0xbe4   :  { %26164 = vmatpush3.bf16.msra.mxu0 %v28712_v40  ;;  %26070 = vmatprep.subr.bf16.mxu1 %v28742_v46  ;;  %v21413_v40 = vld [vmem:[%s30843_s17 + $0xb0] sm:$0xff]  ;;  %v13262_v7 = vand.u32 4294901760, %v21412_v36  ;;  %v13350_v60 = vsub.f32 %v29015_v24, %v13349_v48 }
 0xbe5   :  { %26166 = vmatprep.subr.bf16.mxu0 %v28749_v63  ;;  %v13265_v32 = vand.u32 4294901760, %v21413_v40  ;;  %v13344_v15 = vand.u32 4294901760, %v13343_v52 }
 0xbe6   :  { %v29060_v28 = vsub.f32 %v21412_v36, %v13262_v7  ;;  %v13351_v37 = vand.u32 4294901760, %v13350_v60 }
 0xbe7   :  { %26072 = vmatpush3.bf16.msra.mxu1 %v28742_v46  ;;  %v29041_v46 = vpack.c.bf16 %v13256_v47, %v13253_v58  ;;  %v29062_v29 = vpack.c.bf16 %v13268_v34, %v13265_v32  ;;  %v29074_v55 = vsub.f32 %v21413_v40, %v13265_v32  ;;  %v21392_v58 = vld [vmem:[%s30846_s18 + $0x28] sm:$0xff]  ;;  %v21393_v47 = vld [vmem:[%s30846_s18 + $0x30] sm:$0xff]  ;;  %v21394_v40 = vld [vmem:[%s30846_s18 + $0x38] sm:$0xff] }
 0xbe8   :  { %26168 = vmatpush3.bf16.msra.mxu0 %v28749_v63  ;;  %v13259_v63 = vand.u32 4294901760, %v21411_v49  ;;  %v13377_v44 = vand.u32 4294901760, %v29060_v28  ;;  %v26233_v11 = vpack.c.bf16 %v13351_v37, %v13344_v15  ;;  %v12039_v36 = vsel %vm96_vm0, %v21393_v47, 0 }
 0xbe9   :  { %26218 = vmatprep.subr.bf16.mxu0 %v29018_v8  ;;  %v13384_v62 = vand.u32 4294901760, %v29074_v55  ;;  %v26261_v26 = vpack.c.bf16 %v29076_v56, %v29074_v55 }
 0xbea   :  { %24025 = vmatmul.mubr.f32.vlgmr.msra.gmra.mrb[44].mxu1 %v28882_v54  ;;  %v29056_v23 = vpack.c.bf16 %v13262_v7, %v13259_v63  ;;  %v29058_v2 = vsub.f32 %v21411_v49, %v13259_v63  ;;  %v13378_v27 = vsub.f32 %v29060_v28, %v13377_v44  ;;  %v12036_v49 = vsel %vm96_vm0, %v21392_v58, 0 }
 0xbeb   :  { %24139 = vmatmul.mubr.f32.vlgmr.msra.gmra.mrb[30].mxu0 %v28882_v54  ;;  %v13385_v53 = vsub.f32 %v29074_v55, %v13384_v62  ;;  %v26293_v9 = vpack.c.bf16 %v13391_v5, %v13384_v62  ;;  %v29162_v19 = vand.u32 4294901760, %v12036_v49 }
 0xbec   :  { %26220 = vmatpush3.bf16.msra.mxu0 %v29018_v8  ;;  %24277 = vmatprep.mubr.f32.mxu0 %v28900_v10  ;;  %v13370_v39 = vand.u32 4294901760, %v29058_v2  ;;  %v13379_v17 = vand.u32 4294901760, %v13378_v27  ;;  %v26257_v20 = vpack.c.bf16 %v29060_v28, %v29058_v2 }
 0xbed   :  { %26222 = vmatprep.subr.bf16.mxu0 %v29041_v46  ;;  %v13386_v1 = vand.u32 4294901760, %v13385_v53 }
 0xbee   :  { %v13371_v22 = vsub.f32 %v29058_v2, %v13370_v39 }
 0xbef   :  { %v26245_v10 = vpack.c.bf16 %v13393_v4, %v13386_v1 }
 0xbf0   :  { %26224 = vmatpush3.bf16.msra.mxu0 %v29041_v46  ;;  %v13372_v6 = vand.u32 4294901760, %v13371_v22 }
 0xbf1   :  { %26226 = vmatprep.subr.bf16.mxu0 %v29056_v23 }
 0xbf2   :  { %v26241_v35 = vpack.c.bf16 %v13379_v17, %v13372_v6 }
 0xbf4   :  { %26228 = vmatpush3.bf16.msra.mxu0 %v29056_v23 }
 0xbf5   :  { %26230 = vmatprep.subr.bf16.mxu0 %v29062_v29 }
 0xbf8   :  { %26232 = vmatpush3.bf16.msra.mxu0 %v29062_v29 }
 0xbf9   :  { %26234 = vmatprep.subr.bf16.mxu0 %v26233_v11 }
 0xbfb   :  { %24278 = vmatmul.mubr.f32.vlgmr.msra.gmra.mrb[32].mxu0 %v28902_v43  ;;  %v26253_v43 = vpack.c.bf16 %v29038_v18, %v29036_v0 }
 0xbfc   :  { %26236 = vmatpush3.bf16.msra.mxu0 %v26233_v11  ;;  %24296 = vmatprep.mubr.f32.mxu0 %v28880_v25 }
 0xbfd   :  { %26238 = vmatprep.subr.bf16.mxu0 %v26237_v31 }
 0xc00   :  { %26240 = vmatpush3.bf16.msra.mxu0 %v26237_v31 }
 0xc01   :  { %26242 = vmatprep.subr.bf16.mxu0 %v26241_v35 }
 0xc04   :  { %26244 = vmatpush3.bf16.msra.mxu0 %v26241_v35 }
 0xc05   :  { %26246 = vmatprep.subr.bf16.mxu0 %v26245_v10 }
 0xc08   :  { %26248 = vmatpush3.bf16.msra.mxu0 %v26245_v10 }
 0xc09   :  { %26250 = vmatprep.subr.bf16.mxu0 %v26249_v59 }
 0xc0b   :  { %24297 = vmatmul.mubr.f32.vlgmr.msra.gmra.mrb[32].mxu0 %v28882_v54 }
 0xc0c   :  { %26252 = vmatpush3.bf16.msra.mxu0 %v26249_v59  ;;  %24315 = vmatprep.mubr.f32.mxu0 %v28885_v42  ;;  %v26281_v42 = vpack.c.bf16 %v13349_v48, %v13342_v3  ;;  %v29164_v3 = vand.u32 4294901760, %v12039_v36  ;;  %v29168_v48 = vsub.f32 %v12036_v49, %v29162_v19 }
 0xc0d   :  { %26254 = vmatprep.subr.bf16.mxu0 %v26253_v43 }
 0xc0e   :  { %v29173_v18 = vsub.f32 %v12039_v36, %v29164_v3 }
 0xc10   :  { %26256 = vmatpush3.bf16.msra.mxu0 %v26253_v43  ;;  %v12133_v32 = vand.u32 4294901760, %v29173_v18 }
 0xc11   :  { %26258 = vmatprep.subr.bf16.mxu0 %v26257_v20 }
 0xc14   :  { %26260 = vmatpush3.bf16.msra.mxu0 %v26257_v20 }
 0xc15   :  { %26262 = vmatprep.subr.bf16.mxu0 %v26261_v26 }
 0xc18   :  { %26264 = vmatpush3.bf16.msra.mxu0 %v26261_v26 }
 0xc19   :  { %26266 = vmatprep.subr.bf16.mxu0 %v29018_v8 }
 0xc1b   :  { %24316 = vmatmul.mubr.f32.vlgmr.msra.gmra.mrb[32].mxu0 %v28888_v45  ;;  %v26285_v45 = vpack.c.bf16 %v13363_v41, %v13356_v16 }
 0xc1c   :  { %26268 = vmatpush3.bf16.msra.mxu0 %v29018_v8  ;;  %24334 = vmatprep.mubr.f32.mxu0 %v28891_v30  ;;  %v26289_v30 = vpack.c.bf16 %v13377_v44, %v13370_v39  ;;  %v12134_v39 = vsub.f32 %v29173_v18, %v12133_v32 }
 0xc1d   :  { %26270 = vmatprep.subr.bf16.mxu0 %v29041_v46 }
 0xc1e   :  { %v12135_v53 = vand.u32 4294901760, %v12134_v39 }
 0xc20   :  { %26272 = vmatpush3.bf16.msra.mxu0 %v29041_v46 }
 0xc21   :  { %26274 = vmatprep.subr.bf16.mxu0 %v29056_v23 }
 0xc24   :  { %26276 = vmatpush3.bf16.msra.mxu0 %v29056_v23 }
 0xc25   :  { %26278 = vmatprep.subr.bf16.mxu0 %v29062_v29 }
 0xc28   :  { %26280 = vmatpush3.bf16.msra.mxu0 %v29062_v29 }
 0xc29   :  { %26282 = vmatprep.subr.bf16.mxu0 %v26281_v42 }
 0xc2b   :  { %24335 = vmatmul.mubr.f32.vlgmr.msra.gmra.mrb[32].mxu0 %v28894_v33  ;;  %v21391_v33 = vld [vmem:[%s30846_s18 + $0x20] sm:$0xff] }
 0xc2c   :  { %26284 = vmatpush3.bf16.msra.mxu0 %v26281_v42  ;;  %24353 = vmatprep.mubr.f32.mxu0 %v28880_v25  ;;  %v12033_v21 = vsel %vm96_vm0, %v21391_v33, 0  ;;  %v10842_v33 = vld [vmem:[%s30846_s18 + $0x10] sm:$0xff] }
 0xc2d   :  { %26286 = vmatprep.subr.bf16.mxu0 %v26285_v45  ;;  %v29136_v13 = vand.u32 4294901760, %v12033_v21 }
 0xc2f   :  { %v29140_v61 = vsub.f32 %v12033_v21, %v29136_v13 }
 0xc30   :  { %26288 = vmatpush3.bf16.msra.mxu0 %v26285_v45  ;;  %v10840_v45 = vld [vmem:[%s30846_s18] sm:$0xff] }
 0xc31   :  { %26290 = vmatprep.subr.bf16.mxu0 %v26289_v30  ;;  %v12113_v24 = vand.u32 4294901760, %v29140_v61 }
 0xc34   :  { %26292 = vmatpush3.bf16.msra.mxu0 %v26289_v30  ;;  %v12633_v30 = vsel %vm96_vm0, %v10840_v45, 0 }
 0xc35   :  { %26294 = vmatprep.subr.bf16.mxu0 %v26293_v9  ;;  %v29226_v21 = vand.u32 4294901760, %v12633_v30 }
 0xc37   :  { %v12712_v58 = vsub.f32 %v12633_v30, %v29226_v21 }
 0xc38   :  { %26296 = vmatpush3.bf16.msra.mxu0 %v26293_v9  ;;  %v10841_v9 = vld [vmem:[%s30846_s18 + $0x8] sm:$0xff] }
 0xc39   :  { %26298 = vmatprep.subr.bf16.mxu0 %v29018_v8 }
 0xc3b   :  { %24354 = vmatmul.mubr.f32.vlgmr.msra.gmra.mrb[32].mxu0 %v28882_v54 }
 0xc3c   :  { %26300 = vmatpush3.bf16.msra.mxu0 %v29018_v8  ;;  %24372 = vmatprep.mubr.f32.mxu0 %v28880_v25  ;;  %v12114_v25 = vsub.f32 %v29140_v61, %v12113_v24 }
 0xc3d   :  { %26302 = vmatprep.subr.bf16.mxu0 %v29041_v46 }
 0xc3e   :  { %v12115_v8 = vand.u32 4294901760, %v12114_v25  ;;  %v10843_v25 = vld [vmem:[%s30846_s18 + $0x18] sm:$0xff] }
 0xc3f   :  { %v12642_v49 = vsel %vm96_vm0, %v10843_v25, 0 }
 0xc40   :  { %26304 = vmatpush3.bf16.msra.mxu0 %v29041_v46  ;;  %24145 = vmatprep.mubr.f32.mxu1 %v12115_v8  ;;  %v12123_v46 = vand.u32 4294901760, %v29168_v48 }
 0xc41   :  { %26306 = vmatprep.subr.bf16.mxu0 %v29056_v23 }
 0xc42   :  { %v12124_v2 = vsub.f32 %v29168_v48, %v12123_v46 }
 0xc44   :  { %26308 = vmatpush3.bf16.msra.mxu0 %v29056_v23  ;;  %v12125_v14 = vand.u32 4294901760, %v12124_v2  ;;  %v21405_v2 = vld [vmem:[%s30846_s18 + $0x50] sm:$0xff] }
 0xc45   :  { %26310 = vmatprep.subr.bf16.mxu0 %v29062_v29 }
 0xc48   :  { %26312 = vmatpush3.bf16.msra.mxu0 %v29062_v29 }
 0xc4b   :  { %24373 = vmatmul.mubr.f32.vlgmr.msra.gmra.mrb[32].mxu0 %v28882_v54  ;;  %v12042_v54 = vsel %vm96_vm0, %v21394_v40, 0  ;;  %v29243_v40 = vand.u32 4294901760, %v12642_v49 }
 0xc4c   :  { %v29170_v0 = vand.u32 4294901760, %v12042_v54 }
 0xc4e   :  { %v29177_v63 = vsub.f32 %v12042_v54, %v29170_v0  ;;  %v12713_v54 = vand.u32 4294901760, %v12712_v58 }
 0xc50   :  { %v12143_v15 = vand.u32 4294901760, %v29177_v63 }
 0xc52   :  { %v12144_v5 = vsub.f32 %v29177_v63, %v12143_v15 }
 0xc54   :  { %v12145_v43 = vand.u32 4294901760, %v12144_v5 }
 0xcbd   :  { %v24026_v7 = vpop.f32.mrb[44].mxu1 }
 0xcbe   :  { %v12648_v34 = vand.u32 4294901760, %v24026_v7  ;;  %v24140_v52 = vpop.f32.mrb[30].mxu0  ;;  %v11428_v60 = vpop.f32.mrb[45].mxu1 }
 0xcbf   :  { %v12048_v16 = vand.u32 4294901760, %v24140_v52  ;;  %v12645_v41 = vand.u32 4294901760, %v11428_v60  ;;  %v12022_v23 = vpop.f32.mrb[31].mxu0 }
 0xcc0   :  { %v12760_v28 = vsub.f32 %v24026_v7, %v12648_v34  ;;  %v12045_v29 = vand.u32 4294901760, %v12022_v23 }
 0xcc1   :  { %v12160_v37 = vsub.f32 %v24140_v52, %v12048_v16  ;;  %v29184_v38 = vpack.c.bf16 %v12648_v34, %v12645_v41  ;;  %v12753_v50 = vsub.f32 %v11428_v60, %v12645_v41 }
 0xcc2   :  { %v12761_v44 = vand.u32 4294901760, %v12760_v28  ;;  %v29189_v55 = vpack.c.bf16 %v12048_v16, %v12045_v29  ;;  %v12153_v56 = vsub.f32 %v12022_v23, %v12045_v29 }
 0xcc3   :  { %v12161_v11 = vand.u32 4294901760, %v12160_v37  ;;  %v12754_v12 = vand.u32 4294901760, %v12753_v50  ;;  %v29191_v22 = vpack.c.bf16 %v12760_v28, %v12753_v50 }
 0xcc4   :  { %v12762_v27 = vsub.f32 %v12760_v28, %v12761_v44  ;;  %v12154_v62 = vand.u32 4294901760, %v12153_v56  ;;  %26170 = vmatprep.subr.bf16.mxu1 %v29189_v55  ;;  %v26177_v31 = vpack.c.bf16 %v12160_v37, %v12153_v56 }
 0xcc5   :  { %v12162_v6 = vsub.f32 %v12160_v37, %v12161_v11  ;;  %v12755_v17 = vsub.f32 %v12753_v50, %v12754_v12  ;;  %26172 = vmatpush3.bf16.msra.mxu1 %v29189_v55  ;;  %v29196_v51 = vpack.c.bf16 %v12761_v44, %v12754_v12  ;;  %v21406_v37 = vld [vmem:[%s30846_s18 + $0x58] sm:$0xff] }
 0xcc6   :  { %v12155_v35 = vsub.f32 %v12153_v56, %v12154_v62  ;;  %v26185_v1 = vpack.c.bf16 %v12161_v11, %v12154_v62  ;;  %v12763_v4 = vand.u32 4294901760, %v12762_v27 }
 0xcc7   :  { %v12163_v10 = vand.u32 4294901760, %v12162_v6  ;;  %v12756_v59 = vand.u32 4294901760, %v12755_v17 }
 0xcc8   :  { %24146 = vmatmul.mubr.f32.vlgmr.msra.gmra.mrb[46].mxu1 %v12125_v14  ;;  %v12156_v20 = vand.u32 4294901760, %v12155_v35 }
 0xcc9   :  { %24148 = vmatprep.mubr.f32.mxu1 %v12135_v53  ;;  %v29198_v26 = vpack.c.bf16 %v12763_v4, %v12756_v59 }
 0xcca   :  { %v26173_v42 = vpack.c.bf16 %v12163_v10, %v12156_v20 }
 0xccc   :  { %24149 = vmatmul.mubr.f32.gmra.mrb[48].mxu1 %v12145_v43  ;;  %26174 = vmatprep.subr.bf16.mxu1 %v26173_v42 }
 0xccd   :  { %26176 = vmatpush3.bf16.msra.mxu1 %v26173_v42  ;;  %24155 = vmatprep.mubr.f32.mxu1 %v29136_v13 }
 0xcce   :  { %26178 = vmatprep.subr.bf16.mxu1 %v26177_v31 }
 0xcd0   :  { %24156 = vmatmul.mubr.f32.vlgmr.msra.gmra.mrb[46].mxu1 %v29162_v19 }
 0xcd1   :  { %26180 = vmatpush3.bf16.msra.mxu1 %v26177_v31  ;;  %24158 = vmatprep.mubr.f32.mxu1 %v29164_v3 }
 0xcd2   :  { %26182 = vmatprep.subr.bf16.mxu1 %v29189_v55 }
 0xcd4   :  { %24159 = vmatmul.mubr.f32.gmra.mrb[48].mxu1 %v29170_v0 }
 0xcd5   :  { %24165 = vmatprep.mubr.f32.mxu1 %v29140_v61  ;;  %v12636_v61 = vsel %vm96_vm0, %v10841_v9, 0 }
 0xcd6   :  { %v29234_v8 = vand.u32 4294901760, %v12636_v61 }
 0xcd8   :  { %24166 = vmatmul.mubr.f32.vlgmr.msra.gmra.mrb[46].mxu1 %v29168_v48  ;;  %v12722_v36 = vsub.f32 %v12636_v61, %v29234_v8 }
 0xcd9   :  { %26184 = vmatpush3.bf16.msra.mxu1 %v29189_v55  ;;  %24168 = vmatprep.mubr.f32.mxu1 %v29173_v18 }
 0xcda   :  { %26186 = vmatprep.subr.bf16.mxu1 %v26185_v1  ;;  %v12723_v18 = vand.u32 4294901760, %v12722_v36 }
 0xcdc   :  { %24169 = vmatmul.mubr.f32.gmra.mrb[48].mxu1 %v29177_v63  ;;  %v12714_v63 = vsub.f32 %v12712_v58, %v12713_v54 }
 0xcdd   :  { %24175 = vmatprep.mubr.f32.mxu1 %v12113_v24  ;;  %v12639_v24 = vsel %vm96_vm0, %v10842_v33, 0 }
 0xcde   :  { %v29238_v47 = vand.u32 4294901760, %v12639_v24  ;;  %v12715_v52 = vand.u32 4294901760, %v12714_v63 }
 0xce0   :  { %24176 = vmatmul.mubr.f32.vlgmr.msra.gmra.mrb[46].mxu1 %v12123_v46  ;;  %v12732_v48 = vsub.f32 %v12639_v24, %v29238_v47  ;;  %v12742_v46 = vsub.f32 %v12642_v49, %v29243_v40 }
 0xce1   :  { %26188 = vmatpush3.bf16.msra.mxu1 %v26185_v1  ;;  %24178 = vmatprep.mubr.f32.mxu1 %v12133_v32  ;;  %v12724_v32 = vsub.f32 %v12722_v36, %v12723_v18 }
 0xce2   :  { %26190 = vmatprep.subr.bf16.mxu1 %v29189_v55  ;;  %v12733_v7 = vand.u32 4294901760, %v12732_v48  ;;  %v12743_v34 = vand.u32 4294901760, %v12742_v46 }
 0xce3   :  { %v12725_v16 = vand.u32 4294901760, %v12724_v32  ;;  %v14450_v32 = vld [vmem:[%s30847_s22 + $0x28] sm:$0xff] }
 0xce4   :  { %24179 = vmatmul.mubr.f32.gmra.mrb[48].mxu1 %v12143_v15  ;;  %v12734_v60 = vsub.f32 %v12732_v48, %v12733_v7  ;;  %v12744_v41 = vsub.f32 %v12742_v46, %v12743_v34  ;;  %v13833_v15 = vsel %vm96_vm0, %v21405_v2, 0 }
 0xce5   :  { %24185 = vmatprep.mubr.f32.mxu1 %v29136_v13  ;;  %v29292_v44 = vand.u32 4294901760, %v13833_v15 }
 0xce6   :  { %v12745_v23 = vand.u32 4294901760, %v12744_v41 }
 0xce7   :  { %v13926_v14 = vsub.f32 %v13833_v15, %v29292_v44 }
 0xce8   :  { %24186 = vmatmul.mubr.f32.vlgmr.msra.gmra.mrb[46].mxu1 %v29162_v19 }
 0xce9   :  { %26192 = vmatpush3.bf16.msra.mxu1 %v29189_v55  ;;  %24188 = vmatprep.mubr.f32.mxu1 %v29164_v3  ;;  %v13836_v55 = vsel %vm96_vm0, %v21406_v37, 0  ;;  %v13927_v5 = vand.u32 4294901760, %v13926_v14 }
 0xcea   :  { %26194 = vmatprep.subr.bf16.mxu1 %v29184_v38  ;;  %v29297_v11 = vand.u32 4294901760, %v13836_v55 }
 0xceb   :  { %v13928_v4 = vsub.f32 %v13926_v14, %v13927_v5 }
 0xcec   :  { %24189 = vmatmul.mubr.f32.gmra.mrb[48].mxu1 %v29170_v0  ;;  %v13936_v27 = vsub.f32 %v13836_v55, %v29297_v11 }
 0xced   :  { %24195 = vmatprep.mubr.f32.mxu1 %v29136_v13  ;;  %v12735_v13 = vand.u32 4294901760, %v12734_v60  ;;  %v13929_v9 = vand.u32 4294901760, %v13928_v4 }
 0xcf0   :  { %24196 = vmatmul.mubr.f32.vlgmr.msra.gmra.mrb[46].mxu1 %v29162_v19  ;;  %v21403_v19 = vld [vmem:[%s30846_s18 + $0x40] sm:$0xff] }
 0xcf1   :  { %26196 = vmatpush3.bf16.msra.mxu1 %v29184_v38  ;;  %24198 = vmatprep.mubr.f32.mxu1 %v29164_v3  ;;  %v13827_v3 = vsel %vm96_vm0, %v21403_v19, 0 }
 0xcf2   :  { %26198 = vmatprep.subr.bf16.mxu1 %v29198_v26  ;;  %v29278_v28 = vand.u32 4294901760, %v13827_v3 }
 0xcf4   :  { %24199 = vmatmul.mubr.f32.gmra.mrb[48].mxu1 %v29170_v0  ;;  %v21404_v0 = vld [vmem:[%s30846_s18 + $0x48] sm:$0xff]  ;;  %v29290_v39 = vsub.f32 %v13827_v3, %v29278_v28 }
 0xcf5   :  { %24205 = vmatprep.mubr.f32.mxu1 %v12715_v52  ;;  %v13830_v29 = vsel %vm96_vm0, %v21404_v0, 0  ;;  %v14481_v52 = vand.u32 4294901760, %v14450_v32 }
 0xcf6   :  { %v29286_v50 = vand.u32 4294901760, %v13830_v29  ;;  %v13907_v12 = vand.u32 4294901760, %v29290_v39 }
 0xcf8   :  { %24206 = vmatmul.mubr.f32.vlgmr.msra.gmra.mrb[46].mxu1 %v12725_v16  ;;  %v13916_v56 = vsub.f32 %v13830_v29, %v29286_v50  ;;  %v13908_v62 = vsub.f32 %v29290_v39, %v13907_v12 }
 0xcf9   :  { %26200 = vmatpush3.bf16.msra.mxu1 %v29198_v26  ;;  %24208 = vmatprep.mubr.f32.mxu1 %v12735_v13  ;;  %v14451_v13 = vld [vmem:[%s30847_s22 + $0x30] sm:$0xff] }
 0xcfa   :  { %26202 = vmatprep.subr.bf16.mxu1 %v29191_v22  ;;  %v13909_v1 = vand.u32 4294901760, %v13908_v62  ;;  %v14484_v19 = vand.u32 4294901760, %v14451_v13 }
 0xcfc   :  { %24209 = vmatmul.mubr.f32.gmra.mrb[48].mxu1 %v12745_v23  ;;  %v14452_v23 = vld [vmem:[%s30847_s22 + $0x38] sm:$0xff] }
 0xcfd   :  { %24215 = vmatprep.mubr.f32.mxu1 %v29226_v21  ;;  %v14487_v3 = vand.u32 4294901760, %v14452_v23 }
 0xd00   :  { %24216 = vmatmul.mubr.f32.vlgmr.msra.gmra.mrb[46].mxu1 %v29234_v8 }
 0xd01   :  { %26204 = vmatpush3.bf16.msra.mxu1 %v29191_v22  ;;  %24218 = vmatprep.mubr.f32.mxu1 %v29238_v47  ;;  %v13917_v22 = vand.u32 4294901760, %v13916_v56 }
 0xd02   :  { %26206 = vmatprep.subr.bf16.mxu1 %v29184_v38 }
 0xd03   :  { %v13918_v53 = vsub.f32 %v13916_v56, %v13917_v22 }
 0xd04   :  { %24219 = vmatmul.mubr.f32.gmra.mrb[48].mxu1 %v29243_v40 }
 0xd05   :  { %24225 = vmatprep.mubr.f32.mxu1 %v12712_v58  ;;  %v13919_v26 = vand.u32 4294901760, %v13918_v53  ;;  %v14445_v58 = vld [vmem:[%s30847_s22] sm:$0xff]  ;;  %v14622_v53 = vsub.f32 %v14451_v13, %v14484_v19 }
 0xd06   :  { %v14466_v49 = vand.u32 4294901760, %v14445_v58 }
 0xd07   :  { %v14623_v4 = vand.u32 4294901760, %v14622_v53 }
 0xd08   :  { %24226 = vmatmul.mubr.f32.vlgmr.msra.gmra.mrb[46].mxu1 %v12722_v36  ;;  %v14580_v16 = vsub.f32 %v14445_v58, %v14466_v49 }
 0xd09   :  { %26208 = vmatpush3.bf16.msra.mxu1 %v29184_v38  ;;  %24228 = vmatprep.mubr.f32.mxu1 %v12732_v48  ;;  %v14448_v48 = vld [vmem:[%s30847_s22 + $0x18] sm:$0xff] }
 0xd0a   :  { %26210 = vmatprep.subr.bf16.mxu1 %v29196_v51  ;;  %v14581_v0 = vand.u32 4294901760, %v14580_v16 }
 0xd0c   :  { %24229 = vmatmul.mubr.f32.gmra.mrb[48].mxu1 %v12742_v46  ;;  %v14475_v46 = vand.u32 4294901760, %v14448_v48  ;;  %v14582_v29 = vsub.f32 %v14580_v16, %v14581_v0 }
 0xd0d   :  { %24235 = vmatprep.mubr.f32.mxu1 %v12713_v54  ;;  %v14447_v54 = vld [vmem:[%s30847_s22 + $0x10] sm:$0xff] }
 0xd0e   :  { %v14583_v37 = vand.u32 4294901760, %v14582_v29 }
 0xd10   :  { %24236 = vmatmul.mubr.f32.vlgmr.msra.gmra.mrb[46].mxu1 %v12723_v18  ;;  %v14472_v18 = vand.u32 4294901760, %v14447_v54 }
 0xd11   :  { %26212 = vmatpush3.bf16.msra.mxu1 %v29196_v51  ;;  %24238 = vmatprep.mubr.f32.mxu1 %v12733_v7  ;;  %v13937_v51 = vand.u32 4294901760, %v13936_v27  ;;  %v14449_v7 = vld [vmem:[%s30847_s22 + $0x20] sm:$0xff] }
 0xd12   :  { %26214 = vmatprep.subr.bf16.mxu1 %v29184_v38  ;;  %v29341_v63 = vpack.c.bf16 %v14475_v46, %v14472_v18 }
 0xd13   :  { %v13938_v42 = vsub.f32 %v13936_v27, %v13937_v51 }
 0xd14   :  { %24239 = vmatmul.mubr.f32.gmra.mrb[48].mxu1 %v12743_v34  ;;  %v14478_v34 = vand.u32 4294901760, %v14449_v7 }
 0xd15   :  { %24245 = vmatprep.mubr.f32.mxu1 %v29226_v21  ;;  %v13939_v24 = vand.u32 4294901760, %v13938_v42 }
 0xd16   :  { %v29353_v60 = vpack.c.bf16 %v14481_v52, %v14478_v34 }
 0xd18   :  { %24246 = vmatmul.mubr.f32.vlgmr.msra.gmra.mrb[46].mxu1 %v29234_v8 }
 0xd19   :  { %26216 = vmatpush3.bf16.msra.mxu1 %v29184_v38  ;;  %24248 = vmatprep.mubr.f32.mxu1 %v29238_v47 }
 0xd1c   :  { %24249 = vmatmul.mubr.f32.gmra.mrb[48].mxu1 %v29243_v40 }
 0xd1d   :  { %24255 = vmatprep.mubr.f32.mxu1 %v29226_v21 }
 0xd1e   :  { %v24374_v31 = vpop.f32.mrb[32].mxu0 }
 0xd1f   :  { %v13842_v6 = vand.u32 4294901760, %v24374_v31  ;;  %v13816_v17 = vpop.f32.mrb[33].mxu0 }
 0xd20   :  { %v13839_v38 = vand.u32 4294901760, %v13816_v17  ;;  %24256 = vmatmul.mubr.f32.vlgmr.msra.gmra.mrb[46].mxu1 %v29234_v8 }
 0xd21   :  { %v13954_v35 = vsub.f32 %v24374_v31, %v13842_v6  ;;  %24258 = vmatprep.mubr.f32.mxu1 %v29238_v47  ;;  %v14446_v47 = vld [vmem:[%s30847_s22 + $0x8] sm:$0xff] }
 0xd22   :  { %v26313_v10 = vpack.c.bf16 %v13842_v6, %v13839_v38  ;;  %v13947_v59 = vsub.f32 %v13816_v17, %v13839_v38  ;;  %v14469_v36 = vand.u32 4294901760, %v14446_v47 }
 0xd23   :  { %v13955_v43 = vand.u32 4294901760, %v13954_v35 }
 0xd24   :  { %v13948_v20 = vand.u32 4294901760, %v13947_v59  ;;  %24259 = vmatmul.mubr.f32.gmra.mrb[48].mxu1 %v29243_v40  ;;  %26314 = vmatprep.subr.bf16.mxu1 %v26313_v10  ;;  %v26321_v45 = vpack.c.bf16 %v13954_v35, %v13947_v59  ;;  %v29329_v40 = vpack.c.bf16 %v14469_v36, %v14466_v49  ;;  %v14587_v41 = vsub.f32 %v14446_v47, %v14469_v36  ;;  %v21415_v47 = vld [vmem:[%s30848_s19] ss:$0 sm:$0xff] }
 0xd25   :  { %v13956_v30 = vsub.f32 %v13954_v35, %v13955_v43  ;;  %26316 = vmatpush3.bf16.msra.mxu1 %v26313_v10  ;;  %24379 = vmatprep.mubr.f32.mxu1 %v13909_v1 }
 0xd26   :  { %v13949_v33 = vsub.f32 %v13947_v59, %v13948_v20  ;;  %v26329_v21 = vpack.c.bf16 %v13955_v43, %v13948_v20  ;;  %26338 = vmatprep.subr.bf16.mxu0 %v29329_v40  ;;  %v14588_v2 = vand.u32 4294901760, %v14587_v41  ;;  %v14624_v43 = vsub.f32 %v14622_v53, %v14623_v4 }
 0xd27   :  { %v13957_v61 = vand.u32 4294901760, %v13956_v30  ;;  %26340 = vmatpush3.bf16.msra.mxu0 %v29329_v40 }
 0xd28   :  { %24380 = vmatmul.mubr.f32.vlgmr.msra.gmra.mrb[46].mxu1 %v13919_v26  ;;  %v13950_v25 = vand.u32 4294901760, %v13949_v33  ;;  %26342 = vmatprep.subr.bf16.mxu0 %v29341_v63  ;;  %v14589_v15 = vsub.f32 %v14587_v41, %v14588_v2  ;;  %v14625_v42 = vand.u32 4294901760, %v14624_v43 }
 0xd29   :  { %24382 = vmatprep.mubr.f32.mxu1 %v13929_v9  ;;  %v29381_v9 = vpack.c.bf16 %v14587_v41, %v14580_v16 }
 0xd2a   :  { %v26317_v8 = vpack.c.bf16 %v13957_v61, %v13950_v25 }
 0xd2b   :  { %26344 = vmatpush3.bf16.msra.mxu0 %v29341_v63 }
 0xd2c   :  { %24383 = vmatmul.mubr.f32.gmra.mrb[48].mxu1 %v13939_v24  ;;  %26318 = vmatprep.subr.bf16.mxu1 %v26317_v8  ;;  %v29389_v24 = vpack.c.bf16 %v14588_v2, %v14581_v0 }
 0xd2d   :  { %26320 = vmatpush3.bf16.msra.mxu1 %v26317_v8  ;;  %24389 = vmatprep.mubr.f32.mxu1 %v29278_v28 }
 0xd2e   :  { %26322 = vmatprep.subr.bf16.mxu1 %v26321_v45  ;;  %26346 = vmatprep.subr.bf16.mxu0 %v29353_v60 }
 0xd2f   :  { %26348 = vmatpush3.bf16.msra.mxu0 %v29353_v60 }
 0xd30   :  { %24390 = vmatmul.mubr.f32.vlgmr.msra.gmra.mrb[46].mxu1 %v29286_v50 }
 0xd31   :  { %26324 = vmatpush3.bf16.msra.mxu1 %v26321_v45  ;;  %24392 = vmatprep.mubr.f32.mxu1 %v29292_v44 }
 0xd32   :  { %26326 = vmatprep.subr.bf16.mxu1 %v26313_v10 }
 0xd34   :  { %24393 = vmatmul.mubr.f32.gmra.mrb[48].mxu1 %v29297_v11 }
 0xd35   :  { %24399 = vmatprep.mubr.f32.mxu1 %v29290_v39  ;;  %v14594_v39 = vsub.f32 %v14447_v54, %v14472_v18 }
 0xd38   :  { %24400 = vmatmul.mubr.f32.vlgmr.msra.gmra.mrb[46].mxu1 %v13916_v56  ;;  %v14595_v56 = vand.u32 4294901760, %v14594_v39 }
 0xd39   :  { %26328 = vmatpush3.bf16.msra.mxu1 %v26313_v10  ;;  %24402 = vmatprep.mubr.f32.mxu1 %v13926_v14 }
 0xd3a   :  { %26330 = vmatprep.subr.bf16.mxu1 %v26329_v21 }
 0xd3c   :  { %24403 = vmatmul.mubr.f32.gmra.mrb[48].mxu1 %v13936_v27  ;;  %v14615_v27 = vsub.f32 %v14450_v32, %v14481_v52 }
 0xd3d   :  { %24409 = vmatprep.mubr.f32.mxu1 %v13907_v12  ;;  %v14596_v12 = vsub.f32 %v14594_v39, %v14595_v56 }
 0xd3e   :  { %v14616_v6 = vand.u32 4294901760, %v14615_v27 }
 0xd3f   :  { %v14597_v62 = vand.u32 4294901760, %v14596_v12 }
 0xd40   :  { %24410 = vmatmul.mubr.f32.vlgmr.msra.gmra.mrb[46].mxu1 %v13917_v22  ;;  %v14608_v22 = vsub.f32 %v14449_v7, %v14478_v34  ;;  %v14617_v35 = vsub.f32 %v14615_v27, %v14616_v6 }
 0xd41   :  { %26332 = vmatpush3.bf16.msra.mxu1 %v26329_v21  ;;  %24412 = vmatprep.mubr.f32.mxu1 %v13927_v5 }
 0xd42   :  { %26334 = vmatprep.subr.bf16.mxu1 %v26313_v10  ;;  %v14609_v31 = vand.u32 4294901760, %v14608_v22  ;;  %v14618_v59 = vand.u32 4294901760, %v14617_v35  ;;  %v29385_v21 = vpack.c.bf16 %v14615_v27, %v14608_v22 }
 0xd44   :  { %24413 = vmatmul.mubr.f32.gmra.mrb[48].mxu1 %v13937_v51  ;;  %v14610_v38 = vsub.f32 %v14608_v22, %v14609_v31  ;;  %v14629_v51 = vsub.f32 %v14452_v23, %v14487_v3  ;;  %v29393_v8 = vpack.c.bf16 %v14616_v6, %v14609_v31 }
 0xd45   :  { %24419 = vmatprep.mubr.f32.mxu1 %v29278_v28 }
 0xd46   :  { %v14611_v1 = vand.u32 4294901760, %v14610_v38  ;;  %v29387_v61 = vpack.c.bf16 %v14629_v51, %v14622_v53 }
 0xd48   :  { %24420 = vmatmul.mubr.f32.vlgmr.msra.gmra.mrb[46].mxu1 %v29286_v50  ;;  %v29377_v26 = vpack.c.bf16 %v14618_v59, %v14611_v1 }
 0xd49   :  { %26336 = vmatpush3.bf16.msra.mxu1 %v26313_v10  ;;  %24422 = vmatprep.mubr.f32.mxu1 %v29292_v44  ;;  %v14630_v10 = vand.u32 4294901760, %v14629_v51 }
 0xd4a   :  { %26434 = vmatprep.subr.bf16.mxu1 %v29329_v40 }
 0xd4b   :  { %v14631_v20 = vsub.f32 %v14629_v51, %v14630_v10  ;;  %v29395_v58 = vpack.c.bf16 %v14630_v10, %v14623_v4 }
 0xd4c   :  { %24423 = vmatmul.mubr.f32.gmra.mrb[48].mxu1 %v29297_v11 }
 0xd4d   :  { %24429 = vmatprep.mubr.f32.mxu1 %v29278_v28  ;;  %v29365_v28 = vpack.c.bf16 %v14487_v3, %v14484_v19  ;;  %v14632_v45 = vand.u32 4294901760, %v14631_v20 }
 0xd4f   :  { %26350 = vmatprep.subr.bf16.mxu0 %v29365_v28  ;;  %v29379_v30 = vpack.c.bf16 %v14632_v45, %v14625_v42 }
 0xd50   :  { %24430 = vmatmul.mubr.f32.vlgmr.msra.gmra.mrb[46].mxu1 %v29286_v50  ;;  %v14590_v50 = vand.u32 4294901760, %v14589_v15  ;;  %26352 = vmatpush3.bf16.msra.mxu0 %v29365_v28 }
 0xd51   :  { %24432 = vmatprep.mubr.f32.mxu1 %v29292_v44  ;;  %26436 = vmatpush3.bf16.msra.mxu1 %v29329_v40  ;;  %v14601_v44 = vsub.f32 %v14448_v48, %v14475_v46 }
 0xd52   :  { %26438 = vmatprep.subr.bf16.mxu1 %v29341_v63  ;;  %v29371_v55 = vpack.c.bf16 %v14590_v50, %v14583_v37 }
 0xd53   :  { %v29383_v33 = vpack.c.bf16 %v14601_v44, %v14594_v39 }
 0xd54   :  { %24433 = vmatmul.mubr.f32.gmra.mrb[48].mxu1 %v29297_v11  ;;  %v14602_v11 = vand.u32 4294901760, %v14601_v44  ;;  %26354 = vmatprep.subr.bf16.mxu0 %v29371_v55 }
 0xd55   :  { %26440 = vmatpush3.bf16.msra.mxu1 %v29341_v63 }
 0xd56   :  { %26442 = vmatprep.subr.bf16.mxu1 %v29353_v60  ;;  %v14603_v14 = vsub.f32 %v14601_v44, %v14602_v11  ;;  %v29391_v25 = vpack.c.bf16 %v14602_v11, %v14595_v56 }
 0xd58   :  { %v14604_v5 = vand.u32 4294901760, %v14603_v14 }
 0xd59   :  { %26444 = vmatpush3.bf16.msra.mxu1 %v29353_v60 }
 0xd5a   :  { %26446 = vmatprep.subr.bf16.mxu1 %v29365_v28  ;;  %v29375_v17 = vpack.c.bf16 %v14604_v5, %v14597_v62 }
 0xd5d   :  { %26448 = vmatpush3.bf16.msra.mxu1 %v29365_v28 }
 0xd5e   :  { %26450 = vmatprep.subr.bf16.mxu1 %v29371_v55 }
 0xe23   :  { %v24431_v49 = vpop.f32.mrb[46].mxu1 }
 0xe24   :  { %v14438_v36 = vadd.f32 %v24431_v49, %v21415_v47  ;;  %v14404_v54 = vpop.f32.mrb[47].mxu1 }
 0xe25   :  { %v14437_v48 = vadd.f32 %v21415_v47, %v14404_v54 }
 0xe26   :  { %v29400_v18 = vmax.f32 %v14438_v36, 0.0 }
 0xe27   :  { %v29402_v46 = vmax.f32 %v14437_v48, 0.0  ;;  %v24434_v7 = vpop.f32.mrb[48].mxu1 }
 0xe28   :  { %v14457_v32 = vsel %vm8710_vm7, %v29400_v18, 0  ;;  %v15145_v34 = vmul.f32 %v29400_v18, %v29400_v18  ;;  %v14440_v52 = vadd.f32 %v24434_v7, %v21415_v47  ;;  %v14416_v16 = vpop.f32.mrb[49].mxu1 }
 0xe29   :  { %v29408_v41 = vand.u32 4294901760, %v14457_v32  ;;  %v14454_v13 = vsel %vm8710_vm7, %v29402_v46, 0  ;;  %v15144_v23 = vmul.f32 %v29402_v46, %v29402_v46  ;;  %v14439_v19 = vadd.f32 %v21415_v47, %v14416_v16 }
 0xe2a   :  { %v15152_v3 = vsel %vm8710_vm7, %v15145_v34, 0  ;;  %v29415_v0 = vand.u32 4294901760, %v14454_v13  ;;  %v29417_v2 = vmax.f32 %v14440_v52, 0.0 }
 0xe2b   :  { %v29420_v29 = vsub.f32 %v14457_v32, %v29408_v41  ;;  %v29422_v15 = vand.u32 4294901760, %v15152_v3  ;;  %v15149_v37 = vsel %vm8710_vm7, %v15144_v23, 0  ;;  %v29425_v50 = vmax.f32 %v14439_v19, 0.0 }
 0xe2c   :  { %v29428_v39 = vsub.f32 %v14454_v13, %v29415_v0  ;;  %v29430_v44 = vand.u32 4294901760, %v15149_v37  ;;  %v14463_v56 = vsel %vm8710_vm7, %v29417_v2, 0  ;;  %v15147_v11 = vmul.f32 %v29417_v2, %v29417_v2 }
 0xe2d   :  { %v29437_v12 = vsub.f32 %v15152_v3, %v29422_v15  ;;  %v29439_v14 = vand.u32 4294901760, %v14463_v56  ;;  %v14460_v22 = vsel %vm8710_vm7, %v29425_v50, 0  ;;  %v15146_v27 = vmul.f32 %v29425_v50, %v29425_v50 }
 0xe2e   :  { %v29446_v62 = vsub.f32 %v15149_v37, %v29430_v44  ;;  %v15158_v5 = vsel %vm8710_vm7, %v15147_v11, 0  ;;  %v29449_v31 = vand.u32 4294901760, %v14460_v22  ;;  %v14540_v6 = vand.u32 4294901760, %v29428_v39 }
 0xe2f   :  { %v15245_v38 = vand.u32 4294901760, %v29437_v12  ;;  %v29454_v53 = vsub.f32 %v14463_v56, %v29439_v14  ;;  %v29456_v51 = vand.u32 4294901760, %v15158_v5  ;;  %v15155_v35 = vsel %vm8710_vm7, %v15146_v27, 0 }
 0xe30   :  { %v29460_v1 = vsub.f32 %v14460_v22, %v29449_v31  ;;  %v29462_v4 = vand.u32 4294901760, %v15155_v35  ;;  %v14541_v10 = vsub.f32 %v29428_v39, %v14540_v6  ;;  %v14550_v59 = vand.u32 4294901760, %v29420_v29 }
 0xe31   :  { %v29469_v43 = vsub.f32 %v15158_v5, %v29456_v51  ;;  %v15235_v20 = vand.u32 4294901760, %v29446_v62  ;;  %v15246_v42 = vsub.f32 %v29437_v12, %v15245_v38  ;;  %v14570_v45 = vand.u32 4294901760, %v29454_v53 }
 0xe32   :  { %v29477_v47 = vsub.f32 %v15155_v35, %v29462_v4  ;;  %v14542_v49 = vand.u32 4294901760, %v14541_v10  ;;  %v14551_v36 = vsub.f32 %v29420_v29, %v14550_v59  ;;  %v14560_v54 = vand.u32 4294901760, %v29460_v1 }
 0xe33   :  { %v15236_v48 = vsub.f32 %v29446_v62, %v15235_v20  ;;  %v15265_v7 = vand.u32 4294901760, %v29469_v43  ;;  %v14571_v52 = vsub.f32 %v29454_v53, %v14570_v45  ;;  %v15247_v23 = vand.u32 4294901760, %v15246_v42 }
 0xe34   :  { %24451 = vmatprep.mubr.f32.mxu0 %v14542_v49  ;;  %v14552_v32 = vand.u32 4294901760, %v14551_v36  ;;  %v14561_v34 = vsub.f32 %v29460_v1, %v14560_v54  ;;  %v15255_v16 = vand.u32 4294901760, %v29477_v47 }
 0xe35   :  { %v15237_v13 = vand.u32 4294901760, %v15236_v48  ;;  %v15266_v37 = vsub.f32 %v29469_v43, %v15265_v7  ;;  %v14572_v56 = vand.u32 4294901760, %v14571_v52 }
 0xe36   :  { %24452 = vmatmul.mubr.f32.vlgmr.msra.gmra.mrb[34].mxu0 %v14552_v32  ;;  %v14562_v19 = vand.u32 4294901760, %v14561_v34  ;;  %v15256_v3 = vsub.f32 %v29477_v47, %v15255_v16 }
 0xe37   :  { %26356 = vmatpush3.bf16.msra.mxu0 %v29371_v55  ;;  %24583 = vmatprep.mubr.f32.mxu1 %v15237_v13  ;;  %v15267_v22 = vand.u32 4294901760, %v15266_v37 }
 0xe38   :  { %24584 = vmatmul.mubr.f32.vlgmr.msra.gmra.mrb[50].mxu1 %v15247_v23  ;;  %24454 = vmatprep.mubr.f32.mxu0 %v14562_v19  ;;  %v15257_v11 = vand.u32 4294901760, %v15256_v3 }
 0xe39   :  { %26452 = vmatpush3.bf16.msra.mxu1 %v29371_v55  ;;  %26358 = vmatprep.subr.bf16.mxu0 %v29375_v17  ;;  %v15847_v55 = vld [vmem:[%s30849_s23] sm:$0xf] }
 0xe3a   :  { %24455 = vmatmul.mubr.f32.gmra.mrb[36].mxu0 %v14572_v56  ;;  %24586 = vmatprep.mubr.f32.mxu1 %v15257_v11 }
 0xe3b   :  { %26360 = vmatpush3.bf16.msra.mxu0 %v29375_v17  ;;  %24473 = vmatprep.mubr.f32.mxu0 %v29415_v0 }
 0xe3c   :  { %26454 = vmatprep.subr.bf16.mxu1 %v29375_v17  ;;  %24587 = vmatmul.mubr.f32.gmra.mrb[52].mxu1 %v15267_v22 }
 0xe3d   :  { %26456 = vmatpush3.bf16.msra.mxu1 %v29375_v17  ;;  %26362 = vmatprep.subr.bf16.mxu0 %v29377_v26 }
 0xe3e   :  { %24605 = vmatprep.mubr.f32.mxu1 %v29430_v44  ;;  %26458 = vmatprep.subr.bf16.mxu1 %v29377_v26 }
 0xe3f   :  { %26364 = vmatpush3.bf16.msra.mxu0 %v29377_v26 }
 0xe40   :  { %26366 = vmatprep.subr.bf16.mxu0 %v29379_v30 }
 0xe41   :  { %26460 = vmatpush3.bf16.msra.mxu1 %v29377_v26  ;;  %v30908_v26 = vmov 0.0  }
 0xe42   :  { %26462 = vmatprep.subr.bf16.mxu1 %v29379_v30 }
 0xe43   :  { %26368 = vmatpush3.bf16.msra.mxu0 %v29379_v30 }
 0xe44   :  { %26370 = vmatprep.subr.bf16.mxu0 %v29381_v9 }
 0xe45   :  { %26464 = vmatpush3.bf16.msra.mxu1 %v29379_v30 }
 0xe46   :  { %24474 = vmatmul.mubr.f32.vlgmr.msra.gmra.mrb[34].mxu0 %v29408_v41  ;;  %26466 = vmatprep.subr.bf16.mxu1 %v29381_v9 }
 0xe47   :  { %24476 = vmatprep.mubr.f32.mxu0 %v29449_v31  ;;  %26372 = vmatpush3.bf16.msra.mxu0 %v29381_v9 }
 0xe48   :  { %24606 = vmatmul.mubr.f32.vlgmr.msra.gmra.mrb[50].mxu1 %v29422_v15  ;;  %26374 = vmatprep.subr.bf16.mxu0 %v29383_v33 }
 0xe49   :  { %24608 = vmatprep.mubr.f32.mxu1 %v29462_v4  ;;  %26468 = vmatpush3.bf16.msra.mxu1 %v29381_v9 }
 0xe4a   :  { %24477 = vmatmul.mubr.f32.gmra.mrb[36].mxu0 %v29439_v14  ;;  %26470 = vmatprep.subr.bf16.mxu1 %v29383_v33 }
 0xe4b   :  { %26376 = vmatpush3.bf16.msra.mxu0 %v29383_v33  ;;  %24495 = vmatprep.mubr.f32.mxu0 %v29428_v39 }
 0xe4c   :  { %24609 = vmatmul.mubr.f32.gmra.mrb[52].mxu1 %v29456_v51  ;;  %26378 = vmatprep.subr.bf16.mxu0 %v29385_v21 }
 0xe4d   :  { %26472 = vmatpush3.bf16.msra.mxu1 %v29383_v33  ;;  %24627 = vmatprep.mubr.f32.mxu1 %v29446_v62 }
 0xe4e   :  { %26474 = vmatprep.subr.bf16.mxu1 %v29385_v21 }
 0xe4f   :  { %26380 = vmatpush3.bf16.msra.mxu0 %v29385_v21 }
 0xe50   :  { %26382 = vmatprep.subr.bf16.mxu0 %v29387_v61 }
 0xe51   :  { %26476 = vmatpush3.bf16.msra.mxu1 %v29385_v21 }
 0xe52   :  { %26478 = vmatprep.subr.bf16.mxu1 %v29387_v61 }
 0xe53   :  { %26384 = vmatpush3.bf16.msra.mxu0 %v29387_v61 }
 0xe54   :  { %26386 = vmatprep.subr.bf16.mxu0 %v29329_v40 }
 0xe55   :  { %26480 = vmatpush3.bf16.msra.mxu1 %v29387_v61 }
 0xe56   :  { %24496 = vmatmul.mubr.f32.vlgmr.msra.gmra.mrb[34].mxu0 %v29420_v29  ;;  %26482 = vmatprep.subr.bf16.mxu1 %v29329_v40 }
 0xe57   :  { %24498 = vmatprep.mubr.f32.mxu0 %v29460_v1  ;;  %26388 = vmatpush3.bf16.msra.mxu0 %v29329_v40 }
 0xe58   :  { %24628 = vmatmul.mubr.f32.vlgmr.msra.gmra.mrb[50].mxu1 %v29437_v12  ;;  %26390 = vmatprep.subr.bf16.mxu0 %v29341_v63 }
 0xe59   :  { %24630 = vmatprep.mubr.f32.mxu1 %v29477_v47  ;;  %26484 = vmatpush3.bf16.msra.mxu1 %v29329_v40 }
 0xe5a   :  { %24499 = vmatmul.mubr.f32.gmra.mrb[36].mxu0 %v29454_v53  ;;  %26486 = vmatprep.subr.bf16.mxu1 %v29341_v63 }
 0xe5b   :  { %26392 = vmatpush3.bf16.msra.mxu0 %v29341_v63  ;;  %24517 = vmatprep.mubr.f32.mxu0 %v14540_v6 }
 0xe5c   :  { %24631 = vmatmul.mubr.f32.gmra.mrb[52].mxu1 %v29469_v43  ;;  %26394 = vmatprep.subr.bf16.mxu0 %v29353_v60 }
 0xe5d   :  { %26488 = vmatpush3.bf16.msra.mxu1 %v29341_v63  ;;  %24649 = vmatprep.mubr.f32.mxu1 %v15235_v20 }
 0xe5e   :  { %26490 = vmatprep.subr.bf16.mxu1 %v29353_v60 }
 0xe5f   :  { %26396 = vmatpush3.bf16.msra.mxu0 %v29353_v60 }
 0xe60   :  { %26398 = vmatprep.subr.bf16.mxu0 %v29365_v28 }
 0xe61   :  { %26492 = vmatpush3.bf16.msra.mxu1 %v29353_v60 }
 0xe62   :  { %26494 = vmatprep.subr.bf16.mxu1 %v29365_v28 }
 0xe63   :  { %26400 = vmatpush3.bf16.msra.mxu0 %v29365_v28 }
 0xe64   :  { %26402 = vmatprep.subr.bf16.mxu0 %v29389_v24 }
 0xe65   :  { %26496 = vmatpush3.bf16.msra.mxu1 %v29365_v28 }
 0xe66   :  { %24518 = vmatmul.mubr.f32.vlgmr.msra.gmra.mrb[34].mxu0 %v14550_v59  ;;  %26498 = vmatprep.subr.bf16.mxu1 %v29389_v24 }
 0xe67   :  { %24520 = vmatprep.mubr.f32.mxu0 %v14560_v54  ;;  %26404 = vmatpush3.bf16.msra.mxu0 %v29389_v24 }
 0xe68   :  { %24650 = vmatmul.mubr.f32.vlgmr.msra.gmra.mrb[50].mxu1 %v15245_v38  ;;  %26406 = vmatprep.subr.bf16.mxu0 %v29391_v25 }
 0xe69   :  { %24652 = vmatprep.mubr.f32.mxu1 %v15255_v16  ;;  %26500 = vmatpush3.bf16.msra.mxu1 %v29389_v24 }
 0xe6a   :  { %24521 = vmatmul.mubr.f32.gmra.mrb[36].mxu0 %v14570_v45  ;;  %26502 = vmatprep.subr.bf16.mxu1 %v29391_v25 }
 0xe6b   :  { %26408 = vmatpush3.bf16.msra.mxu0 %v29391_v25  ;;  %24539 = vmatprep.mubr.f32.mxu0 %v29415_v0 }
 0xe6c   :  { %24653 = vmatmul.mubr.f32.gmra.mrb[52].mxu1 %v15265_v7  ;;  %26410 = vmatprep.subr.bf16.mxu0 %v29393_v8 }
 0xe6d   :  { %26504 = vmatpush3.bf16.msra.mxu1 %v29391_v25  ;;  %24671 = vmatprep.mubr.f32.mxu1 %v29430_v44 }
 0xe6e   :  { %26506 = vmatprep.subr.bf16.mxu1 %v29393_v8 }
 0xe6f   :  { %26412 = vmatpush3.bf16.msra.mxu0 %v29393_v8 }
 0xe70   :  { %26414 = vmatprep.subr.bf16.mxu0 %v29395_v58 }
 0xe71   :  { %26508 = vmatpush3.bf16.msra.mxu1 %v29393_v8 }
 0xe72   :  { %26510 = vmatprep.subr.bf16.mxu1 %v29395_v58 }
 0xe73   :  { %26416 = vmatpush3.bf16.msra.mxu0 %v29395_v58 }
 0xe74   :  { %26418 = vmatprep.subr.bf16.mxu0 %v29329_v40 }
 0xe75   :  { %26512 = vmatpush3.bf16.msra.mxu1 %v29395_v58 }
 0xe76   :  { %24540 = vmatmul.mubr.f32.vlgmr.msra.gmra.mrb[34].mxu0 %v29408_v41  ;;  %26514 = vmatprep.subr.bf16.mxu1 %v29329_v40 }
 0xe77   :  { %24542 = vmatprep.mubr.f32.mxu0 %v29449_v31  ;;  %26420 = vmatpush3.bf16.msra.mxu0 %v29329_v40 }
 0xe78   :  { %24672 = vmatmul.mubr.f32.vlgmr.msra.gmra.mrb[50].mxu1 %v29422_v15  ;;  %26422 = vmatprep.subr.bf16.mxu0 %v29341_v63 }
 0xe79   :  { %24674 = vmatprep.mubr.f32.mxu1 %v29462_v4  ;;  %26516 = vmatpush3.bf16.msra.mxu1 %v29329_v40  ;;  %v15853_v40 = vsel %vm1966_vm4, %v15847_v55, 0 }
 0xe7a   :  { %24543 = vmatmul.mubr.f32.gmra.mrb[36].mxu0 %v29439_v14  ;;  %26518 = vmatprep.subr.bf16.mxu1 %v29341_v63  ;;  %v29622_v17 = vand.u32 4294901760, %v15853_v40 }
 0xe7b   :  { %26424 = vmatpush3.bf16.msra.mxu0 %v29341_v63  ;;  %24561 = vmatprep.mubr.f32.mxu0 %v29415_v0 }
 0xe7c   :  { %24675 = vmatmul.mubr.f32.gmra.mrb[52].mxu1 %v29456_v51  ;;  %26426 = vmatprep.subr.bf16.mxu0 %v29353_v60  ;;  %v15933_v10 = vsub.f32 %v15853_v40, %v29622_v17 }
 0xe7d   :  { %26520 = vmatpush3.bf16.msra.mxu1 %v29341_v63  ;;  %24693 = vmatprep.mubr.f32.mxu1 %v29430_v44 }
 0xe7e   :  { %26522 = vmatprep.subr.bf16.mxu1 %v29353_v60  ;;  %v15934_v36 = vand.u32 4294901760, %v15933_v10 }
 0xe7f   :  { %26428 = vmatpush3.bf16.msra.mxu0 %v29353_v60 }
 0xe80   :  { %26430 = vmatprep.subr.bf16.mxu0 %v29365_v28  ;;  %v15935_v34 = vsub.f32 %v15933_v10, %v15934_v36 }
 0xe81   :  { %26524 = vmatpush3.bf16.msra.mxu1 %v29353_v60 }
 0xe82   :  { %26526 = vmatprep.subr.bf16.mxu1 %v29365_v28  ;;  %v15936_v23 = vand.u32 4294901760, %v15935_v34 }
 0xe83   :  { %26432 = vmatpush3.bf16.msra.mxu0 %v29365_v28 }
 0xe84   :  { %24699 = vmatprep.subr.mxu0 %v30908_v26 }
 0xe85   :  { %26528 = vmatpush3.bf16.msra.mxu1 %v29365_v28 }
 0xe86   :  { %24562 = vmatmul.mubr.f32.vlgmr.msra.gmra.mrb[34].mxu0 %v29408_v41  ;;  %24729 = vmatprep.subr.mxu1 %v30908_v26 }
 0xe87   :  { %24564 = vmatprep.mubr.f32.mxu0 %v29449_v31  ;;  %24700 = vmatpush3.msra.mxu0 %v29622_v17 }
 0xe88   :  { %24694 = vmatmul.mubr.f32.vlgmr.msra.gmra.mrb[50].mxu1 %v29422_v15  ;;  %24704 = vmatprep.subr.mxu0 %v30908_v26 }
 0xe89   :  { %24696 = vmatprep.mubr.f32.mxu1 %v29462_v4  ;;  %24730 = vmatpush3.msra.mxu1 %v29622_v17 }
 0xe8a   :  { %24565 = vmatmul.mubr.f32.gmra.mrb[36].mxu0 %v29439_v14  ;;  %24734 = vmatprep.subr.mxu1 %v30908_v26 }
 0xe8b   :  { %24701 = vmatprep.mubr.msk.f32.mxu0 %vm27552_vm1, %v30908_v26 }
 0xe8c   :  { %24697 = vmatmul.mubr.f32.gmra.mrb[52].mxu1 %v29456_v51 }
 0xe8d   :  { %24731 = vmatprep.mubr.msk.f32.mxu1 %vm27552_vm1, %v30908_v26 }
 0xf59   :  { %v24563_v63 = vpop.f32.mrb[34].mxu0 }
 0xf5a   :  { %v15132_v60 = vsel %vm1962_vm3, %v24563_v63, 0.0  ;;  %v15109_v28 = vpop.f32.mrb[35].mxu0  ;;  %v16795_v63 = vld [vmem:[%s30850_s24] sm:$0xff] }
 0xf5b   :  { %v15131_v30 = vsel %vm1962_vm3, %v15109_v28, 0.0  ;;  %v24695_v9 = vpop.f32.mrb[50].mxu1  ;;  %v21426_v28 = vld [vmem:[%s30850_s24 + $0x40] sm:$0xff] }
 0xf5c   :  { %v15133_v33 = vadd.f32 %v15132_v60, %v15131_v30  ;;  %v15827_v21 = vsel %vm1962_vm3, %v24695_v9, 0.0  ;;  %v15804_v61 = vpop.f32.mrb[51].mxu1  ;;  %v16796_v60 = vld [vmem:[%s30850_s24 + $0x8] sm:$0xff]  ;;  %v16816_v30 = vand.u32 4294901760, %v16795_v63 }
 0xf5d   :  { %v15826_v24 = vsel %vm1962_vm3, %v15804_v61, 0.0  ;;  %v24566_v25 = vpop.f32.mrb[36].mxu0  ;;  %v16819_v9 = vand.u32 4294901760, %v16796_v60 }
 0xf5e   :  { %v15828_v8 = vadd.f32 %v15827_v21, %v15826_v24  ;;  %v15121_v58 = vpop.f32.mrb[37].mxu0  ;;  %v15136_v39 = vsel %vm1962_vm3, %v24566_v25, 0.0  ;;  %v16797_v24 = vld [vmem:[%s30850_s24 + $0x10] sm:$0xff]  ;;  %v16798_v25 = vld [vmem:[%s30850_s24 + $0x18] sm:$0xff] }
 0xf5f   :  { %v15134_v41 = vsel %vm1962_vm3, %v15121_v58, 0.0  ;;  %v24698_v0 = vpop.f32.mrb[52].mxu1  ;;  %v29697_v21 = vpack.c.bf16 %v16819_v9, %v16816_v30  ;;  %v16822_v58 = vand.u32 4294901760, %v16797_v24 }
 0xf60   :  { %v15135_v29 = vadd.f32 %v15134_v41, %v15133_v33  ;;  %v15816_v15 = vpop.f32.mrb[53].mxu1  ;;  %v15831_v27 = vsel %vm1962_vm3, %v24698_v0, 0.0  ;;  %v16825_v41 = vand.u32 4294901760, %v16798_v25  ;;  %v21429_v0 = vld [vmem:[%s30850_s24 + $0x58] sm:$0xff] }
 0xf61   :  { %v15829_v44 = vsel %vm1962_vm3, %v15816_v15, 0.0  ;;  %v17509_v15 = vand.u32 4294901760, %v21429_v0 }
 0xf62   :  { %v15137_v12 = vadd.f32 %v15136_v39, %v15135_v29  ;;  %v15830_v14 = vadd.f32 %v15829_v44, %v15828_v8  ;;  %v21428_v8 = vld [vmem:[%s30850_s24 + $0x50] sm:$0xff]  ;;  %v29717_v39 = vpack.c.bf16 %v16825_v41, %v16822_v58 }
 0xf63   :  { %v17506_v29 = vand.u32 4294901760, %v21428_v8 }
 0xf64   :  { %v15138_v62 = vrot.slane %v15137_v12, 4  ;;  %v15832_v5 = vadd.f32 %v15831_v27, %v15830_v14  ;;  %v16800_v14 = vld [vmem:[%s30850_s24 + $0x28] sm:$0xff]  ;;  %v29730_v27 = vld [vmem:[%s30850_s24 + $0x60] sm:$0xff] }
 0xf65   :  { %v29719_v44 = vpack.c.bf16 %v17509_v15, %v17506_v29 }
 0xf66   :  { %v15139_v31 = vadd.f32 %v15138_v62, %v15137_v12  ;;  %v15833_v6 = vrot.slane %v15832_v5, 4  ;;  %v16799_v12 = vld [vmem:[%s30850_s24 + $0x20] sm:$0xff] }
 0xf67   :  { %v16828_v62 = vand.u32 4294901760, %v16799_v12 }
 0xf68   :  { %v15140_v38 = vrot.slane %v15139_v31, 2  ;;  %v15834_v53 = vadd.f32 %v15833_v6, %v15832_v5  ;;  %v16831_v5 = vand.u32 4294901760, %v16800_v14  ;;  %v17512_v6 = vand.u32 4294901760, %v29730_v27 }
 0xf6a   :  { %v15141_v51 = vadd.f32 %v15140_v38, %v15139_v31  ;;  %v15835_v35 = vrot.slane %v15834_v53, 2  ;;  %v29736_v31 = vld [vmem:[%s30850_s24 + $0x68] sm:$0xff] }
 0xf6b   :  { %v17515_v38 = vand.u32 4294901760, %v29736_v31 }
 0xf6c   :  { %v15142_v1 = vrot.slane %v15141_v51, 1  ;;  %v15836_v4 = vadd.f32 %v15835_v35, %v15834_v53  ;;  %v29743_v53 = vpack.c.bf16 %v16831_v5, %v16828_v62  ;;  %v29747_v35 = vsub.f32 %v16796_v60, %v16819_v9 }
 0xf6e   :  { %v15143_v59 = vadd.f32 %v15142_v1, %v15141_v51  ;;  %v15837_v43 = vrot.slane %v15836_v4, 1  ;;  %v29745_v51 = vsub.f32 %v16795_v63, %v16816_v30 }
 0xf70   :  { %v15840_v20 = vmul.f32 0.001953125, %v15143_v59  ;;  %v15838_v42 = vadd.f32 %v15837_v43, %v15836_v4  ;;  %v29753_v4 = vpack.c.bf16 %v17515_v38, %v17512_v6  ;;  %v29761_v59 = vld [vmem:[%s30850_s24 + $0x38] sm:$0xff]  ;;  %v29766_v43 = vld [vmem:[%s30850_s24 + $0x70] sm:$0xff] }
 0xf72   :  { %v15842_v45 = vmul.f32 %v15840_v20, %v15840_v20  ;;  %v15850_v47 = vsel %vm1962_vm3, %v15840_v20, 0  ;;  %v15841_v49 = vmul.f32 0.001953125, %v15838_v42 }
 0xf73   :  { %v15921_v54 = vand.u32 4294901760, %v15850_v47 }
 0xf74   :  { %v15843_v48 = vsub.f32 %v15841_v49, %v15842_v45  ;;  %v16837_v45 = vand.u32 4294901760, %v29761_v59  ;;  %v17518_v49 = vand.u32 4294901760, %v29766_v43 }
 0xf75   :  { %v15922_v7 = vsub.f32 %v15850_v47, %v15921_v54  ;;  %v29775_v47 = vld [vmem:[%s30850_s24 + $0x78] sm:$0xff] }
 0xf76   :  { %v15844_v32 = vmax.f32 %v15843_v48, 0.0  ;;  %v30873_v48 = vand.u32 4294901760, %v29747_v35 }
 0xf77   :  { %v15923_v52 = vand.u32 4294901760, %v15922_v7 }
 0xf78   :  { %v15845_v16 = vadd.f32 1e-05, %v15844_v32 }
 0xf79   :  { %v15924_v13 = vsub.f32 %v15922_v7, %v15923_v52 }
 0xf7a   :  { %27517 = vrsqrt.f32 %v15845_v16  ;;  %v29791_v16 = vsub.f32 %v16797_v24, %v16822_v58 }
 0xf7b   :  { %v15925_v19 = vand.u32 4294901760, %v15924_v13  ;;  %v29793_v13 = vsub.f32 %v16798_v25, %v16825_v41 }
 0xf7d   :  { %24702 = vmatmul.mubr.f32.vlgmr.msra.gmra.mrb[38].mxu0 %v15925_v19  ;;  %v16939_v19 = vsub.f32 %v29747_v35, %v30873_v48 }
 0xf7e   :  { %24705 = vmatpush3.msra.mxu0 %v15936_v23  ;;  %24706 = vmatprep.mubr.msk.f32.mxu0 %vm27552_vm1, %v30908_v26 }
 0xf7f   :  { %24709 = vmatprep.subr.mxu0 %v30908_v26 }
 0xf84   :  { %v27518_v3 = vpop.eup %27517 }
 0xf85   :  { %24707 = vmatmul.mubr.f32.vlgmr.msra.gmra.mrb[38].mxu0 %v15921_v54  ;;  %v16320_v37 = vsel %vm1962_vm3, %v27518_v3, 0 }
 0xf86   :  { %24710 = vmatpush3.msra.mxu0 %v15933_v10  ;;  %24711 = vmatprep.mubr.msk.f32.mxu0 %vm27552_vm1, %v30908_v26  ;;  %v16388_v56 = vand.u32 4294901760, %v16320_v37 }
 0xf87   :  { %24714 = vmatprep.subr.mxu0 %v30908_v26 }
 0xf88   :  { %v16389_v11 = vsub.f32 %v16320_v37, %v16388_v56 }
 0xf8a   :  { %v16390_v22 = vand.u32 4294901760, %v16389_v11 }
 0xf8c   :  { %v16391_v55 = vsub.f32 %v16389_v11, %v16390_v22 }
 0xf8d   :  { %24712 = vmatmul.mubr.f32.vlgmr.msra.gmra.mrb[38].mxu0 %v15922_v7 }
 0xf8e   :  { %v16392_v40 = vand.u32 4294901760, %v16391_v55  ;;  %24715 = vmatpush3.msra.mxu0 %v29622_v17  ;;  %24716 = vmatprep.mubr.msk.f32.mxu0 %vm27552_vm1, %v30908_v26  ;;  %v29809_v55 = vsub.f32 %v21428_v8, %v17506_v29  ;;  %v16965_v8 = vsub.f32 %v16800_v14, %v16831_v5 }
 0xf8f   :  { %24719 = vmatprep.subr.mxu0 %v30908_v26 }
 0xf90   :  { %24732 = vmatmul.mubr.f32.vlgmr.msra.gmra.mrb[54].mxu1 %v16392_v40  ;;  %v16940_v40 = vand.u32 4294901760, %v16939_v19 }
 0xf91   :  { %24735 = vmatpush3.msra.mxu1 %v15936_v23  ;;  %24736 = vmatprep.mubr.msk.f32.mxu1 %vm27552_vm1, %v30908_v26 }
 0xf92   :  { %24739 = vmatprep.subr.mxu1 %v30908_v26 }
 0xf95   :  { %24717 = vmatmul.mubr.f32.vlgmr.msra.gmra.mrb[38].mxu0 %v15923_v52 }
 0xf96   :  { %24720 = vmatpush3.msra.mxu0 %v15934_v36  ;;  %24721 = vmatprep.mubr.msk.f32.mxu0 %vm27552_vm1, %v30908_v26 }
 0xf97   :  { %24724 = vmatprep.subr.mxu0 %v30908_v26 }
 0xf98   :  { %24737 = vmatmul.mubr.f32.vlgmr.msra.gmra.mrb[54].mxu1 %v16388_v56 }
 0xf99   :  { %24740 = vmatpush3.msra.mxu1 %v15933_v10  ;;  %24741 = vmatprep.mubr.msk.f32.mxu1 %vm27552_vm1, %v30908_v26  ;;  %v16801_v10 = vld [vmem:[%s30850_s24 + $0x30] sm:$0xff] }
 0xf9a   :  { %24744 = vmatprep.subr.mxu1 %v30908_v26  ;;  %v16834_v42 = vand.u32 4294901760, %v16801_v10 }
 0xf9c   :  { %v29786_v34 = vpack.c.bf16 %v16837_v45, %v16834_v42 }
 0xf9d   :  { %24722 = vmatmul.mubr.f32.vlgmr.msra.gmra.mrb[38].mxu0 %v15921_v54 }
 0xf9e   :  { %24725 = vmatpush3.msra.mxu0 %v29622_v17  ;;  %24726 = vmatprep.mubr.msk.f32.mxu0 %vm27552_vm1, %v30908_v26 }
 0xf9f   :  { %26530 = vmatprep.subr.bf16.mxu0 %v29697_v21 }
 0xfa0   :  { %24742 = vmatmul.mubr.f32.vlgmr.msra.gmra.mrb[54].mxu1 %v16389_v11  ;;  %v30870_v11 = vand.u32 4294901760, %v29791_v16 }
 0xfa1   :  { %24745 = vmatpush3.msra.mxu1 %v29622_v17  ;;  %24746 = vmatprep.mubr.msk.f32.mxu1 %vm27552_vm1, %v30908_v26 }
 0xfa2   :  { %24749 = vmatprep.subr.mxu1 %v30908_v26  ;;  %v16946_v30 = vsub.f32 %v29791_v16, %v30870_v11 }
 0xfa4   :  { %v16947_v58 = vand.u32 4294901760, %v16946_v30 }
 0xfa5   :  { %24727 = vmatmul.mubr.f32.vlgmr.msra.gmra.mrb[38].mxu0 %v15921_v54  ;;  %v17521_v54 = vand.u32 4294901760, %v29775_v47 }
 0xfa6   :  { %26532 = vmatpush3.bf16.msra.mxu0 %v29697_v21 }
 0xfa7   :  { %26534 = vmatprep.subr.bf16.mxu0 %v29717_v39  ;;  %v29795_v23 = vpack.c.bf16 %v17521_v54, %v17518_v49 }
 0xfa8   :  { %24747 = vmatmul.mubr.f32.vlgmr.msra.gmra.mrb[54].mxu1 %v16390_v22  ;;  %v30869_v22 = vand.u32 4294901760, %v29793_v13 }
 0xfa9   :  { %24750 = vmatpush3.msra.mxu1 %v15934_v36  ;;  %24751 = vmatprep.mubr.msk.f32.mxu1 %vm27552_vm1, %v30908_v26  ;;  %v16931_v36 = vand.u32 4294901760, %v29745_v51 }
 0xfaa   :  { %24754 = vmatprep.subr.mxu1 %v30908_v26  ;;  %26536 = vmatpush3.bf16.msra.mxu0 %v29717_v39  ;;  %v16953_v9 = vsub.f32 %v29793_v13, %v30869_v22  ;;  %v17656_v22 = vsub.f32 %v29766_v43, %v17518_v49 }
 0xfab   :  { %26538 = vmatprep.subr.bf16.mxu0 %v29743_v53  ;;  %v16932_v52 = vsub.f32 %v29745_v51, %v16931_v36 }
 0xfac   :  { %v16954_v41 = vand.u32 4294901760, %v16953_v9  ;;  %v16979_v9 = vsub.f32 %v29761_v59, %v16837_v45 }
 0xfae   :  { %26540 = vmatpush3.bf16.msra.mxu0 %v29743_v53  ;;  %v29836_v19 = vpack.c.bf16 %v16954_v41, %v16947_v58  ;;  %v16980_v58 = vand.u32 4294901760, %v16979_v9  ;;  %v17657_v41 = vand.u32 4294901760, %v17656_v22 }
 0xfaf   :  { %26542 = vmatprep.subr.bf16.mxu0 %v29786_v34 }
 0xfb0   :  { %24752 = vmatmul.mubr.f32.vlgmr.msra.gmra.mrb[54].mxu1 %v16388_v56 }
 0xfb1   :  { %24755 = vmatpush3.msra.mxu1 %v29622_v17  ;;  %24756 = vmatprep.mubr.msk.f32.mxu1 %vm27552_vm1, %v30908_v26  ;;  %v21427_v17 = vld [vmem:[%s30850_s24 + $0x48] sm:$0xff]  ;;  %v17500_v26 = vand.u32 4294901760, %v21426_v28 }
 0xfb2   :  { %v17503_v33 = vand.u32 4294901760, %v21427_v17  ;;  %26544 = vmatpush3.bf16.msra.mxu0 %v29786_v34 }
 0xfb3   :  { %v29749_v1 = vsub.f32 %v21426_v28, %v17500_v26  ;;  %v29813_v28 = vsub.f32 %v21429_v0, %v17509_v15 }
 0xfb4   :  { %v29699_v61 = vpack.c.bf16 %v17503_v33, %v17500_v26  ;;  %v29768_v20 = vsub.f32 %v21427_v17, %v17503_v33  ;;  %v17629_v17 = vand.u32 4294901760, %v29809_v55  ;;  %v16958_v26 = vsub.f32 %v16799_v12, %v16828_v62 }
 0xfb5   :  { %v30872_v7 = vand.u32 4294901760, %v29749_v1  ;;  %v17636_v25 = vand.u32 4294901760, %v29813_v28  ;;  %v17642_v12 = vsub.f32 %v29730_v27, %v17512_v6  ;;  %v17649_v62 = vsub.f32 %v29736_v31, %v17515_v38 }
 0xfb6   :  { %26626 = vmatprep.subr.bf16.mxu1 %v29699_v61  ;;  %v30871_v32 = vand.u32 4294901760, %v29768_v20  ;;  %v17630_v0 = vsub.f32 %v29809_v55, %v17629_v17  ;;  %v16959_v29 = vand.u32 4294901760, %v16958_v26 }
 0xfb7   :  { %v17616_v3 = vsub.f32 %v29749_v1, %v30872_v7  ;;  %v17637_v15 = vsub.f32 %v29813_v28, %v17636_v25  ;;  %v17658_v7 = vsub.f32 %v17656_v22, %v17657_v41 }
 0xfb8   :  { %24757 = vmatmul.mubr.f32.vlgmr.msra.gmra.mrb[54].mxu1 %v16388_v56  ;;  %v17623_v37 = vsub.f32 %v29768_v20, %v30871_v32  ;;  %v16933_v56 = vand.u32 4294901760, %v16932_v52  ;;  %v16966_v52 = vand.u32 4294901760, %v16965_v8  ;;  %v17631_v14 = vand.u32 4294901760, %v17630_v0 }
 0xfb9   :  { %26628 = vmatpush3.bf16.msra.mxu1 %v29699_v61  ;;  %v17617_v63 = vand.u32 4294901760, %v17616_v3  ;;  %v16960_v5 = vsub.f32 %v16958_v26, %v16959_v29  ;;  %v16972_v3 = vsub.f32 %v16801_v10, %v16834_v42  ;;  %v17663_v10 = vsub.f32 %v29775_v47, %v17521_v54 }
 0xfba   :  { %26630 = vmatprep.subr.bf16.mxu1 %v29719_v44  ;;  %v17624_v60 = vand.u32 4294901760, %v17623_v37  ;;  %v29823_v33 = vpack.c.bf16 %v16940_v40, %v16933_v56  ;;  %v17638_v37 = vand.u32 4294901760, %v17637_v15  ;;  %v16967_v56 = vsub.f32 %v16965_v8, %v16966_v52 }
 0xfbb   :  { %v17643_v40 = vand.u32 4294901760, %v17642_v12  ;;  %v16973_v30 = vand.u32 4294901760, %v16972_v3  ;;  %v16981_v32 = vsub.f32 %v16979_v9, %v16980_v58  ;;  %v17664_v59 = vand.u32 4294901760, %v17663_v10 }
 0xfbc   :  { %v29825_v24 = vpack.c.bf16 %v17624_v60, %v17617_v63  ;;  %26546 = vmatprep.subr.bf16.mxu0 %v29823_v33  ;;  %v17650_v63 = vand.u32 4294901760, %v17649_v62  ;;  %v16961_v60 = vand.u32 4294901760, %v16960_v5  ;;  %v29840_v11 = vpack.c.bf16 %v17638_v37, %v17631_v14 }
 0xfbd   :  { %26632 = vmatpush3.bf16.msra.mxu1 %v29719_v44  ;;  %v16968_v27 = vand.u32 4294901760, %v16967_v56  ;;  %v17644_v6 = vsub.f32 %v17642_v12, %v17643_v40  ;;  %v16974_v38 = vsub.f32 %v16972_v3, %v16973_v30  ;;  %v16982_v43 = vand.u32 4294901760, %v16981_v32 }
 0xfbe   :  { %26634 = vmatprep.subr.bf16.mxu1 %v29753_v4  ;;  %v17651_v31 = vsub.f32 %v17649_v62, %v17650_v63  ;;  %v17659_v49 = vand.u32 4294901760, %v17658_v7  ;;  %v17665_v14 = vsub.f32 %v17663_v10, %v17664_v59  ;;  %v29853_v47 = vpack.c.bf16 %v29747_v35, %v29745_v51 }
 0xfbf   :  { %v29843_v42 = vpack.c.bf16 %v16968_v27, %v16961_v60  ;;  %v17645_v0 = vand.u32 4294901760, %v17644_v6  ;;  %v16975_v5 = vand.u32 4294901760, %v16974_v38  ;;  %v29857_v54 = vpack.c.bf16 %v29768_v20, %v29749_v1 }
 0xfc0   :  { %v17652_v15 = vand.u32 4294901760, %v17651_v31  ;;  %v17666_v56 = vand.u32 4294901760, %v17665_v14  ;;  %v29861_v60 = vpack.c.bf16 %v29793_v13, %v29791_v16  ;;  %v29865_v7 = vpack.c.bf16 %v29813_v28, %v29809_v55 }
 0xfc1   :  { %26636 = vmatpush3.bf16.msra.mxu1 %v29753_v4  ;;  %v29847_v37 = vpack.c.bf16 %v16982_v43, %v16975_v5  ;;  %v29867_v32 = vpack.c.bf16 %v16965_v8, %v16958_v26  ;;  %v29869_v27 = vpack.c.bf16 %v17649_v62, %v17642_v12  ;;  %v29871_v6 = vpack.c.bf16 %v16979_v9, %v16972_v3 }
 0xfc2   :  { %26638 = vmatprep.subr.bf16.mxu1 %v29795_v23  ;;  %v29845_v45 = vpack.c.bf16 %v17652_v15, %v17645_v0  ;;  %v29849_v48 = vpack.c.bf16 %v17666_v56, %v17659_v49  ;;  %v29873_v31 = vpack.c.bf16 %v17663_v10, %v17656_v22  ;;  %v30909_v38 = vand.u32 4294901760, %v29747_v35 }
 0xfc3   :  { %v30910_v15 = vand.u32 4294901760, %v29749_v1  ;;  %v30911_v5 = vand.u32 4294901760, %v29768_v20  ;;  %v30912_v28 = vand.u32 4294901760, %v29791_v16  ;;  %v30913_v26 = vand.u32 4294901760, %v29793_v13 }
 0xfc4   :  { %v29879_v0 = vpack.c.bf16 %v30909_v38, %v16931_v36  ;;  %v29893_v22 = vpack.c.bf16 %v17636_v25, %v17629_v17  ;;  %v29895_v12 = vpack.c.bf16 %v16966_v52, %v16959_v29  ;;  %v29897_v51 = vpack.c.bf16 %v17650_v63, %v17643_v40  ;;  %v21416_v25 = vld [vmem:[%s30851_s20] ss:$0 sm:$0xff] }
 0xfc5   :  { %26640 = vmatpush3.bf16.msra.mxu1 %v29795_v23  ;;  %v29885_v55 = vpack.c.bf16 %v30911_v5, %v30910_v15  ;;  %v29891_v8 = vpack.c.bf16 %v30913_v26, %v30912_v28  ;;  %v29899_v35 = vpack.c.bf16 %v16980_v58, %v16973_v30  ;;  %v29901_v36 = vpack.c.bf16 %v17664_v59, %v17657_v41 }
 0xfc6   :  { %26642 = vmatprep.subr.bf16.mxu1 %v29825_v24 }
0x1078   :  { %v16297_v1 = vpop.f32.mrb[38].mxu0 }
0x1079   :  { %v24728_v20 = vpop.f32.mrb[39].mxu0  ;;  %v16304_v62 = vrot.slane %v16297_v1, %v28231_v57 }
0x107b   :  { %v16305_v16 = vsub.f32 %v29402_v46, %v16304_v62  ;;  %v16306_v13 = vsub.f32 %v29400_v18, %v16304_v62  ;;  %v16307_v3 = vsub.f32 %v29425_v50, %v16304_v62  ;;  %v16308_v17 = vsub.f32 %v29417_v2, %v16304_v62  ;;  %v21417_v18 = vld [vmem:[%s30852_s21] ss:$0 sm:$0xff] }
0x107d   :  { %v16315_v29 = vmul.f32 %v21416_v25, %v16305_v16  ;;  %v16316_v40 = vmul.f32 %v21416_v25, %v16306_v13  ;;  %v16317_v63 = vmul.f32 %v21416_v25, %v16307_v3  ;;  %v16318_v30 = vmul.f32 %v21416_v25, %v16308_v17 }
0x108b   :  { %v16764_v52 = vpop.f32.mrb[54].mxu1 }
0x108c   :  { %v16771_v9 = vrot.slane %v16764_v52, %v28231_v57  ;;  %v24758_v58 = vpop.f32.mrb[55].mxu1 }
0x108e   :  { %v16772_v46 = vmul.f32 %v16771_v9, %v16315_v29  ;;  %v16773_v50 = vmul.f32 %v16771_v9, %v16316_v40  ;;  %v16774_v41 = vmul.f32 %v16771_v9, %v16317_v63  ;;  %v16775_v2 = vmul.f32 %v16771_v9, %v16318_v30 }
0x1090   :  { %v16783_v10 = vadd.f32 %v21417_v18, %v16772_v46  ;;  %v16784_v59 = vadd.f32 %v21417_v18, %v16773_v50  ;;  %v16785_v43 = vadd.f32 %v21417_v18, %v16774_v41  ;;  %v16786_v49 = vadd.f32 %v21417_v18, %v16775_v2 }
0x1092   :  { %v16804_v14 = vsel %vm8710_vm7, %v16783_v10, 0  ;;  %v16807_v56 = vsel %vm8710_vm7, %v16784_v59, 0  ;;  %v16810_v38 = vsel %vm8710_vm7, %v16785_v43, 0  ;;  %v16813_v57 = vsel %vm8710_vm7, %v16786_v49, 0 }
0x1093   :  { %v29919_v15 = vand.u32 4294901760, %v16804_v14  ;;  %v29921_v5 = vand.u32 4294901760, %v16807_v56  ;;  %v29923_v28 = vand.u32 4294901760, %v16810_v38  ;;  %v29925_v26 = vand.u32 4294901760, %v16813_v57 }
0x1095   :  { %v29928_v1 = vsub.f32 %v16804_v14, %v29919_v15  ;;  %v29931_v20 = vsub.f32 %v16807_v56, %v29921_v5  ;;  %v29934_v62 = vsub.f32 %v16810_v38, %v29923_v28  ;;  %v29937_v16 = vsub.f32 %v16813_v57, %v29925_v26 }
0x1097   :  { %v29940_v13 = vand.u32 4294901760, %v29928_v1  ;;  %v29943_v3 = vand.u32 4294901760, %v29931_v20  ;;  %v29946_v17 = vand.u32 4294901760, %v29934_v62  ;;  %v29949_v25 = vand.u32 4294901760, %v29937_v16 }
0x1099   :  { %v16891_v29 = vsub.f32 %v29928_v1, %v29940_v13  ;;  %v16901_v52 = vsub.f32 %v29931_v20, %v29943_v3  ;;  %v16911_v40 = vsub.f32 %v29934_v62, %v29946_v17  ;;  %v16921_v9 = vsub.f32 %v29937_v16, %v29949_v25 }
0x109b   :  { %v29957_v63 = vand.u32 4294901760, %v16891_v29  ;;  %v29959_v30 = vand.u32 4294901760, %v16901_v52  ;;  %v29967_v58 = vand.u32 4294901760, %v16911_v40  ;;  %v29973_v18 = vand.u32 4294901760, %v16921_v9 }
0x109d   :  { %24775 = vmatprep.mubr.f32.mxu0 %v29957_v63  ;;  %24907 = vmatprep.mubr.f32.mxu1 %v29957_v63 }
0x109e   :  { %24776 = vmatmul.mubr.f32.vlgmr.msra.gmra.mrb[40].mxu0 %v29959_v30  ;;  %24908 = vmatmul.mubr.f32.vlgmr.msra.gmra.mrb[56].mxu1 %v29959_v30 }
0x109f   :  { %26548 = vmatpush3.bf16.msra.mxu0 %v29823_v33  ;;  %26644 = vmatpush3.bf16.msra.mxu1 %v29825_v24  ;;  %v21444_v33 = vld [vmem:[%s30850_s24 + $0x90] sm:$0xff]  ;;  %v21445_v24 = vld [vmem:[%s30850_s24 + $0x98] sm:$0xff] }
0x10a0   :  { %24778 = vmatprep.mubr.f32.mxu0 %v29967_v58  ;;  %24910 = vmatprep.mubr.f32.mxu1 %v29967_v58 }
0x10a1   :  { %26550 = vmatprep.subr.bf16.mxu0 %v29836_v19  ;;  %26646 = vmatprep.subr.bf16.mxu1 %v29840_v11 }
0x10a2   :  { %24779 = vmatmul.mubr.f32.gmra.mrb[42].mxu0 %v29973_v18  ;;  %24911 = vmatmul.mubr.f32.gmra.mrb[58].mxu1 %v29973_v18 }
0x10a3   :  { %26552 = vmatpush3.bf16.msra.mxu0 %v29836_v19  ;;  %26648 = vmatpush3.bf16.msra.mxu1 %v29840_v11 }
0x10a4   :  { %24797 = vmatprep.mubr.f32.mxu0 %v29919_v15  ;;  %24929 = vmatprep.mubr.f32.mxu1 %v29919_v15 }
0x10a5   :  { %26554 = vmatprep.subr.bf16.mxu0 %v29843_v42  ;;  %26650 = vmatprep.subr.bf16.mxu1 %v29845_v45 }
0x10a7   :  { %26556 = vmatpush3.bf16.msra.mxu0 %v29843_v42  ;;  %26652 = vmatpush3.bf16.msra.mxu1 %v29845_v45  ;;  %v19810_v42 = vand.u32 4294901760, %v21444_v33  ;;  %v19813_v45 = vand.u32 4294901760, %v21445_v24 }
0x10a8   :  { %26558 = vmatprep.subr.bf16.mxu0 %v29847_v37  ;;  %26654 = vmatprep.subr.bf16.mxu1 %v29849_v48 }
0x10ab   :  { %26560 = vmatpush3.bf16.msra.mxu0 %v29847_v37  ;;  %26656 = vmatpush3.bf16.msra.mxu1 %v29849_v48  ;;  %v21442_v48 = vld [vmem:[%s30850_s24 + $0x80] sm:$0xff] }
0x10ac   :  { %26562 = vmatprep.subr.bf16.mxu0 %v29853_v47  ;;  %26658 = vmatprep.subr.bf16.mxu1 %v29857_v54  ;;  %v21446_v37 = vld [vmem:[%s30850_s24 + $0xa0] sm:$0xff] }
0x10ae   :  { %24798 = vmatmul.mubr.f32.vlgmr.msra.gmra.mrb[40].mxu0 %v29921_v5  ;;  %24930 = vmatmul.mubr.f32.vlgmr.msra.gmra.mrb[56].mxu1 %v29921_v5 }
0x10af   :  { %24800 = vmatprep.mubr.f32.mxu0 %v29923_v28  ;;  %26564 = vmatpush3.bf16.msra.mxu0 %v29853_v47  ;;  %v21449_v47 = vld [vmem:[%s30850_s24 + $0xb8] sm:$0xff] }
0x10b0   :  { %24932 = vmatprep.mubr.f32.mxu1 %v29923_v28  ;;  %26660 = vmatpush3.bf16.msra.mxu1 %v29857_v54 }
0x10b1   :  { %26566 = vmatprep.subr.bf16.mxu0 %v29861_v60  ;;  %26662 = vmatprep.subr.bf16.mxu1 %v29865_v7 }
0x10b2   :  { %24801 = vmatmul.mubr.f32.gmra.mrb[42].mxu0 %v29925_v26  ;;  %24933 = vmatmul.mubr.f32.gmra.mrb[58].mxu1 %v29925_v26 }
0x10b3   :  { %26568 = vmatpush3.bf16.msra.mxu0 %v29861_v60  ;;  %24819 = vmatprep.mubr.f32.mxu0 %v29928_v1 }
0x10b4   :  { %26664 = vmatpush3.bf16.msra.mxu1 %v29865_v7  ;;  %24951 = vmatprep.mubr.f32.mxu1 %v29928_v1  ;;  %v30119_v7 = vsub.f32 %v21444_v33, %v19810_v42 }
0x10b5   :  { %26570 = vmatprep.subr.bf16.mxu0 %v29867_v32  ;;  %26666 = vmatprep.subr.bf16.mxu1 %v29869_v27 }
0x10b7   :  { %26572 = vmatpush3.bf16.msra.mxu0 %v29867_v32  ;;  %v30121_v32 = vsub.f32 %v21445_v24, %v19813_v45 }
0x10b8   :  { %26668 = vmatpush3.bf16.msra.mxu1 %v29869_v27  ;;  %26574 = vmatprep.subr.bf16.mxu0 %v29871_v6 }
0x10b9   :  { %26670 = vmatprep.subr.bf16.mxu1 %v29873_v31 }
0x10bb   :  { %26576 = vmatpush3.bf16.msra.mxu0 %v29871_v6 }
0x10bc   :  { %26672 = vmatpush3.bf16.msra.mxu1 %v29873_v31  ;;  %26578 = vmatprep.subr.bf16.mxu0 %v29697_v21  ;;  %v19825_v31 = vand.u32 4294901760, %v21449_v47 }
0x10bd   :  { %26674 = vmatprep.subr.bf16.mxu1 %v29699_v61 }
0x10be   :  { %24820 = vmatmul.mubr.f32.vlgmr.msra.gmra.mrb[40].mxu0 %v29931_v20  ;;  %v30163_v49 = vsub.f32 %v21449_v47, %v19825_v31 }
0x10bf   :  { %24952 = vmatmul.mubr.f32.vlgmr.msra.gmra.mrb[56].mxu1 %v29931_v20  ;;  %24822 = vmatprep.mubr.f32.mxu0 %v29934_v62 }
0x10c0   :  { %26580 = vmatpush3.bf16.msra.mxu0 %v29697_v21  ;;  %24954 = vmatprep.mubr.f32.mxu1 %v29934_v62  ;;  %v19968_v40 = vand.u32 4294901760, %v30163_v49 }
0x10c1   :  { %26676 = vmatpush3.bf16.msra.mxu1 %v29699_v61  ;;  %26582 = vmatprep.subr.bf16.mxu0 %v29717_v39 }
0x10c2   :  { %24823 = vmatmul.mubr.f32.gmra.mrb[42].mxu0 %v29937_v16  ;;  %26678 = vmatprep.subr.bf16.mxu1 %v29719_v44 }
0x10c3   :  { %24955 = vmatmul.mubr.f32.gmra.mrb[58].mxu1 %v29937_v16  ;;  %24841 = vmatprep.mubr.f32.mxu0 %v29940_v13 }
0x10c4   :  { %26584 = vmatpush3.bf16.msra.mxu0 %v29717_v39  ;;  %24973 = vmatprep.mubr.f32.mxu1 %v29940_v13 }
0x10c5   :  { %26680 = vmatpush3.bf16.msra.mxu1 %v29719_v44  ;;  %26586 = vmatprep.subr.bf16.mxu0 %v29743_v53 }
0x10c6   :  { %26682 = vmatprep.subr.bf16.mxu1 %v29753_v4 }
0x10c8   :  { %26588 = vmatpush3.bf16.msra.mxu0 %v29743_v53 }
0x10c9   :  { %26684 = vmatpush3.bf16.msra.mxu1 %v29753_v4  ;;  %26590 = vmatprep.subr.bf16.mxu0 %v29786_v34 }
0x10ca   :  { %26686 = vmatprep.subr.bf16.mxu1 %v29795_v23 }
0x10cc   :  { %26592 = vmatpush3.bf16.msra.mxu0 %v29786_v34 }
0x10cd   :  { %26688 = vmatpush3.bf16.msra.mxu1 %v29795_v23  ;;  %26594 = vmatprep.subr.bf16.mxu0 %v29879_v0 }
0x10ce   :  { %26690 = vmatprep.subr.bf16.mxu1 %v29885_v55 }
0x10cf   :  { %24842 = vmatmul.mubr.f32.vlgmr.msra.gmra.mrb[40].mxu0 %v29943_v3 }
0x10d0   :  { %24974 = vmatmul.mubr.f32.vlgmr.msra.gmra.mrb[56].mxu1 %v29943_v3  ;;  %24844 = vmatprep.mubr.f32.mxu0 %v29946_v17 }
0x10d1   :  { %26596 = vmatpush3.bf16.msra.mxu0 %v29879_v0  ;;  %24976 = vmatprep.mubr.f32.mxu1 %v29946_v17 }
0x10d2   :  { %26692 = vmatpush3.bf16.msra.mxu1 %v29885_v55  ;;  %26598 = vmatprep.subr.bf16.mxu0 %v29891_v8 }
0x10d3   :  { %24845 = vmatmul.mubr.f32.gmra.mrb[42].mxu0 %v29949_v25  ;;  %26694 = vmatprep.subr.bf16.mxu1 %v29893_v22 }
0x10d4   :  { %24977 = vmatmul.mubr.f32.gmra.mrb[58].mxu1 %v29949_v25  ;;  %24863 = vmatprep.mubr.f32.mxu0 %v29919_v15 }
0x10d5   :  { %26600 = vmatpush3.bf16.msra.mxu0 %v29891_v8  ;;  %24995 = vmatprep.mubr.f32.mxu1 %v29919_v15  ;;  %v19933_v8 = vand.u32 4294901760, %v30119_v7 }
0x10d6   :  { %26696 = vmatpush3.bf16.msra.mxu1 %v29893_v22  ;;  %26602 = vmatprep.subr.bf16.mxu0 %v29895_v12  ;;  %v19940_v22 = vand.u32 4294901760, %v30121_v32 }
0x10d7   :  { %26698 = vmatprep.subr.bf16.mxu1 %v29897_v51  ;;  %v19934_v41 = vsub.f32 %v30119_v7, %v19933_v8 }
0x10d8   :  { %v19941_v2 = vsub.f32 %v30121_v32, %v19940_v22 }
0x10d9   :  { %26604 = vmatpush3.bf16.msra.mxu0 %v29895_v12  ;;  %v19935_v56 = vand.u32 4294901760, %v19934_v41 }
0x10da   :  { %26700 = vmatpush3.bf16.msra.mxu1 %v29897_v51  ;;  %26606 = vmatprep.subr.bf16.mxu0 %v29899_v35  ;;  %v19942_v38 = vand.u32 4294901760, %v19941_v2 }
0x10db   :  { %26702 = vmatprep.subr.bf16.mxu1 %v29901_v36 }
0x10dd   :  { %26608 = vmatpush3.bf16.msra.mxu0 %v29899_v35 }
0x10de   :  { %26704 = vmatpush3.bf16.msra.mxu1 %v29901_v36  ;;  %26610 = vmatprep.subr.bf16.mxu0 %v29697_v21 }
0x10df   :  { %26706 = vmatprep.subr.bf16.mxu1 %v29699_v61 }
0x10e0   :  { %24864 = vmatmul.mubr.f32.vlgmr.msra.gmra.mrb[40].mxu0 %v29921_v5 }
0x10e1   :  { %24996 = vmatmul.mubr.f32.vlgmr.msra.gmra.mrb[56].mxu1 %v29921_v5  ;;  %24866 = vmatprep.mubr.f32.mxu0 %v29923_v28 }
0x10e2   :  { %26612 = vmatpush3.bf16.msra.mxu0 %v29697_v21  ;;  %24998 = vmatprep.mubr.f32.mxu1 %v29923_v28  ;;  %v21443_v21 = vld [vmem:[%s30850_s24 + $0x88] sm:$0xff] }
0x10e3   :  { %26708 = vmatpush3.bf16.msra.mxu1 %v29699_v61  ;;  %26614 = vmatprep.subr.bf16.mxu0 %v29717_v39  ;;  %v19804_v61 = vand.u32 4294901760, %v21442_v48  ;;  %v19807_v11 = vand.u32 4294901760, %v21443_v21 }
0x10e4   :  { %24867 = vmatmul.mubr.f32.gmra.mrb[42].mxu0 %v29925_v26  ;;  %26710 = vmatprep.subr.bf16.mxu1 %v29719_v44 }
0x10e5   :  { %24999 = vmatmul.mubr.f32.gmra.mrb[58].mxu1 %v29925_v26  ;;  %24885 = vmatprep.mubr.f32.mxu0 %v29919_v15  ;;  %v30101_v19 = vpack.c.bf16 %v19807_v11, %v19804_v61 }
0x10e6   :  { %26616 = vmatpush3.bf16.msra.mxu0 %v29717_v39  ;;  %25017 = vmatprep.mubr.f32.mxu1 %v29919_v15  ;;  %v30096_v39 = vsub.f32 %v21442_v48, %v19804_v61  ;;  %v19969_v61 = vsub.f32 %v30163_v49, %v19968_v40 }
0x10e7   :  { %26712 = vmatpush3.bf16.msra.mxu1 %v29719_v44  ;;  %26618 = vmatprep.subr.bf16.mxu0 %v29743_v53  ;;  %v30098_v44 = vsub.f32 %v21443_v21, %v19807_v11 }
0x10e8   :  { %26714 = vmatprep.subr.bf16.mxu1 %v29753_v4  ;;  %v19919_v54 = vand.u32 4294901760, %v30096_v39  ;;  %v19970_v24 = vand.u32 4294901760, %v19969_v61 }
0x10e9   :  { %v19926_v60 = vand.u32 4294901760, %v30098_v44 }
0x10ea   :  { %26620 = vmatpush3.bf16.msra.mxu0 %v29743_v53  ;;  %v21447_v53 = vld [vmem:[%s30850_s24 + $0xa8] sm:$0xff]  ;;  %v19920_v0 = vsub.f32 %v30096_v39, %v19919_v54 }
0x10eb   :  { %26716 = vmatpush3.bf16.msra.mxu1 %v29753_v4  ;;  %26622 = vmatprep.subr.bf16.mxu0 %v29786_v34  ;;  %v21448_v4 = vld [vmem:[%s30850_s24 + $0xb0] sm:$0xff]  ;;  %v19819_v27 = vand.u32 4294901760, %v21447_v53  ;;  %v19927_v55 = vsub.f32 %v30098_v44, %v19926_v60 }
0x10ec   :  { %26718 = vmatprep.subr.bf16.mxu1 %v29795_v23  ;;  %v19822_v6 = vand.u32 4294901760, %v21448_v4  ;;  %v19921_v46 = vand.u32 4294901760, %v19920_v0 }
0x10ed   :  { %v30144_v35 = vsub.f32 %v21447_v53, %v19819_v27  ;;  %v19928_v50 = vand.u32 4294901760, %v19927_v55  ;;  %v21421_v53 = vld [vmem:[%s30853_s25 + $0x58] sm:$0xff] }
0x10ee   :  { %26624 = vmatpush3.bf16.msra.mxu0 %v29786_v34  ;;  %v30124_v34 = vpack.c.bf16 %v19813_v45, %v19810_v42  ;;  %v30148_v36 = vpack.c.bf16 %v19825_v31, %v19822_v6  ;;  %v30161_v43 = vsub.f32 %v21448_v4, %v19822_v6  ;;  %v26849_v45 = vpack.c.bf16 %v30098_v44, %v30096_v39  ;;  %v21424_v6 = vld [vmem:[%s30853_s25 + $0x70] sm:$0xff]  ;;  %v21425_v55 = vld [vmem:[%s30853_s25 + $0x78] sm:$0xff] }
0x10ef   :  { %26720 = vmatpush3.bf16.msra.mxu1 %v29795_v23  ;;  %v19816_v23 = vand.u32 4294901760, %v21446_v37  ;;  %v19954_v59 = vand.u32 4294901760, %v30144_v35  ;;  %v26833_v14 = vpack.c.bf16 %v19928_v50, %v19921_v46 }
0x10f0   :  { %26818 = vmatprep.subr.bf16.mxu1 %v30101_v19  ;;  %v19961_v52 = vand.u32 4294901760, %v30161_v43 }
0x10f1   :  { %24886 = vmatmul.mubr.f32.vlgmr.msra.gmra.mrb[40].mxu0 %v29921_v5  ;;  %v30140_v12 = vpack.c.bf16 %v19819_v27, %v19816_v23  ;;  %v30142_v51 = vsub.f32 %v21446_v37, %v19816_v23  ;;  %v19955_v29 = vsub.f32 %v30144_v35, %v19954_v59  ;;  %v21420_v37 = vld [vmem:[%s30853_s25 + $0x50] sm:$0xff] }
0x10f2   :  { %25018 = vmatmul.mubr.f32.vlgmr.msra.gmra.mrb[56].mxu1 %v29921_v5  ;;  %24888 = vmatprep.mubr.f32.mxu0 %v29923_v28  ;;  %v19962_v21 = vsub.f32 %v30161_v43, %v19961_v52 }
0x10f3   :  { %25020 = vmatprep.mubr.f32.mxu1 %v29923_v28  ;;  %26820 = vmatpush3.bf16.msra.mxu1 %v30101_v19  ;;  %v19947_v10 = vand.u32 4294901760, %v30142_v51  ;;  %v19956_v48 = vand.u32 4294901760, %v19955_v29 }
0x10f4   :  { %26822 = vmatprep.subr.bf16.mxu1 %v30124_v34  ;;  %v19963_v33 = vand.u32 4294901760, %v19962_v21 }
0x10f5   :  { %24889 = vmatmul.mubr.f32.gmra.mrb[42].mxu0 %v29925_v26  ;;  %v19948_v57 = vsub.f32 %v30142_v51, %v19947_v10 }
0x10f6   :  { %25021 = vmatmul.mubr.f32.gmra.mrb[58].mxu1 %v29925_v26  ;;  %v26845_v42 = vpack.c.bf16 %v19970_v24, %v19963_v33 }
0x10f7   :  { %26824 = vmatpush3.bf16.msra.mxu1 %v30124_v34  ;;  %25279 = vmatprep.mubr.f32.mxu1 %v29957_v63  ;;  %v26837_v63 = vpack.c.bf16 %v19942_v38, %v19935_v56  ;;  %v19949_v9 = vand.u32 4294901760, %v19948_v57 }
0x10f8   :  { %26826 = vmatprep.subr.bf16.mxu1 %v30140_v12 }
0x10f9   :  { %v26841_v11 = vpack.c.bf16 %v19956_v48, %v19949_v9 }
0x10fb   :  { %26828 = vmatpush3.bf16.msra.mxu1 %v30140_v12 }
0x10fc   :  { %26830 = vmatprep.subr.bf16.mxu1 %v30148_v36 }
0x10ff   :  { %26832 = vmatpush3.bf16.msra.mxu1 %v30148_v36 }
0x1100   :  { %26834 = vmatprep.subr.bf16.mxu1 %v26833_v14 }
0x1102   :  { %25280 = vmatmul.mubr.f32.vlgmr.msra.gmra.mrb[60].mxu1 %v29959_v30  ;;  %v26853_v30 = vpack.c.bf16 %v30121_v32, %v30119_v7 }
0x1103   :  { %25282 = vmatprep.mubr.f32.mxu1 %v29967_v58  ;;  %26836 = vmatpush3.bf16.msra.mxu1 %v26833_v14  ;;  %v26857_v58 = vpack.c.bf16 %v30144_v35, %v30142_v51  ;;  %v18187_v35 = vsel %vm3798_vm5, %v21425_v55, 0 }
0x1104   :  { %26838 = vmatprep.subr.bf16.mxu1 %v26837_v63  ;;  %v30316_v2 = vand.u32 4294901760, %v18187_v35 }
0x1106   :  { %25283 = vmatmul.mubr.f32.gmra.mrb[62].mxu1 %v29973_v18  ;;  %v26861_v18 = vpack.c.bf16 %v30163_v49, %v30161_v43  ;;  %v30339_v57 = vsub.f32 %v18187_v35, %v30316_v2 }
0x1107   :  { %26840 = vmatpush3.bf16.msra.mxu1 %v26837_v63  ;;  %25301 = vmatprep.mubr.f32.mxu1 %v29919_v15 }
0x1108   :  { %26842 = vmatprep.subr.bf16.mxu1 %v26841_v11 }
0x110b   :  { %26844 = vmatpush3.bf16.msra.mxu1 %v26841_v11 }
0x110c   :  { %26846 = vmatprep.subr.bf16.mxu1 %v26845_v42 }
0x110f   :  { %26848 = vmatpush3.bf16.msra.mxu1 %v26845_v42 }
0x1110   :  { %26850 = vmatprep.subr.bf16.mxu1 %v26849_v45 }
0x1112   :  { %25302 = vmatmul.mubr.f32.vlgmr.msra.gmra.mrb[60].mxu1 %v29921_v5 }
0x1113   :  { %25304 = vmatprep.mubr.f32.mxu1 %v29923_v28  ;;  %26852 = vmatpush3.bf16.msra.mxu1 %v26849_v45 }
0x1114   :  { %26854 = vmatprep.subr.bf16.mxu1 %v26853_v30 }
0x1116   :  { %25305 = vmatmul.mubr.f32.gmra.mrb[62].mxu1 %v29925_v26 }
0x1117   :  { %26856 = vmatpush3.bf16.msra.mxu1 %v26853_v30  ;;  %25323 = vmatprep.mubr.f32.mxu1 %v29928_v1  ;;  %v26881_v1 = vpack.c.bf16 %v19926_v60, %v19919_v54  ;;  %v21423_v60 = vld [vmem:[%s30853_s25 + $0x68] sm:$0xff] }
0x1118   :  { %26858 = vmatprep.subr.bf16.mxu1 %v26857_v58 }
0x111b   :  { %26860 = vmatpush3.bf16.msra.mxu1 %v26857_v58 }
0x111c   :  { %26862 = vmatprep.subr.bf16.mxu1 %v26861_v18 }
0x111f   :  { %26864 = vmatpush3.bf16.msra.mxu1 %v26861_v18 }
0x1120   :  { %26866 = vmatprep.subr.bf16.mxu1 %v30101_v19 }
0x1122   :  { %25324 = vmatmul.mubr.f32.vlgmr.msra.gmra.mrb[60].mxu1 %v29931_v20  ;;  %v26885_v20 = vpack.c.bf16 %v19940_v22, %v19933_v8  ;;  %v18184_v22 = vsel %vm3798_vm5, %v21424_v6, 0 }
0x1123   :  { %25326 = vmatprep.mubr.f32.mxu1 %v29934_v62  ;;  %26868 = vmatpush3.bf16.msra.mxu1 %v30101_v19  ;;  %v26889_v62 = vpack.c.bf16 %v19954_v59, %v19947_v10  ;;  %v30314_v41 = vand.u32 4294901760, %v18184_v22 }
0x1124   :  { %26870 = vmatprep.subr.bf16.mxu1 %v30124_v34 }
0x1125   :  { %v30336_v56 = vsub.f32 %v18184_v22, %v30314_v41 }
0x1126   :  { %25327 = vmatmul.mubr.f32.gmra.mrb[62].mxu1 %v29937_v16  ;;  %v26893_v16 = vpack.c.bf16 %v19968_v40, %v19961_v52 }
0x1127   :  { %26872 = vmatpush3.bf16.msra.mxu1 %v30124_v34  ;;  %25345 = vmatprep.mubr.f32.mxu1 %v29940_v13  ;;  %v21418_v13 = vld [vmem:[%s30853_s25 + $0x40] sm:$0xff]  ;;  %v18320_v30 = vand.u32 4294901760, %v30336_v56 }
0x1128   :  { %26874 = vmatprep.subr.bf16.mxu1 %v30140_v12 }
0x112b   :  { %26876 = vmatpush3.bf16.msra.mxu1 %v30140_v12 }
0x112c   :  { %26878 = vmatprep.subr.bf16.mxu1 %v30148_v36 }
0x112f   :  { %26880 = vmatpush3.bf16.msra.mxu1 %v30148_v36 }
0x1130   :  { %26882 = vmatprep.subr.bf16.mxu1 %v26881_v1 }
0x1132   :  { %25346 = vmatmul.mubr.f32.vlgmr.msra.gmra.mrb[60].mxu1 %v29943_v3  ;;  %v18166_v3 = vsel %vm3798_vm5, %v21418_v13, 0 }
0x1133   :  { %25348 = vmatprep.mubr.f32.mxu1 %v29946_v17  ;;  %26884 = vmatpush3.bf16.msra.mxu1 %v26881_v1  ;;  %v30243_v17 = vand.u32 4294901760, %v18166_v3 }
0x1134   :  { %26886 = vmatprep.subr.bf16.mxu1 %v26885_v20 }
0x1136   :  { %25349 = vmatmul.mubr.f32.gmra.mrb[62].mxu1 %v29949_v25  ;;  %v30247_v25 = vsub.f32 %v18166_v3, %v30243_v17 }
0x1137   :  { %26888 = vmatpush3.bf16.msra.mxu1 %v26885_v20  ;;  %25367 = vmatprep.mubr.f32.mxu1 %v29919_v15 }
0x1138   :  { %26890 = vmatprep.subr.bf16.mxu1 %v26889_v62  ;;  %v30879_v39 = vand.u32 4294901760, %v30247_v25 }
0x113b   :  { %26892 = vmatpush3.bf16.msra.mxu1 %v26889_v62  ;;  %v18330_v62 = vand.u32 4294901760, %v30339_v57 }
0x113c   :  { %26894 = vmatprep.subr.bf16.mxu1 %v26893_v16 }
0x113f   :  { %26896 = vmatpush3.bf16.msra.mxu1 %v26893_v16 }
0x1140   :  { %26898 = vmatprep.subr.bf16.mxu1 %v30101_v19 }
0x1142   :  { %25368 = vmatmul.mubr.f32.vlgmr.msra.gmra.mrb[60].mxu1 %v29921_v5 }
0x1143   :  { %25370 = vmatprep.mubr.f32.mxu1 %v29923_v28  ;;  %26900 = vmatpush3.bf16.msra.mxu1 %v30101_v19  ;;  %v21419_v19 = vld [vmem:[%s30853_s25 + $0x48] sm:$0xff] }
0x1144   :  { %26902 = vmatprep.subr.bf16.mxu1 %v30124_v34  ;;  %v18169_v4 = vsel %vm3798_vm5, %v21419_v19, 0 }
0x1145   :  { %v30273_v47 = vand.u32 4294901760, %v18169_v4 }
0x1146   :  { %25371 = vmatmul.mubr.f32.gmra.mrb[62].mxu1 %v29925_v26 }
0x1147   :  { %26904 = vmatpush3.bf16.msra.mxu1 %v30124_v34  ;;  %25389 = vmatprep.mubr.f32.mxu1 %v29919_v15  ;;  %v18261_v15 = vsub.f32 %v30247_v25, %v30879_v39  ;;  %v18181_v34 = vsel %vm3798_vm5, %v21423_v60, 0  ;;  %v30285_v23 = vsub.f32 %v18169_v4, %v30273_v47 }
0x1148   :  { %26906 = vmatprep.subr.bf16.mxu1 %v30140_v12  ;;  %v30301_v8 = vand.u32 4294901760, %v18181_v34 }
0x1149   :  { %v18262_v44 = vand.u32 4294901760, %v18261_v15 }
0x114a   :  { %v30312_v50 = vsub.f32 %v18181_v34, %v30301_v8 }
0x114b   :  { %26908 = vmatpush3.bf16.msra.mxu1 %v30140_v12  ;;  %25031 = vmatprep.mubr.f32.mxu0 %v18262_v44  ;;  %v30878_v12 = vand.u32 4294901760, %v30285_v23 }
0x114c   :  { %26910 = vmatprep.subr.bf16.mxu1 %v30148_v36  ;;  %v30874_v14 = vand.u32 4294901760, %v30312_v50 }
0x114d   :  { %v30321_v10 = vsub.f32 %v30285_v23, %v30878_v12 }
0x114e   :  { %v30352_v45 = vsub.f32 %v30312_v50, %v30874_v14 }
0x114f   :  { %26912 = vmatpush3.bf16.msra.mxu1 %v30148_v36  ;;  %v18272_v63 = vand.u32 4294901760, %v30321_v10  ;;  %v18321_v10 = vsub.f32 %v30336_v56, %v18320_v30 }
0x1152   :  { %25390 = vmatmul.mubr.f32.vlgmr.msra.gmra.mrb[60].mxu1 %v29921_v5  ;;  %v18172_v5 = vsel %vm3798_vm5, %v21420_v37, 0 }
0x1153   :  { %25392 = vmatprep.mubr.f32.mxu1 %v29923_v28  ;;  %v18175_v28 = vsel %vm3798_vm5, %v21421_v53, 0  ;;  %v30275_v54 = vand.u32 4294901760, %v18172_v5 }
0x1154   :  { %v30280_v7 = vand.u32 4294901760, %v18175_v28 }
0x1155   :  { %v30288_v27 = vsub.f32 %v18172_v5, %v30275_v54 }
0x1156   :  { %25393 = vmatmul.mubr.f32.gmra.mrb[62].mxu1 %v29925_v26  ;;  %v21422_v26 = vld [vmem:[%s30853_s25 + $0x60] sm:$0xff]  ;;  %v30294_v31 = vsub.f32 %v18175_v28, %v30280_v7 }
0x1157   :  { %v18178_v32 = vsel %vm3798_vm5, %v21422_v26, 0  ;;  %v30877_v51 = vand.u32 4294901760, %v30288_v27 }
0x1158   :  { %v30296_v0 = vand.u32 4294901760, %v18178_v32  ;;  %v30876_v36 = vand.u32 4294901760, %v30294_v31 }
0x1159   :  { %v30326_v59 = vsub.f32 %v30288_v27, %v30877_v51 }
0x115a   :  { %v30309_v46 = vsub.f32 %v18178_v32, %v30296_v0  ;;  %v30331_v43 = vsub.f32 %v30294_v31, %v30876_v36 }
0x115b   :  { %v18282_v9 = vand.u32 4294901760, %v30326_v59  ;;  %v18331_v59 = vsub.f32 %v30339_v57, %v18330_v62 }
0x115c   :  { %v30875_v49 = vand.u32 4294901760, %v30309_v46  ;;  %v18292_v11 = vand.u32 4294901760, %v30331_v43  ;;  %v30916_v43 = vand.u32 4294901760, %v30288_v27 }
0x115e   :  { %v30347_v33 = vsub.f32 %v30309_v46, %v30875_v49 }
0x11c4   :  { %v24887_v38 = vpop.f32.mrb[40].mxu0 }
0x11c5   :  { %v19003_v29 = vand.u32 4294901760, %v24887_v38  ;;  %v25019_v52 = vpop.f32.mrb[56].mxu1  ;;  %v17459_v40 = vpop.f32.mrb[41].mxu0 }
0x11c6   :  { %v18193_v48 = vand.u32 4294901760, %v25019_v52  ;;  %v19000_v21 = vand.u32 4294901760, %v17459_v40  ;;  %v18143_v61 = vpop.f32.mrb[57].mxu1 }
0x11c7   :  { %v19157_v24 = vsub.f32 %v24887_v38, %v19003_v29  ;;  %v18190_v42 = vand.u32 4294901760, %v18143_v61 }
0x11c8   :  { %v18347_v58 = vsub.f32 %v25019_v52, %v18193_v48  ;;  %v30355_v18 = vpack.c.bf16 %v19003_v29, %v19000_v21  ;;  %v19150_v1 = vsub.f32 %v17459_v40, %v19000_v21  ;;  %v24890_v20 = vpop.f32.mrb[42].mxu0 }
0x11c9   :  { %v19158_v16 = vand.u32 4294901760, %v19157_v24  ;;  %v30358_v13 = vpack.c.bf16 %v18193_v48, %v18190_v42  ;;  %v18340_v3 = vsub.f32 %v18143_v61, %v18190_v42  ;;  %v19009_v15 = vand.u32 4294901760, %v24890_v20  ;;  %v25022_v44 = vpop.f32.mrb[58].mxu1  ;;  %v17471_v19 = vpop.f32.mrb[43].mxu0 }
0x11ca   :  { %v18348_v37 = vand.u32 4294901760, %v18347_v58  ;;  %v19151_v53 = vand.u32 4294901760, %v19150_v1  ;;  %v18199_v4 = vand.u32 4294901760, %v25022_v44  ;;  %v19006_v5 = vand.u32 4294901760, %v17471_v19  ;;  %v18155_v28 = vpop.f32.mrb[59].mxu1 }
0x11cb   :  { %v19159_v26 = vsub.f32 %v19157_v24, %v19158_v16  ;;  %v18341_v60 = vand.u32 4294901760, %v18340_v3  ;;  %v19171_v32 = vsub.f32 %v24890_v20, %v19009_v15  ;;  %v18196_v34 = vand.u32 4294901760, %v18155_v28  ;;  %26722 = vmatprep.subr.bf16.mxu0 %v30358_v13 }
0x11cc   :  { %v18349_v6 = vsub.f32 %v18347_v58, %v18348_v37  ;;  %v19152_v55 = vsub.f32 %v19150_v1, %v19151_v53  ;;  %v18361_v22 = vsub.f32 %v25022_v44, %v18199_v4  ;;  %v30361_v35 = vpack.c.bf16 %v19009_v15, %v19006_v5  ;;  %26724 = vmatpush3.bf16.msra.mxu0 %v30358_v13 }
0x11cd   :  { %v18342_v38 = vsub.f32 %v18340_v3, %v18341_v60  ;;  %v19172_v29 = vand.u32 4294901760, %v19171_v32  ;;  %v19164_v52 = vsub.f32 %v17471_v19, %v19006_v5  ;;  %v30364_v40 = vpack.c.bf16 %v18199_v4, %v18196_v34 }
0x11ce   :  { %v18362_v48 = vand.u32 4294901760, %v18361_v22  ;;  %v18354_v21 = vsub.f32 %v18155_v28, %v18196_v34  ;;  %v18350_v61 = vand.u32 4294901760, %v18349_v6  ;;  %v26737_v42 = vpack.c.bf16 %v18347_v58, %v18340_v3 }
0x11cf   :  { %v19173_v20 = vsub.f32 %v19171_v32, %v19172_v29  ;;  %v19165_v14 = vand.u32 4294901760, %v19164_v52  ;;  %26726 = vmatprep.subr.bf16.mxu0 %v30364_v40  ;;  %v18343_v49 = vand.u32 4294901760, %v18342_v38  ;;  %v30367_v36 = vpack.c.bf16 %v18348_v37, %v18341_v60 }
0x11d0   :  { %v18363_v15 = vsub.f32 %v18361_v22, %v18362_v48  ;;  %v18355_v44 = vand.u32 4294901760, %v18354_v21  ;;  %26728 = vmatpush3.bf16.msra.mxu0 %v30364_v40  ;;  %v26741_v51 = vpack.c.bf16 %v18361_v22, %v18354_v21  ;;  %v19153_v12 = vand.u32 4294901760, %v19152_v55  ;;  %v16792_v55 = vld [vmem:[%s30853_s25 + $0x28] sm:$0xff] }
0x11d1   :  { %v19166_v19 = vsub.f32 %v19164_v52, %v19165_v14  ;;  %v26729_v4 = vpack.c.bf16 %v18350_v61, %v18343_v49  ;;  %v19160_v5 = vand.u32 4294901760, %v19159_v26  ;;  %v19174_v39 = vand.u32 4294901760, %v19173_v20 }
0x11d2   :  { %v18356_v28 = vsub.f32 %v18354_v21, %v18355_v44  ;;  %v18364_v34 = vand.u32 4294901760, %v18363_v15  ;;  %v26757_v58 = vpack.c.bf16 %v18362_v48, %v18355_v44  ;;  %v30370_v3 = vpack.c.bf16 %v19157_v24, %v19150_v1  ;;  %v16793_v48 = vld [vmem:[%s30853_s25 + $0x30] sm:$0xff]  ;;  %v16794_v44 = vld [vmem:[%s30853_s25 + $0x38] sm:$0xff] }
0x11d3   :  { %25032 = vmatmul.mubr.f32.vlgmr.msra.gmra.mrb[44].mxu0 %v18272_v63  ;;  %26730 = vmatprep.subr.bf16.mxu0 %v26729_v4  ;;  %v30374_v37 = vpack.c.bf16 %v19160_v5, %v19153_v12  ;;  %v19167_v60 = vand.u32 4294901760, %v19166_v19  ;;  %v30376_v6 = vpack.c.bf16 %v19171_v32, %v19164_v52  ;;  %v30378_v22 = vpack.c.bf16 %v19158_v16, %v19151_v53  ;;  %v16791_v53 = vld [vmem:[%s30853_s25 + $0x20] sm:$0xff] }
0x11d4   :  { %26732 = vmatpush3.bf16.msra.mxu0 %v26729_v4  ;;  %25034 = vmatprep.mubr.f32.mxu0 %v18282_v9  ;;  %v18357_v49 = vand.u32 4294901760, %v18356_v28  ;;  %v18302_v26 = vand.u32 4294901760, %v30347_v33  ;;  %v30386_v63 = vpack.c.bf16 %v19172_v29, %v19165_v14  ;;  %v18312_v1 = vand.u32 4294901760, %v30352_v45 }
0x11d5   :  { %v30388_v12 = vpack.c.bf16 %v19174_v39, %v19167_v60  ;;  %v18322_v9 = vand.u32 4294901760, %v18321_v10  ;;  %v18332_v14 = vand.u32 4294901760, %v18331_v59  ;;  %v30914_v39 = vand.u32 4294901760, %v30247_v25 }
0x11d6   :  { %v26733_v24 = vpack.c.bf16 %v18364_v34, %v18357_v49  ;;  %v30918_v33 = vand.u32 4294901760, %v30309_v46  ;;  %v18988_v52 = vsel %vm3798_vm5, %v16791_v53, 0  ;;  %v18991_v21 = vsel %vm3798_vm5, %v16792_v55, 0 }
0x11d7   :  { %25035 = vmatmul.mubr.f32.gmra.mrb[46].mxu0 %v18292_v11  ;;  %v30917_v11 = vand.u32 4294901760, %v30294_v31  ;;  %v30500_v61 = vand.u32 4294901760, %v18988_v52  ;;  %v18994_v15 = vsel %vm3798_vm5, %v16793_v48, 0  ;;  %v30514_v5 = vand.u32 4294901760, %v18991_v21 }
0x11d8   :  { %26734 = vmatprep.subr.bf16.mxu0 %v26733_v24  ;;  %25037 = vmatprep.mubr.f32.mxu0 %v18302_v26  ;;  %v30522_v49 = vand.u32 4294901760, %v18994_v15  ;;  %v18997_v26 = vsel %vm3798_vm5, %v16794_v44, 0 }
0x11d9   :  { %26736 = vmatpush3.bf16.msra.mxu0 %v26733_v24  ;;  %v30520_v60 = vsub.f32 %v18988_v52, %v30500_v61 }
0x11da   :  { %26738 = vmatprep.subr.bf16.mxu0 %v26737_v42 }
0x11db   :  { %25038 = vmatmul.mubr.f32.gmra.mrb[48].mxu0 %v18312_v1 }
0x11dc   :  { %25040 = vmatprep.mubr.f32.mxu0 %v18322_v9 }
0x11df   :  { %25041 = vmatmul.mubr.f32.gmra.mrb[50].mxu0 %v18332_v14 }
0x11e0   :  { %25051 = vmatprep.mubr.f32.mxu0 %v30243_v17 }
0x11e3   :  { %25052 = vmatmul.mubr.f32.vlgmr.msra.gmra.mrb[44].mxu0 %v30273_v47 }
0x11e4   :  { %26740 = vmatpush3.bf16.msra.mxu0 %v26737_v42  ;;  %25054 = vmatprep.mubr.f32.mxu0 %v30275_v54 }
0x11e5   :  { %26742 = vmatprep.subr.bf16.mxu0 %v26741_v51 }
0x11e7   :  { %25055 = vmatmul.mubr.f32.gmra.mrb[46].mxu0 %v30280_v7 }
0x11e8   :  { %26744 = vmatpush3.bf16.msra.mxu0 %v26741_v51  ;;  %25057 = vmatprep.mubr.f32.mxu0 %v30296_v0  ;;  %v30915_v51 = vand.u32 4294901760, %v30285_v23 }
0x11e9   :  { %26746 = vmatprep.subr.bf16.mxu0 %v30358_v13 }
0x11eb   :  { %25058 = vmatmul.mubr.f32.gmra.mrb[48].mxu0 %v30301_v8 }
0x11ec   :  { %25060 = vmatprep.mubr.f32.mxu0 %v30314_v41 }
0x11ef   :  { %25061 = vmatmul.mubr.f32.gmra.mrb[50].mxu0 %v30316_v2 }
0x11f0   :  { %25071 = vmatprep.mubr.f32.mxu0 %v30247_v25  ;;  %v30919_v25 = vand.u32 4294901760, %v30312_v50 }
0x11f3   :  { %25072 = vmatmul.mubr.f32.vlgmr.msra.gmra.mrb[44].mxu0 %v30285_v23  ;;  %v16787_v23 = vld [vmem:[%s30853_s25] sm:$0xff] }
0x11f4   :  { %26748 = vmatpush3.bf16.msra.mxu0 %v30358_v13  ;;  %25074 = vmatprep.mubr.f32.mxu0 %v30288_v27  ;;  %v16788_v27 = vld [vmem:[%s30853_s25 + $0x8] sm:$0xff] }
0x11f5   :  { %26750 = vmatprep.subr.bf16.mxu0 %v30364_v40 }
0x11f7   :  { %25075 = vmatmul.mubr.f32.gmra.mrb[46].mxu0 %v30294_v31  ;;  %v18976_v31 = vsel %vm3798_vm5, %v16787_v23, 0 }
0x11f8   :  { %26752 = vmatpush3.bf16.msra.mxu0 %v30364_v40  ;;  %25077 = vmatprep.mubr.f32.mxu0 %v30309_v46  ;;  %v30449_v46 = vand.u32 4294901760, %v18976_v31 }
0x11f9   :  { %26754 = vmatprep.subr.bf16.mxu0 %v30367_v36 }
0x11fb   :  { %25078 = vmatmul.mubr.f32.gmra.mrb[48].mxu0 %v30312_v50  ;;  %v16789_v50 = vld [vmem:[%s30853_s25 + $0x10] sm:$0xff] }
0x11fc   :  { %25080 = vmatprep.mubr.f32.mxu0 %v30336_v56  ;;  %v18982_v45 = vsel %vm3798_vm5, %v16789_v50, 0 }
0x11fd   :  { %v30471_v16 = vand.u32 4294901760, %v18982_v45 }
0x11ff   :  { %25081 = vmatmul.mubr.f32.gmra.mrb[50].mxu0 %v30339_v57  ;;  %v30461_v57 = vsub.f32 %v18976_v31, %v30449_v46  ;;  %v19110_v31 = vand.u32 4294901760, %v30520_v60 }
0x1200   :  { %25091 = vmatprep.mubr.f32.mxu0 %v30914_v39 }
0x1201   :  { %v19070_v32 = vand.u32 4294901760, %v30461_v57 }
0x1203   :  { %25092 = vmatmul.mubr.f32.vlgmr.msra.gmra.mrb[44].mxu0 %v30915_v51  ;;  %v30533_v51 = vsub.f32 %v18991_v21, %v30514_v5 }
0x1204   :  { %26756 = vmatpush3.bf16.msra.mxu0 %v30367_v36  ;;  %25094 = vmatprep.mubr.f32.mxu0 %v30916_v43  ;;  %v18979_v36 = vsel %vm3798_vm5, %v16788_v27, 0 }
0x1205   :  { %26758 = vmatprep.subr.bf16.mxu0 %v26757_v58  ;;  %v30457_v56 = vand.u32 4294901760, %v18979_v36  ;;  %v19120_v55 = vand.u32 4294901760, %v30533_v51 }
0x1207   :  { %25095 = vmatmul.mubr.f32.gmra.mrb[46].mxu0 %v30917_v11 }
0x1208   :  { %26760 = vmatpush3.bf16.msra.mxu0 %v26757_v58  ;;  %25097 = vmatprep.mubr.f32.mxu0 %v30918_v33  ;;  %v30536_v33 = vand.u32 4294901760, %v18997_v26 }
0x1209   :  { %26762 = vmatprep.subr.bf16.mxu0 %v30358_v13 }
0x120a   :  { %v30555_v48 = vsub.f32 %v18997_v26, %v30536_v33 }
0x120b   :  { %25098 = vmatmul.mubr.f32.gmra.mrb[48].mxu0 %v30919_v25 }
0x120c   :  { %25100 = vmatprep.mubr.f32.mxu0 %v18320_v30  ;;  %v16790_v30 = vld [vmem:[%s30853_s25 + $0x18] sm:$0xff] }
0x120f   :  { %25101 = vmatmul.mubr.f32.gmra.mrb[50].mxu0 %v18330_v62  ;;  %v30469_v62 = vsub.f32 %v18979_v36, %v30457_v56  ;;  %v30543_v36 = vsub.f32 %v18994_v15, %v30522_v49  ;;  %v19111_v15 = vsub.f32 %v30520_v60, %v19110_v31 }
0x1210   :  { %25111 = vmatprep.mubr.f32.mxu0 %v30243_v17 }
0x1211   :  { %v19080_v38 = vand.u32 4294901760, %v30469_v62  ;;  %v19130_v44 = vand.u32 4294901760, %v30543_v36 }
0x1213   :  { %25112 = vmatmul.mubr.f32.vlgmr.msra.gmra.mrb[44].mxu0 %v30273_v47  ;;  %v19081_v20 = vsub.f32 %v30469_v62, %v19080_v38 }
0x1214   :  { %26764 = vmatpush3.bf16.msra.mxu0 %v30358_v13  ;;  %25114 = vmatprep.mubr.f32.mxu0 %v30275_v54  ;;  %v18985_v13 = vsel %vm3798_vm5, %v16790_v30, 0 }
0x1215   :  { %26766 = vmatprep.subr.bf16.mxu0 %v30364_v40  ;;  %v30484_v29 = vand.u32 4294901760, %v18985_v13 }
0x1217   :  { %25115 = vmatmul.mubr.f32.gmra.mrb[46].mxu0 %v30280_v7 }
0x1218   :  { %26768 = vmatpush3.bf16.msra.mxu0 %v30364_v40  ;;  %25117 = vmatprep.mubr.f32.mxu0 %v30296_v0  ;;  %v30488_v40 = vsub.f32 %v18982_v45, %v30471_v16 }
0x1219   :  { %26770 = vmatprep.subr.bf16.mxu0 %v30355_v18 }
0x121a   :  { %v19090_v4 = vand.u32 4294901760, %v30488_v40 }
0x121b   :  { %25118 = vmatmul.mubr.f32.gmra.mrb[48].mxu0 %v30301_v8 }
0x121c   :  { %25120 = vmatprep.mubr.f32.mxu0 %v30314_v41 }
0x121f   :  { %25121 = vmatmul.mubr.f32.gmra.mrb[50].mxu0 %v30316_v2 }
0x1220   :  { %25131 = vmatprep.mubr.f32.mxu0 %v30243_v17  ;;  %v19071_v17 = vsub.f32 %v30461_v57, %v19070_v32 }
0x1222   :  { %v19072_v34 = vand.u32 4294901760, %v19071_v17 }
0x1223   :  { %25132 = vmatmul.mubr.f32.vlgmr.msra.gmra.mrb[44].mxu0 %v30273_v47  ;;  %v30507_v47 = vsub.f32 %v18985_v13, %v30484_v29 }
0x1224   :  { %26772 = vmatpush3.bf16.msra.mxu0 %v30355_v18  ;;  %25134 = vmatprep.mubr.f32.mxu0 %v30275_v54 }
0x1225   :  { %26774 = vmatprep.subr.bf16.mxu0 %v30361_v35  ;;  %v25391_v42 = vpop.f32.mrb[60].mxu1  ;;  %v19100_v59 = vand.u32 4294901760, %v30507_v47 }
0x1226   :  { %v20497_v19 = vand.u32 4294901760, %v25391_v42  ;;  %v20447_v54 = vpop.f32.mrb[61].mxu1 }
0x1227   :  { %v20494_v28 = vand.u32 4294901760, %v20447_v54  ;;  %25135 = vmatmul.mubr.f32.gmra.mrb[46].mxu0 %v30280_v7  ;;  %v19082_v7 = vand.u32 4294901760, %v19081_v20  ;;  %v19101_v53 = vsub.f32 %v30507_v47, %v19100_v59 }
0x1228   :  { %v20651_v58 = vsub.f32 %v25391_v42, %v20497_v19  ;;  %26776 = vmatpush3.bf16.msra.mxu0 %v30361_v35  ;;  %25137 = vmatprep.mubr.f32.mxu0 %v30296_v0  ;;  %v19091_v0 = vsub.f32 %v30488_v40, %v19090_v4 }
0x1229   :  { %v30525_v10 = vpack.c.bf16 %v20497_v19, %v20494_v28  ;;  %v20644_v24 = vsub.f32 %v20447_v54, %v20494_v28  ;;  %26778 = vmatprep.subr.bf16.mxu0 %v30374_v37  ;;  %v25394_v1 = vpop.f32.mrb[62].mxu1  ;;  %v19102_v26 = vand.u32 4294901760, %v19101_v53 }
0x122a   :  { %v20652_v9 = vand.u32 4294901760, %v20651_v58  ;;  %v20503_v14 = vand.u32 4294901760, %v25394_v1  ;;  %v20459_v39 = vpop.f32.mrb[63].mxu1  ;;  %v19092_v20 = vand.u32 4294901760, %v19091_v0 }
0x122b   :  { %v20645_v43 = vand.u32 4294901760, %v20644_v24  ;;  %v20500_v11 = vand.u32 4294901760, %v20459_v39  ;;  %25138 = vmatmul.mubr.f32.gmra.mrb[48].mxu0 %v30301_v8  ;;  %v30538_v25 = vpack.c.bf16 %v20651_v58, %v20644_v24 }
0x122c   :  { %v20653_v23 = vsub.f32 %v20651_v58, %v20652_v9  ;;  %v20665_v27 = vsub.f32 %v25394_v1, %v20503_v14  ;;  %25140 = vmatprep.mubr.f32.mxu0 %v30314_v41  ;;  %v19112_v1 = vand.u32 4294901760, %v19111_v15 }
0x122d   :  { %v20646_v50 = vsub.f32 %v20644_v24, %v20645_v43  ;;  %v30545_v45 = vpack.c.bf16 %v20503_v14, %v20500_v11  ;;  %v20658_v30 = vsub.f32 %v20459_v39, %v20500_v11  ;;  %v30547_v13 = vpack.c.bf16 %v20652_v9, %v20645_v43 }
0x122e   :  { %v20666_v8 = vand.u32 4294901760, %v20665_v27  ;;  %v20654_v52 = vand.u32 4294901760, %v20653_v23  ;;  %v19140_v24 = vand.u32 4294901760, %v30555_v48  ;;  %v19131_v9 = vsub.f32 %v30543_v36, %v19130_v44 }
0x122f   :  { %v20659_v41 = vand.u32 4294901760, %v20658_v30  ;;  %25141 = vmatmul.mubr.f32.gmra.mrb[50].mxu0 %v30316_v2  ;;  %v20647_v17 = vand.u32 4294901760, %v20646_v50  ;;  %v30557_v21 = vpack.c.bf16 %v20665_v27, %v20658_v30 }
0x1230   :  { %v20667_v42 = vsub.f32 %v20665_v27, %v20666_v8  ;;  %25151 = vmatprep.mubr.f32.mxu0 %v19072_v34  ;;  %v19121_v34 = vsub.f32 %v30533_v51, %v19120_v55  ;;  %v19132_v0 = vand.u32 4294901760, %v19131_v9 }
0x1231   :  { %v20660_v19 = vsub.f32 %v20658_v30, %v20659_v41  ;;  %v30563_v54 = vpack.c.bf16 %v20654_v52, %v20647_v17  ;;  %v30565_v28 = vpack.c.bf16 %v20666_v8, %v20659_v41 }
0x1232   :  { %v20668_v2 = vand.u32 4294901760, %v20667_v42  ;;  %v19122_v39 = vand.u32 4294901760, %v19121_v34 }
0x1233   :  { %v20661_v58 = vand.u32 4294901760, %v20660_v19  ;;  %25152 = vmatmul.mubr.f32.vlgmr.msra.gmra.mrb[44].mxu0 %v19082_v7  ;;  %v19141_v7 = vsub.f32 %v30555_v48, %v19140_v24 }
0x1234   :  { %26780 = vmatpush3.bf16.msra.mxu0 %v30374_v37  ;;  %25154 = vmatprep.mubr.f32.mxu0 %v19092_v20 }
0x1235   :  { %26782 = vmatprep.subr.bf16.mxu0 %v30388_v12  ;;  %v30574_v14 = vpack.c.bf16 %v20668_v2, %v20661_v58  ;;  %v19142_v37 = vand.u32 4294901760, %v19141_v7 }
0x1237   :  { %25155 = vmatmul.mubr.f32.gmra.mrb[46].mxu0 %v19102_v26 }
0x1238   :  { %26784 = vmatpush3.bf16.msra.mxu0 %v30388_v12  ;;  %25157 = vmatprep.mubr.f32.mxu0 %v19112_v1 }
0x1239   :  { %26786 = vmatprep.subr.bf16.mxu0 %v30370_v3 }
0x123b   :  { %25158 = vmatmul.mubr.f32.gmra.mrb[48].mxu0 %v19122_v39 }
0x123c   :  { %25160 = vmatprep.mubr.f32.mxu0 %v19132_v0 }
0x123f   :  { %25161 = vmatmul.mubr.f32.gmra.mrb[50].mxu0 %v19142_v37 }
0x1240   :  { %25171 = vmatprep.mubr.f32.mxu0 %v30449_v46 }
0x1243   :  { %25172 = vmatmul.mubr.f32.vlgmr.msra.gmra.mrb[44].mxu0 %v30457_v56 }
0x1244   :  { %26788 = vmatpush3.bf16.msra.mxu0 %v30370_v3  ;;  %25174 = vmatprep.mubr.f32.mxu0 %v30471_v16  ;;  %v21434_v3 = vld [vmem:[%s30853_s25 + $0x80] sm:$0xff] }
0x1245   :  { %26790 = vmatprep.subr.bf16.mxu0 %v30376_v6 }
0x1247   :  { %25175 = vmatmul.mubr.f32.gmra.mrb[46].mxu0 %v30484_v29 }
0x1248   :  { %26792 = vmatpush3.bf16.msra.mxu0 %v30376_v6  ;;  %25177 = vmatprep.mubr.f32.mxu0 %v30500_v61  ;;  %v20470_v6 = vsel %vm3798_vm5, %v21434_v3, 0 }
0x1249   :  { %26794 = vmatprep.subr.bf16.mxu0 %v30355_v18 }
0x124b   :  { %25178 = vmatmul.mubr.f32.gmra.mrb[48].mxu0 %v30514_v5 }
0x124c   :  { %25180 = vmatprep.mubr.f32.mxu0 %v30522_v49 }
0x124f   :  { %25181 = vmatmul.mubr.f32.gmra.mrb[50].mxu0 %v30536_v33 }
0x1250   :  { %25191 = vmatprep.mubr.f32.mxu0 %v30461_v57  ;;  %v21437_v57 = vld [vmem:[%s30853_s25 + $0x98] sm:$0xff] }
0x1253   :  { %25192 = vmatmul.mubr.f32.vlgmr.msra.gmra.mrb[44].mxu0 %v30469_v62  ;;  %v21438_v62 = vld [vmem:[%s30853_s25 + $0xa0] sm:$0xff] }
0x1254   :  { %26796 = vmatpush3.bf16.msra.mxu0 %v30355_v18  ;;  %25194 = vmatprep.mubr.f32.mxu0 %v30488_v40 }
0x1255   :  { %26798 = vmatprep.subr.bf16.mxu0 %v30361_v35 }
0x1257   :  { %25195 = vmatmul.mubr.f32.gmra.mrb[46].mxu0 %v30507_v47  ;;  %v20479_v47 = vsel %vm3798_vm5, %v21437_v57, 0 }
0x1258   :  { %26800 = vmatpush3.bf16.msra.mxu0 %v30361_v35  ;;  %25197 = vmatprep.mubr.f32.mxu0 %v30520_v60  ;;  %v21439_v60 = vld [vmem:[%s30853_s25 + $0xa8] sm:$0xff]  ;;  %v30672_v43 = vand.u32 4294901760, %v20479_v47 }
0x1259   :  { %26802 = vmatprep.subr.bf16.mxu0 %v30378_v22  ;;  %v20485_v27 = vsel %vm3798_vm5, %v21439_v60, 0 }
0x125a   :  { %v30693_v50 = vsub.f32 %v20479_v47, %v30672_v43  ;;  %v30695_v30 = vand.u32 4294901760, %v20485_v27 }
0x125b   :  { %25198 = vmatmul.mubr.f32.gmra.mrb[48].mxu0 %v30533_v51 }
0x125c   :  { %25200 = vmatprep.mubr.f32.mxu0 %v30543_v36  ;;  %v20594_v41 = vand.u32 4294901760, %v30693_v50 }
0x125f   :  { %25201 = vmatmul.mubr.f32.gmra.mrb[50].mxu0 %v30555_v48 }
0x1260   :  { %25211 = vmatprep.mubr.f32.mxu0 %v19070_v32 }
0x1263   :  { %25212 = vmatmul.mubr.f32.vlgmr.msra.gmra.mrb[44].mxu0 %v19080_v38 }
0x1264   :  { %26804 = vmatpush3.bf16.msra.mxu0 %v30378_v22  ;;  %25214 = vmatprep.mubr.f32.mxu0 %v19090_v4  ;;  %v21436_v22 = vld [vmem:[%s30853_s25 + $0x90] sm:$0xff]  ;;  %v20482_v4 = vsel %vm3798_vm5, %v21438_v62, 0 }
0x1265   :  { %26806 = vmatprep.subr.bf16.mxu0 %v30386_v63  ;;  %v20476_v12 = vsel %vm3798_vm5, %v21436_v22, 0  ;;  %v30679_v23 = vand.u32 4294901760, %v20482_v4 }
0x1266   :  { %v30657_v40 = vand.u32 4294901760, %v20476_v12 }
0x1267   :  { %25215 = vmatmul.mubr.f32.gmra.mrb[46].mxu0 %v19100_v59  ;;  %v21440_v59 = vld [vmem:[%s30853_s25 + $0xb0] sm:$0xff]  ;;  %v30701_v53 = vsub.f32 %v20482_v4, %v30679_v23 }
0x1268   :  { %26808 = vmatpush3.bf16.msra.mxu0 %v30386_v63  ;;  %25217 = vmatprep.mubr.f32.mxu0 %v19110_v31  ;;  %v30639_v63 = vand.u32 4294901760, %v20470_v6  ;;  %v30677_v11 = vsub.f32 %v20476_v12, %v30657_v40  ;;  %v21441_v31 = vld [vmem:[%s30853_s25 + $0xb8] sm:$0xff] }
0x1269   :  { %26810 = vmatprep.subr.bf16.mxu0 %v30355_v18 }
0x126a   :  { %v30652_v32 = vsub.f32 %v20470_v6, %v30639_v63  ;;  %v20584_v8 = vand.u32 4294901760, %v30677_v11 }
0x126b   :  { %25218 = vmatmul.mubr.f32.gmra.mrb[48].mxu0 %v19120_v55  ;;  %v20491_v55 = vsel %vm3798_vm5, %v21441_v31, 0 }
0x126c   :  { %25220 = vmatprep.mubr.f32.mxu0 %v19130_v44  ;;  %v20564_v51 = vand.u32 4294901760, %v30652_v32  ;;  %v30715_v48 = vand.u32 4294901760, %v20491_v55  ;;  %v20585_v42 = vsub.f32 %v30677_v11, %v20584_v8  ;;  %v20595_v44 = vsub.f32 %v30693_v50, %v20594_v41 }
0x126e   :  { %v20586_v2 = vand.u32 4294901760, %v20585_v42  ;;  %v20596_v34 = vand.u32 4294901760, %v20595_v44 }
0x126f   :  { %25221 = vmatmul.mubr.f32.gmra.mrb[50].mxu0 %v19140_v24 }
0x1270   :  { %25231 = vmatprep.mubr.f32.mxu0 %v30449_v46 }
0x1273   :  { %25232 = vmatmul.mubr.f32.vlgmr.msra.gmra.mrb[44].mxu0 %v30457_v56 }
0x1274   :  { %26812 = vmatpush3.bf16.msra.mxu0 %v30355_v18  ;;  %25234 = vmatprep.mubr.f32.mxu0 %v30471_v16  ;;  %v21435_v18 = vld [vmem:[%s30853_s25 + $0x88] sm:$0xff] }
0x1275   :  { %26814 = vmatprep.subr.bf16.mxu0 %v30361_v35 }
0x1277   :  { %25235 = vmatmul.mubr.f32.gmra.mrb[46].mxu0 %v30484_v29 }
0x1278   :  { %26816 = vmatpush3.bf16.msra.mxu0 %v30361_v35  ;;  %25237 = vmatprep.mubr.f32.mxu0 %v30500_v61  ;;  %v20473_v35 = vsel %vm3798_vm5, %v21435_v18, 0 }
0x1279   :  { %26914 = vmatprep.subr.bf16.mxu0 %v30525_v10  ;;  %v30654_v38 = vand.u32 4294901760, %v20473_v35 }
0x127b   :  { %25238 = vmatmul.mubr.f32.gmra.mrb[48].mxu0 %v30514_v5 }
0x127c   :  { %25240 = vmatprep.mubr.f32.mxu0 %v30522_v49 }
0x127f   :  { %25241 = vmatmul.mubr.f32.gmra.mrb[50].mxu0 %v30536_v33 }
0x1280   :  { %25251 = vmatprep.mubr.f32.mxu0 %v30449_v46  ;;  %v30670_v46 = vsub.f32 %v20473_v35, %v30654_v38 }
0x1282   :  { %v20574_v36 = vand.u32 4294901760, %v30670_v46 }
0x1283   :  { %25252 = vmatmul.mubr.f32.vlgmr.msra.gmra.mrb[44].mxu0 %v30457_v56  ;;  %v20488_v56 = vsel %vm3798_vm5, %v21440_v59, 0 }
0x1284   :  { %26916 = vmatpush3.bf16.msra.mxu0 %v30525_v10  ;;  %25254 = vmatprep.mubr.f32.mxu0 %v30471_v16  ;;  %v20565_v16 = vsub.f32 %v30652_v32, %v20564_v51  ;;  %v20575_v52 = vsub.f32 %v30670_v46, %v20574_v36 }
0x1285   :  { %26918 = vmatprep.subr.bf16.mxu0 %v30545_v45 }
0x1286   :  { %v20566_v17 = vand.u32 4294901760, %v20565_v16  ;;  %v20576_v15 = vand.u32 4294901760, %v20575_v52 }
0x1287   :  { %25255 = vmatmul.mubr.f32.gmra.mrb[46].mxu0 %v30484_v29  ;;  %v30703_v29 = vand.u32 4294901760, %v20488_v56 }
0x1288   :  { %26920 = vmatpush3.bf16.msra.mxu0 %v30545_v45  ;;  %25257 = vmatprep.mubr.f32.mxu0 %v30500_v61  ;;  %v30713_v61 = vsub.f32 %v20485_v27, %v30695_v30 }
0x1289   :  { %26922 = vmatprep.subr.bf16.mxu0 %v30563_v54  ;;  %v30723_v20 = vsub.f32 %v20488_v56, %v30703_v29 }
0x128a   :  { %v20614_v19 = vand.u32 4294901760, %v30713_v61 }
0x128b   :  { %25258 = vmatmul.mubr.f32.gmra.mrb[48].mxu0 %v30514_v5  ;;  %v20604_v5 = vand.u32 4294901760, %v30701_v53  ;;  %v20624_v26 = vand.u32 4294901760, %v30723_v20 }
0x128c   :  { %25260 = vmatprep.mubr.f32.mxu0 %v30522_v49  ;;  %v20633_v49 = vsub.f32 %v20491_v55, %v30715_v48  ;;  %v20615_v24 = vsub.f32 %v30713_v61, %v20614_v19 }
0x128d   :  { %v20605_v58 = vsub.f32 %v30701_v53, %v20604_v5  ;;  %v20625_v9 = vsub.f32 %v30723_v20, %v20624_v26 }
0x128e   :  { %v20616_v39 = vand.u32 4294901760, %v20615_v24 }
0x128f   :  { %25261 = vmatmul.mubr.f32.gmra.mrb[50].mxu0 %v30536_v33  ;;  %v20634_v33 = vand.u32 4294901760, %v20633_v49  ;;  %v20606_v1 = vand.u32 4294901760, %v20605_v58  ;;  %v20626_v0 = vand.u32 4294901760, %v20625_v9 }
0x1290   :  { %25403 = vmatprep.mubr.f32.mxu0 %v20566_v17 }
0x1291   :  { %v20635_v7 = vsub.f32 %v20633_v49, %v20634_v33 }
0x1293   :  { %25404 = vmatmul.mubr.f32.vlgmr.msra.gmra.mrb[44].mxu0 %v20576_v15  ;;  %v20636_v37 = vand.u32 4294901760, %v20635_v7 }
0x1294   :  { %26924 = vmatpush3.bf16.msra.mxu0 %v30563_v54  ;;  %25406 = vmatprep.mubr.f32.mxu0 %v20586_v2 }
0x1295   :  { %26926 = vmatprep.subr.bf16.mxu0 %v30574_v14 }
0x1297   :  { %25407 = vmatmul.mubr.f32.gmra.mrb[46].mxu0 %v20596_v34 }
0x1298   :  { %26928 = vmatpush3.bf16.msra.mxu0 %v30574_v14  ;;  %25409 = vmatprep.mubr.f32.mxu0 %v20606_v1 }
0x1299   :  { %26930 = vmatprep.subr.bf16.mxu0 %v30538_v25 }
0x129b   :  { %25410 = vmatmul.mubr.f32.gmra.mrb[48].mxu0 %v20616_v39 }
0x129c   :  { %25412 = vmatprep.mubr.f32.mxu0 %v20626_v0 }
0x129f   :  { %25413 = vmatmul.mubr.f32.gmra.mrb[50].mxu0 %v20636_v37 }
0x12a0   :  { %25423 = vmatprep.mubr.f32.mxu0 %v30639_v63 }
0x12a3   :  { %25424 = vmatmul.mubr.f32.vlgmr.msra.gmra.mrb[44].mxu0 %v30654_v38 }
0x12a4   :  { %26932 = vmatpush3.bf16.msra.mxu0 %v30538_v25  ;;  %25426 = vmatprep.mubr.f32.mxu0 %v30657_v40 }
0x12a5   :  { %26934 = vmatprep.subr.bf16.mxu0 %v30557_v21 }
0x12a7   :  { %25427 = vmatmul.mubr.f32.gmra.mrb[46].mxu0 %v30672_v43 }
0x12a8   :  { %26936 = vmatpush3.bf16.msra.mxu0 %v30557_v21  ;;  %25429 = vmatprep.mubr.f32.mxu0 %v30679_v23 }
0x12a9   :  { %26938 = vmatprep.subr.bf16.mxu0 %v30525_v10 }
0x12ab   :  { %25430 = vmatmul.mubr.f32.gmra.mrb[48].mxu0 %v30695_v30 }
0x12ac   :  { %25432 = vmatprep.mubr.f32.mxu0 %v30703_v29 }
0x12af   :  { %25433 = vmatmul.mubr.f32.gmra.mrb[50].mxu0 %v30715_v48 }
0x12b0   :  { %25443 = vmatprep.mubr.f32.mxu0 %v30652_v32 }
0x12b3   :  { %25444 = vmatmul.mubr.f32.vlgmr.msra.gmra.mrb[44].mxu0 %v30670_v46 }
0x12b4   :  { %26940 = vmatpush3.bf16.msra.mxu0 %v30525_v10  ;;  %25446 = vmatprep.mubr.f32.mxu0 %v30677_v11 }
0x12b5   :  { %26942 = vmatprep.subr.bf16.mxu0 %v30545_v45 }
0x12b7   :  { %25447 = vmatmul.mubr.f32.gmra.mrb[46].mxu0 %v30693_v50 }
0x12b8   :  { %26944 = vmatpush3.bf16.msra.mxu0 %v30545_v45  ;;  %25449 = vmatprep.mubr.f32.mxu0 %v30701_v53 }
0x12b9   :  { %26946 = vmatprep.subr.bf16.mxu0 %v30547_v13 }
0x12bb   :  { %25450 = vmatmul.mubr.f32.gmra.mrb[48].mxu0 %v30713_v61 }
0x12bc   :  { %25452 = vmatprep.mubr.f32.mxu0 %v30723_v20 }
0x12bf   :  { %25453 = vmatmul.mubr.f32.gmra.mrb[50].mxu0 %v20633_v49 }
0x12c0   :  { %25463 = vmatprep.mubr.f32.mxu0 %v20564_v51 }
0x12c3   :  { %25464 = vmatmul.mubr.f32.vlgmr.msra.gmra.mrb[44].mxu0 %v20574_v36 }
0x12c4   :  { %26948 = vmatpush3.bf16.msra.mxu0 %v30547_v13  ;;  %25466 = vmatprep.mubr.f32.mxu0 %v20584_v8 }
0x12c5   :  { %26950 = vmatprep.subr.bf16.mxu0 %v30565_v28 }
0x12c7   :  { %25467 = vmatmul.mubr.f32.gmra.mrb[46].mxu0 %v20594_v41 }
0x12c8   :  { %26952 = vmatpush3.bf16.msra.mxu0 %v30565_v28  ;;  %25469 = vmatprep.mubr.f32.mxu0 %v20604_v5 }
0x12c9   :  { %26954 = vmatprep.subr.bf16.mxu0 %v30525_v10 }
0x12cb   :  { %25470 = vmatmul.mubr.f32.gmra.mrb[48].mxu0 %v20614_v19 }
0x12cc   :  { %25472 = vmatprep.mubr.f32.mxu0 %v20624_v26 }
0x12cf   :  { %25473 = vmatmul.mubr.f32.gmra.mrb[50].mxu0 %v20634_v33 }
0x12d0   :  { %25483 = vmatprep.mubr.f32.mxu0 %v30639_v63 }
0x12d3   :  { %25484 = vmatmul.mubr.f32.vlgmr.msra.gmra.mrb[44].mxu0 %v30654_v38 }
0x12d4   :  { %26956 = vmatpush3.bf16.msra.mxu0 %v30525_v10  ;;  %25486 = vmatprep.mubr.f32.mxu0 %v30657_v40  ;;  %v21450_v10 = vld [vmem:[%s30854_s26] ss:$0 sm:$0xff] }
0x12d5   :  { %26958 = vmatprep.subr.bf16.mxu0 %v30545_v45 }
0x12d7   :  { %25487 = vmatmul.mubr.f32.gmra.mrb[46].mxu0 %v30672_v43 }
0x12d8   :  { %26960 = vmatpush3.bf16.msra.mxu0 %v30545_v45  ;;  %25489 = vmatprep.mubr.f32.mxu0 %v30679_v23 }
0x12db   :  { %25490 = vmatmul.mubr.f32.gmra.mrb[48].mxu0 %v30695_v30 }
0x12dc   :  { %25492 = vmatprep.mubr.f32.mxu0 %v30703_v29 }
0x12df   :  { %25493 = vmatmul.mubr.f32.gmra.mrb[50].mxu0 %v30715_v48 }
0x12e0   :  { %25503 = vmatprep.mubr.f32.mxu0 %v30639_v63 }
0x12e3   :  { %25504 = vmatmul.mubr.f32.vlgmr.msra.gmra.mrb[44].mxu0 %v30654_v38 }
0x12e4   :  { %25506 = vmatprep.mubr.f32.mxu0 %v30657_v40 }
0x12e7   :  { %25507 = vmatmul.mubr.f32.gmra.mrb[46].mxu0 %v30672_v43 }
0x12e8   :  { %25509 = vmatprep.mubr.f32.mxu0 %v30679_v23 }
0x12eb   :  { %25510 = vmatmul.mubr.f32.gmra.mrb[48].mxu0 %v30695_v30 }
0x12ec   :  { %25512 = vmatprep.mubr.f32.mxu0 %v30703_v29 }
0x12ef   :  { %25513 = vmatmul.mubr.f32.gmra.mrb[50].mxu0 %v30715_v48 }
0x13b6   :  { %v25505_v25 = vpop.f32.mrb[44].mxu0 }
0x13b7   :  { %v21295_v45 = vadd.f32 %v25505_v25, %v21450_v10  ;;  %v21233_v13 = vpop.f32.mrb[45].mxu0 }
0x13b8   :  { %v21294_v21 = vadd.f32 %v21450_v10, %v21233_v13 }
0x13b9   :  { %v21452_v54 = vmul.f32 -1.442695, %v21295_v45 }
0x13ba   :  { %v21451_v28 = vmul.f32 -1.442695, %v21294_v21  ;;  %v25508_v14 = vpop.f32.mrb[46].mxu0 }
0x13bb   :  { %27519 = vpow2.f32 %v21452_v54  ;;  %v21297_v3 = vadd.f32 %v25508_v14, %v21450_v10  ;;  %v21245_v6 = vpop.f32.mrb[47].mxu0 }
0x13bc   :  { %27521 = vpow2.f32 %v21451_v28  ;;  %v21296_v18 = vadd.f32 %v21450_v10, %v21245_v6 }
0x13bd   :  { %v21454_v22 = vmul.f32 -1.442695, %v21297_v3 }
0x13be   :  { %v21453_v63 = vmul.f32 -1.442695, %v21296_v18  ;;  %v25511_v35 = vpop.f32.mrb[48].mxu0 }
0x13bf   :  { %27523 = vpow2.f32 %v21454_v22  ;;  %v21299_v12 = vadd.f32 %v25511_v35, %v21450_v10  ;;  %v21257_v57 = vpop.f32.mrb[49].mxu0 }
0x13c0   :  { %27525 = vpow2.f32 %v21453_v63  ;;  %v21298_v62 = vadd.f32 %v21450_v10, %v21257_v57 }
0x13c1   :  { %v21456_v32 = vmul.f32 -1.442695, %v21299_v12 }
0x13c2   :  { %v21455_v38 = vmul.f32 -1.442695, %v21298_v62  ;;  %v25514_v40 = vpop.f32.mrb[50].mxu0 }
0x13c3   :  { %27527 = vpow2.f32 %v21456_v32  ;;  %v21301_v47 = vadd.f32 %v25514_v40, %v21450_v10  ;;  %v21269_v4 = vpop.f32.mrb[51].mxu0 }
0x13c4   :  { %27529 = vpow2.f32 %v21455_v38  ;;  %v21300_v60 = vadd.f32 %v21450_v10, %v21269_v4 }
0x13c5   :  { %v27520_v59 = vpop.eup %27519  ;;  %v21458_v51 = vmul.f32 -1.442695, %v21301_v47 }
0x13c6   :  { %v27522_v46 = vpop.eup %27521  ;;  %v21327_v43 = vadd.f32 1.0, %v27520_v59  ;;  %v21457_v11 = vmul.f32 -1.442695, %v21300_v60 }
0x13c7   :  { %v21326_v23 = vadd.f32 1.0, %v27522_v46  ;;  %27531 = vpow2.f32 %v21458_v51 }
0x13c8   :  { %27533 = vrcp.f32 %v21327_v43 }
0x13c9   :  { %v27524_v27 = vpop.eup %27523  ;;  %27535 = vrcp.f32 %v21326_v23 }
0x13ca   :  { %v27526_v56 = vpop.eup %27525  ;;  %v21329_v31 = vadd.f32 1.0, %v27524_v27  ;;  %27537 = vpow2.f32 %v21457_v11 }
0x13cb   :  { %v21328_v16 = vadd.f32 1.0, %v27526_v56 }
0x13cc   :  { %27539 = vrcp.f32 %v21329_v31 }
0x13cd   :  { %v27528_v36 = vpop.eup %27527  ;;  %27541 = vrcp.f32 %v21328_v16 }
0x13ce   :  { %v27530_v50 = vpop.eup %27529  ;;  %v21331_v30 = vadd.f32 1.0, %v27528_v36 }
0x13cf   :  { %v21330_v8 = vadd.f32 1.0, %v27530_v50 }
0x13d0   :  { %27543 = vrcp.f32 %v21331_v30 }
0x13d1   :  { %v27532_v53 = vpop.eup %27531  ;;  %27545 = vrcp.f32 %v21330_v8 }
0x13d2   :  { %v27534_v29 = vpop.eup %27533  ;;  %v21333_v55 = vadd.f32 1.0, %v27532_v53 }
0x13d3   :  { %v27536_v52 = vpop.eup %27535  ;;  %21351 = vst.msk [vmem:[%s30855_s27 + $0x8] sm:$0xff] %vm3798_vm5, %v27534_v29 }
0x13d4   :  { %v27538_v41 = vpop.eup %27537  ;;  %21350 = vst.msk [vmem:[%s30855_s27] sm:$0xff] %vm3798_vm5, %v27536_v52  ;;  %27547 = vrcp.f32 %v21333_v55 }
0x13d5   :  { %v21332_v61 = vadd.f32 1.0, %v27538_v41 }
0x13d6   :  { %v27540_v48 = vpop.eup %27539 }
0x13d7   :  { %v27542_v17 = vpop.eup %27541  ;;  %21353 = vst.msk [vmem:[%s30855_s27 + $0x18] sm:$0xff] %vm3798_vm5, %v27540_v48  ;;  %27549 = vrcp.f32 %v21332_v61 }
0x13d8   :  { %21352 = vst.msk [vmem:[%s30855_s27 + $0x10] sm:$0xff] %vm3798_vm5, %v27542_v17 }
0x13da   :  { %v27544_v42 = vpop.eup %27543 }
0x13db   :  { %v27546_v5 = vpop.eup %27545  ;;  %21355 = vst.msk [vmem:[%s30855_s27 + $0x28] sm:$0xff] %vm3798_vm5, %v27544_v42 }
0x13dc   :  { %21354 = vst.msk [vmem:[%s30855_s27 + $0x20] sm:$0xff] %vm3798_vm5, %v27546_v5 }
0x13de   :  { %v27548_v20 = vpop.eup %27547 }
0x13df   :  { %21357 = vst.msk [vmem:[%s30855_s27 + $0x38] sm:$0xff] %vm3798_vm5, %v27548_v20 }
0x13e1   :  { %v27550_v15 = vpop.eup %27549 }
0x13e2   :  { %21356 = vst.msk [vmem:[%s30855_s27 + $0x30] sm:$0xff] %vm3798_vm5, %v27550_v15 }

</bundles_post_ra>
